<compile_context>
chip_gen: v5e
topology: v5e:2x2
jax: 0.10.0
libtpu: 0.0.40
codegen_flags: <defaults>
</compile_context>

<pallas_src>
import jax
import jax.numpy as jnp
from jax.experimental import pallas as pl
from jax.experimental.pallas import tpu as pltpu

# ----------------------------- configuration -----------------------------
B = 2            # batch
S = 8            # text sequence length
P = 4            # number of prefix tokens produced by the adapter
T = P + S        # logical full sequence length (12)
T_PAD = 16       # padded per-batch sequence length (sublane multiple of 8)
F = 16           # adapter input feature dim
A_H = 32         # adapter hidden dim
D = 64           # model hidden size
H = 4            # attention heads
HD = D // H      # head dim (16)
HD2 = HD // 2    # half head dim
FFN_I = 128      # SwiGLU intermediate size
V = 128          # vocab size
L = 2            # decoder layers
EPS = 1e-6
NEG_INF = -1e9

# Batches folded per grid step.  G = B -> single grid step (best on 1-TC
# v5e/v6e).  On v7x use G = B // 2 so each TensorCore gets one slab.
G = B
GM = G * T_PAD   # folded row count per grid step (32)
assert B % G == 0


# ------------------------------ fused kernel ------------------------------
def _fused_kernel(onehot_ref, amask_ref, feat_ref,
                  slotmask_ref, b2p_ref, cos_ref, sin_ref,
                  aw1_ref, ab1_ref, aw2_ref,
                  embed_ref, attn_norm_ref, wqkv_ref, wo_ref,
                  ffn_norm_ref, wgu_ref, wd_ref, fnorm_ref, head_ref,
                  out_ref):
    """Whole PrefixLLaMA forward for one folded batch-group (GM rows)."""
    f32 = jnp.float32
    bf16 = jnp.bfloat16

    # ---- prefix adapter MLP on the folded slab ----
    # feat rows carry features[b] at each batch's prefix rows, zeros elsewhere.
    ah = jnp.dot(feat_ref[...], aw1_ref[...],
                 preferred_element_type=f32) + ab1_ref[...]
    ah = jnp.maximum(ah, 0.0)                                     # (GM, A_H)
    # SLOTMASK selects, per row, the W2 column block of its prefix slot and
    # zeroes every non-prefix row -> adapter output lands directly in h.
    ah_big = (jnp.tile(ah, (1, P)) * slotmask_ref[...]).astype(bf16)   # (GM, P*A_H)
    h_prefix = jnp.dot(ah_big, aw2_ref[...],
                       preferred_element_type=f32) + b2p_ref[...]      # (GM, D)

    # ---- token embeddings via one-hot matmul (prefix/pad rows are zero) ----
    h = jnp.dot(onehot_ref[...], embed_ref[...],
                preferred_element_type=f32) + h_prefix                 # (GM, D)

    amask = amask_ref[...]                                        # (GM, GM)
    cos_f = cos_ref[...]                                          # (GM, D)
    sin_f = sin_ref[...]

    def rms(x, w):
        var = jnp.mean(x * x, axis=-1, keepdims=True)
        return x * jax.lax.rsqrt(var + EPS) * w

    # ---- decoder layers (statically unrolled; weights VMEM-resident) ----
    for l in range(L):
        # --- attention block ---
        xn = rms(h, attn_norm_ref[l]).astype(bf16)
        # Extended QKV: [q*s | rot_half(q)*s | k | rot_half(k) | v] in one dot;
        # rotate-half + scale were folded into the weights host-side.
        qkv = jnp.dot(xn, wqkv_ref[l], preferred_element_type=f32)     # (GM, 5D)
        q_rot = (qkv[:, 0:D] * cos_f + qkv[:, D:2 * D] * sin_f).astype(bf16)
        k_rot = (qkv[:, 2 * D:3 * D] * cos_f + qkv[:, 3 * D:4 * D] * sin_f).astype(bf16)
        vv = qkv[:, 4 * D:5 * D].astype(bf16)

        ctx = []
        for hh in range(H):
            c0 = hh * HD
            q_h = q_rot[:, c0:c0 + HD]
            k_h = k_rot[:, c0:c0 + HD]
            v_h = vv[:, c0:c0 + HD]
            s = jax.lax.dot_general(q_h, k_h, (((1,), (1,)), ((), ())),
                                    preferred_element_type=f32)        # (GM, GM)
            s = s + amask
            s = s - jnp.max(s, axis=-1, keepdims=True)
            e = jnp.exp(s)
            denom = jnp.sum(e, axis=-1, keepdims=True)
            p_attn = (e * pl.reciprocal(denom, approx=True)).astype(bf16)
            ctx.append(jnp.dot(p_attn, v_h, preferred_element_type=f32))
        ctx_all = jnp.concatenate(ctx, axis=-1).astype(bf16)           # (GM, D)
        h = h + jnp.dot(ctx_all, wo_ref[l], preferred_element_type=f32)

        # --- SwiGLU FFN block ---
        xn2 = rms(h, ffn_norm_ref[l]).astype(bf16)
        gu = jnp.dot(xn2, wgu_ref[l], preferred_element_type=f32)      # (GM, 2*FFN_I)
        g = gu[:, :FFN_I]
        u = gu[:, FFN_I:]
        act = ((g * jax.nn.sigmoid(g)) * u).astype(bf16)
        h = h + jnp.dot(act, wd_ref[l], preferred_element_type=f32)

    # ---- final norm + lm_head (lane-dense (GM, V=128) output tile) ----
    hn = rms(h, fnorm_ref[...]).astype(bf16)
    out_ref[...] = jnp.dot(hn, head_ref[...],
                           preferred_element_type=f32).astype(out_ref.dtype)


# ------------------------------ host wrapper -------------------------------
def _const_spec(shape):
    zeros = (0,) * len(shape)
    return pl.BlockSpec(shape, lambda i, zeros=zeros: zeros)


def _step_spec(shape):
    rest = tuple(shape[1:])
    zeros = (0,) * len(rest)
    return pl.BlockSpec((None,) + rest, lambda i, zeros=zeros: (i,) + zeros)


def prefix_llama_forward(params, input_ids, attention_mask, features, labels=None):
    """PrefixLLaMAModel.forward: prefix-adapter + embed + concat + LLaMA LM."""
    f32 = jnp.float32
    bf16 = jnp.bfloat16
    steps = B // G

    # ---- token one-hot (prefix & pad rows stay all-zero sentinel rows) ----
    ids_full = jnp.full((B, T_PAD), -1, jnp.int32).at[:, P:T].set(
        input_ids.astype(jnp.int32))
    onehot = (ids_full[..., None] == jnp.arange(V, dtype=jnp.int32)).astype(bf16)
    onehot = onehot.reshape(steps, GM, V)

    # ---- additive mask: block-diag over folded batches + causal + key pad ----
    full_mask = jnp.concatenate(
        [jnp.ones((B, P), f32), attention_mask.astype(f32),
         jnp.zeros((B, T_PAD - T), f32)], axis=1)                   # (B, T_PAD)
    t_idx = jnp.tile(jnp.arange(T_PAD), G)                           # (GM,)
    g_idx = jnp.repeat(jnp.arange(G), T_PAD)                         # (GM,)
    causal = t_idx[:, None] >= t_idx[None, :]
    same_b = g_idx[:, None] == g_idx[None, :]
    fm = full_mask.reshape(steps, GM)
    keep = same_b[None] & causal[None] & (fm[:, None, :] > 0)
    amask = jnp.where(keep, 0.0, NEG_INF).astype(f32)                # (steps, GM, GM)

    # ---- adapter features placed at each batch's prefix rows ----
    feat_rows = jnp.zeros((B, T_PAD, F), f32).at[:, :P, :].set(
        features[:, None, :].astype(f32))
    feat_placed = feat_rows.reshape(steps, GM, F).astype(bf16)

    # ---- prefix-slot selection / placement constants ----
    ad = params["adapter"]
    slotmask = (t_idx[:, None] ==
                jnp.repeat(jnp.arange(P), A_H)[None, :]).astype(f32)  # (GM, P*A_H)
    b2_rows = jnp.zeros((T_PAD, D), f32).at[:P].set(ad["b2"].reshape(P, D))
    b2_placed = jnp.tile(b2_rows, (G, 1))                             # (GM, D)
    w2_big = ad["w2"].reshape(A_H, P, D).transpose(1, 0, 2).reshape(
        P * A_H, D).astype(bf16)

    # ---- RoPE tables tiled to the head-contiguous Q/K lane layout ----
    inv = 1.0 / (10000.0 ** (jnp.arange(0, HD, 2, dtype=f32) / HD))
    freqs = jnp.outer(jnp.arange(T_PAD, dtype=f32), inv)              # (T_PAD, HD2)
    cos_f = jnp.tile(jnp.cos(freqs), (G, 2 * H))                      # (GM, D)
    sin_f = jnp.tile(jnp.sin(freqs), (G, 2 * H))

    # ---- bake rotate-half companion + 1/sqrt(HD) into the QKV weights ----
    rot_head = jnp.zeros((HD, HD), f32)
    rot_head = rot_head.at[jnp.arange(HD2), HD2 + jnp.arange(HD2)].set(1.0)
    rot_head = rot_head.at[HD2 + jnp.arange(HD2), jnp.arange(HD2)].set(-1.0)
    rot = jnp.kron(jnp.eye(H, dtype=f32), rot_head)                   # (D, D)
    scale = 1.0 / (HD ** 0.5)
    wqkv = params["wqkv"]
    wq, wk, wv = wqkv[:, :, :D], wqkv[:, :, D:2 * D], wqkv[:, :, 2 * D:]
    wqkv_ext = jnp.concatenate(
        [wq * scale, jnp.einsum("lde,ef->ldf", wq, rot) * scale,
         wk, jnp.einsum("lde,ef->ldf", wk, rot), wv], axis=-1).astype(bf16)  # (L, D, 5D)

    in_arrays = [
        onehot, amask, feat_placed,
        slotmask, b2_placed, cos_f, sin_f,
        ad["w1"].astype(bf16), ad["b1"], w2_big,
        params["embed"].astype(bf16),
        params["attn_norm"], wqkv_ext, params["wo"].astype(bf16),
        params["ffn_norm"], params["wgu"].astype(bf16), params["wd"].astype(bf16),
        params["final_norm"], params["lm_head"].astype(bf16),
    ]
    in_specs = ([_step_spec(onehot.shape), _step_spec(amask.shape),
                 _step_spec(feat_placed.shape)]
                + [_const_spec(a.shape) for a in in_arrays[3:]])
    out_spec = pl.BlockSpec((None, GM, V), lambda i: (i, 0, 0))

    logits_pad = pl.pallas_call(
        _fused_kernel,
        out_shape=jax.ShapeDtypeStruct((steps, GM, V), f32),
        grid=(steps,),
        in_specs=in_specs,
        out_specs=out_spec,
        compiler_params=pltpu.CompilerParams(
            dimension_semantics=("parallel",)),
    )(*in_arrays)

    logits = logits_pad.reshape(B, T_PAD, V)[:, :T, :]
    # TODO(synk): labels -> shifted cross-entropy loss (HF CausalLMOutput) not
    # implemented; this returns logits only (labels=None path).
    return logits


# --------------------------------- init ------------------------------------
def init_params(key):
    def nrm(k, shape, scale=0.02):
        return scale * jax.random.normal(k, shape, jnp.float32)

    ks = iter(jax.random.split(key, 16))
    return {
        "embed": nrm(next(ks), (V, D)),
        "adapter": {
            "w1": nrm(next(ks), (F, A_H)),
            "b1": jnp.zeros((1, A_H), jnp.float32),
            "w2": nrm(next(ks), (A_H, P * D)),
            "b2": jnp.zeros((1, P * D), jnp.float32),
        },
        "attn_norm": jnp.ones((L, 1, D), jnp.float32),
        "wqkv": nrm(next(ks), (L, D, 3 * D)),          # packed q|k|v
        "wo": nrm(next(ks), (L, D, D)),
        "ffn_norm": jnp.ones((L, 1, D), jnp.float32),
        "wgu": nrm(next(ks), (L, D, 2 * FFN_I)),       # packed gate|up
        "wd": nrm(next(ks), (L, FFN_I, D)),
        "final_norm": jnp.ones((1, D), jnp.float32),
        "lm_head": nrm(next(ks), (D, V)),
    }


if __name__ == "__main__":
    key = jax.random.PRNGKey(0)
    kp, kid, kf = jax.random.split(key, 3)
    params = init_params(kp)

    input_ids = jax.random.randint(kid, (B, S), 0, V, dtype=jnp.int32)
    attention_mask = jnp.ones((B, S), jnp.float32)
    features = jax.random.normal(kf, (B, F), jnp.float32)

    fwd = jax.jit(prefix_llama_forward)
    logits = fwd(params, input_ids, attention_mask, features)
    jax.block_until_ready(logits)

    assert logits.shape == (B, T, V), logits.shape
    assert bool(jnp.all(jnp.isfinite(logits)))
    print("KERNEL_OK")
</pallas_src>

<mosaic_0001>
module attributes {stable_mosaic.version = 11 : i64} {
  func.func @_fused_kernel(%arg0: i32, %arg1: memref<1x32x128xbf16, #tpu.memory_space<vmem>>, %arg2: memref<1x32x32xf32, #tpu.memory_space<vmem>>, %arg3: memref<1x32x16xbf16, #tpu.memory_space<vmem>>, %arg4: memref<32x128xf32, #tpu.memory_space<vmem>>, %arg5: memref<32x64xf32, #tpu.memory_space<vmem>>, %arg6: memref<32x64xf32, #tpu.memory_space<vmem>>, %arg7: memref<32x64xf32, #tpu.memory_space<vmem>>, %arg8: memref<16x32xbf16, #tpu.memory_space<vmem>>, %arg9: memref<1x32xf32, #tpu.memory_space<vmem>>, %arg10: memref<128x64xbf16, #tpu.memory_space<vmem>>, %arg11: memref<128x64xbf16, #tpu.memory_space<vmem>>, %arg12: memref<2x1x64xf32, #tpu.memory_space<vmem>>, %arg13: memref<2x64x320xbf16, #tpu.memory_space<vmem>>, %arg14: memref<2x64x64xbf16, #tpu.memory_space<vmem>>, %arg15: memref<2x1x64xf32, #tpu.memory_space<vmem>>, %arg16: memref<2x64x256xbf16, #tpu.memory_space<vmem>>, %arg17: memref<2x128x64xbf16, #tpu.memory_space<vmem>>, %arg18: memref<1x64xf32, #tpu.memory_space<vmem>>, %arg19: memref<64x128xbf16, #tpu.memory_space<vmem>>, %arg20: memref<1x32x128xf32, #tpu.memory_space<vmem>>) attributes {dimension_semantics = [#tpu.dimension_semantics<parallel>], iteration_bounds = array<i64: 1>, scalar_prefetch = 0 : i64, scratch_operands = 0 : i64, tpu.core_type = #tpu.core_type<tc>, window_params = [{transform_indices = @transform_0, window_bounds = array<i64: 1, 32, 128>}, {transform_indices = @transform_1, window_bounds = array<i64: 1, 32, 32>}, {transform_indices = @transform_2, window_bounds = array<i64: 1, 32, 16>}, {pipeline_mode = #tpu.pipeline_mode<synchronous>, transform_indices = @transform_3, window_bounds = array<i64: 32, 128>}, {pipeline_mode = #tpu.pipeline_mode<synchronous>, transform_indices = @transform_4, window_bounds = array<i64: 32, 64>}, {pipeline_mode = #tpu.pipeline_mode<synchronous>, transform_indices = @transform_5, window_bounds = array<i64: 32, 64>}, {pipeline_mode = #tpu.pipeline_mode<synchronous>, transform_indices = @transform_6, window_bounds = array<i64: 32, 64>}, {pipeline_mode = #tpu.pipeline_mode<synchronous>, transform_indices = @transform_7, window_bounds = array<i64: 16, 32>}, {pipeline_mode = #tpu.pipeline_mode<synchronous>, transform_indices = @transform_8, window_bounds = array<i64: 1, 32>}, {pipeline_mode = #tpu.pipeline_mode<synchronous>, transform_indices = @transform_9, window_bounds = array<i64: 128, 64>}, {pipeline_mode = #tpu.pipeline_mode<synchronous>, transform_indices = @transform_10, window_bounds = array<i64: 128, 64>}, {pipeline_mode = #tpu.pipeline_mode<synchronous>, transform_indices = @transform_11, window_bounds = array<i64: 2, 1, 64>}, {pipeline_mode = #tpu.pipeline_mode<synchronous>, transform_indices = @transform_12, window_bounds = array<i64: 2, 64, 320>}, {pipeline_mode = #tpu.pipeline_mode<synchronous>, transform_indices = @transform_13, window_bounds = array<i64: 2, 64, 64>}, {pipeline_mode = #tpu.pipeline_mode<synchronous>, transform_indices = @transform_14, window_bounds = array<i64: 2, 1, 64>}, {pipeline_mode = #tpu.pipeline_mode<synchronous>, transform_indices = @transform_15, window_bounds = array<i64: 2, 64, 256>}, {pipeline_mode = #tpu.pipeline_mode<synchronous>, transform_indices = @transform_16, window_bounds = array<i64: 2, 128, 64>}, {pipeline_mode = #tpu.pipeline_mode<synchronous>, transform_indices = @transform_17, window_bounds = array<i64: 1, 64>}, {pipeline_mode = #tpu.pipeline_mode<synchronous>, transform_indices = @transform_18, window_bounds = array<i64: 64, 128>}, {transform_indices = @transform_19, window_bounds = array<i64: 1, 32, 128>}]} {
    %c0 = arith.constant 0 : index
    %c0_0 = arith.constant 0 : index
    %c0_1 = arith.constant 0 : index
    %0 = vector.load %arg3[%c0, %c0_0, %c0_1] : memref<1x32x16xbf16, #tpu.memory_space<vmem>>, vector<1x32x16xbf16>
    %1 = vector.shape_cast %0 : vector<1x32x16xbf16> to vector<32x16xbf16>
    %c0_2 = arith.constant 0 : index
    %c0_3 = arith.constant 0 : index
    %2 = vector.load %arg8[%c0_2, %c0_3] : memref<16x32xbf16, #tpu.memory_space<vmem>>, vector<16x32xbf16>
    %cst = arith.constant dense<0.000000e+00> : vector<32x32xf32>
    %3 = tpu.matmul %1, %2, %cst {dimension_numbers = #tpu.dot_dimension_numbers<[1], [0], [0], [1], [0, 0, 1, 1], [], []>} : vector<32x16xbf16>, vector<16x32xbf16>, vector<32x32xf32> -> vector<32x32xf32>
    %c0_4 = arith.constant 0 : index
    %c0_5 = arith.constant 0 : index
    %4 = vector.load %arg9[%c0_4, %c0_5] : memref<1x32xf32, #tpu.memory_space<vmem>>, vector<1x32xf32>
    %5 = vector.broadcast %4 : vector<1x32xf32> to vector<32x32xf32>
    %6 = arith.addf %3, %5 : vector<32x32xf32>
    %cst_6 = arith.constant 0.000000e+00 : f32
    %7 = vector.broadcast %cst_6 : f32 to vector<32x32xf32>
    %8 = arith.maximumf %6, %7 : vector<32x32xf32>
    %9 = tpu.concatenate %8, %8, %8, %8 in 1 : vector<32x32xf32>, vector<32x32xf32>, vector<32x32xf32>, vector<32x32xf32> -> vector<32x128xf32>
    %c0_7 = arith.constant 0 : index
    %c0_8 = arith.constant 0 : index
    %10 = vector.load %arg4[%c0_7, %c0_8] : memref<32x128xf32, #tpu.memory_space<vmem>>, vector<32x128xf32>
    %11 = arith.mulf %9, %10 : vector<32x128xf32>
    %12 = arith.truncf %11 : vector<32x128xf32> to vector<32x128xbf16>
    %c0_9 = arith.constant 0 : index
    %c0_10 = arith.constant 0 : index
    %13 = vector.load %arg10[%c0_9, %c0_10] : memref<128x64xbf16, #tpu.memory_space<vmem>>, vector<128x64xbf16>
    %cst_11 = arith.constant dense<0.000000e+00> : vector<32x64xf32>
    %14 = tpu.matmul %12, %13, %cst_11 {dimension_numbers = #tpu.dot_dimension_numbers<[1], [0], [0], [1], [0, 0, 1, 1], [], []>} : vector<32x128xbf16>, vector<128x64xbf16>, vector<32x64xf32> -> vector<32x64xf32>
    %c0_12 = arith.constant 0 : index
    %c0_13 = arith.constant 0 : index
    %15 = vector.load %arg5[%c0_12, %c0_13] : memref<32x64xf32, #tpu.memory_space<vmem>>, vector<32x64xf32>
    %16 = arith.addf %14, %15 : vector<32x64xf32>
    %c0_14 = arith.constant 0 : index
    %c0_15 = arith.constant 0 : index
    %c0_16 = arith.constant 0 : index
    %17 = vector.load %arg1[%c0_14, %c0_15, %c0_16] : memref<1x32x128xbf16, #tpu.memory_space<vmem>>, vector<1x32x128xbf16>
    %18 = vector.shape_cast %17 : vector<1x32x128xbf16> to vector<32x128xbf16>
    %c0_17 = arith.constant 0 : index
    %c0_18 = arith.constant 0 : index
    %19 = vector.load %arg11[%c0_17, %c0_18] : memref<128x64xbf16, #tpu.memory_space<vmem>>, vector<128x64xbf16>
    %cst_19 = arith.constant dense<0.000000e+00> : vector<32x64xf32>
    %20 = tpu.matmul %18, %19, %cst_19 {dimension_numbers = #tpu.dot_dimension_numbers<[1], [0], [0], [1], [0, 0, 1, 1], [], []>} : vector<32x128xbf16>, vector<128x64xbf16>, vector<32x64xf32> -> vector<32x64xf32>
    %21 = arith.addf %20, %16 : vector<32x64xf32>
    %c0_20 = arith.constant 0 : index
    %c0_21 = arith.constant 0 : index
    %c0_22 = arith.constant 0 : index
    %22 = vector.load %arg2[%c0_20, %c0_21, %c0_22] : memref<1x32x32xf32, #tpu.memory_space<vmem>>, vector<1x32x32xf32>
    %23 = vector.shape_cast %22 : vector<1x32x32xf32> to vector<32x32xf32>
    %c0_23 = arith.constant 0 : index
    %c0_24 = arith.constant 0 : index
    %24 = vector.load %arg6[%c0_23, %c0_24] : memref<32x64xf32, #tpu.memory_space<vmem>>, vector<32x64xf32>
    %c0_25 = arith.constant 0 : index
    %c0_26 = arith.constant 0 : index
    %25 = vector.load %arg7[%c0_25, %c0_26] : memref<32x64xf32, #tpu.memory_space<vmem>>, vector<32x64xf32>
    %c0_27 = arith.constant 0 : index
    %c0_28 = arith.constant 0 : index
    %c0_29 = arith.constant 0 : index
    %26 = vector.load %arg12[%c0_27, %c0_28, %c0_29] : memref<2x1x64xf32, #tpu.memory_space<vmem>>, vector<1x1x64xf32>
    %27 = vector.shape_cast %26 : vector<1x1x64xf32> to vector<1x64xf32>
    %28 = arith.mulf %21, %21 : vector<32x64xf32>
    %cst_30 = arith.constant dense<0.000000e+00> : vector<32xf32>
    %29 = vector.multi_reduction <add>, %28, %cst_30 [1] : vector<32x64xf32> to vector<32xf32>
    %30 = vector.shape_cast %29 : vector<32xf32> to vector<32x1xf32>
    %cst_31 = arith.constant 6.400000e+01 : f32
    %31 = vector.broadcast %cst_31 : f32 to vector<32x1xf32>
    %32 = arith.divf %30, %31 : vector<32x1xf32>
    %cst_32 = arith.constant 9.99999997E-7 : f32
    %33 = vector.broadcast %cst_32 : f32 to vector<32x1xf32>
    %34 = arith.addf %32, %33 : vector<32x1xf32>
    %35 = math.rsqrt %34 : vector<32x1xf32>
    %36 = vector.broadcast %35 : vector<32x1xf32> to vector<32x64xf32>
    %37 = arith.mulf %21, %36 : vector<32x64xf32>
    %38 = vector.broadcast %27 : vector<1x64xf32> to vector<32x64xf32>
    %39 = arith.mulf %37, %38 : vector<32x64xf32>
    %40 = arith.truncf %39 : vector<32x64xf32> to vector<32x64xbf16>
    %c0_33 = arith.constant 0 : index
    %c0_34 = arith.constant 0 : index
    %c0_35 = arith.constant 0 : index
    %41 = vector.load %arg13[%c0_33, %c0_34, %c0_35] : memref<2x64x320xbf16, #tpu.memory_space<vmem>>, vector<1x64x320xbf16>
    %42 = vector.shape_cast %41 : vector<1x64x320xbf16> to vector<64x320xbf16>
    %cst_36 = arith.constant dense<0.000000e+00> : vector<32x320xf32>
    %43 = tpu.matmul %40, %42, %cst_36 {dimension_numbers = #tpu.dot_dimension_numbers<[1], [0], [0], [1], [0, 0, 1, 1], [], []>} : vector<32x64xbf16>, vector<64x320xbf16>, vector<32x320xf32> -> vector<32x320xf32>
    %44 = vector.extract_strided_slice %43 {offsets = [0, 0], sizes = [32, 64], strides = [1, 1]} : vector<32x320xf32> to vector<32x64xf32>
    %45 = arith.mulf %44, %24 : vector<32x64xf32>
    %46 = vector.extract_strided_slice %43 {offsets = [0, 64], sizes = [32, 64], strides = [1, 1]} : vector<32x320xf32> to vector<32x64xf32>
    %47 = arith.mulf %46, %25 : vector<32x64xf32>
    %48 = arith.addf %45, %47 : vector<32x64xf32>
    %49 = arith.truncf %48 : vector<32x64xf32> to vector<32x64xbf16>
    %50 = vector.extract_strided_slice %43 {offsets = [0, 128], sizes = [32, 64], strides = [1, 1]} : vector<32x320xf32> to vector<32x64xf32>
    %51 = arith.mulf %50, %24 : vector<32x64xf32>
    %52 = vector.extract_strided_slice %43 {offsets = [0, 192], sizes = [32, 64], strides = [1, 1]} : vector<32x320xf32> to vector<32x64xf32>
    %53 = arith.mulf %52, %25 : vector<32x64xf32>
    %54 = arith.addf %51, %53 : vector<32x64xf32>
    %55 = arith.truncf %54 : vector<32x64xf32> to vector<32x64xbf16>
    %56 = vector.extract_strided_slice %43 {offsets = [0, 256], sizes = [32, 64], strides = [1, 1]} : vector<32x320xf32> to vector<32x64xf32>
    %57 = arith.truncf %56 : vector<32x64xf32> to vector<32x64xbf16>
    %58 = vector.extract_strided_slice %49 {offsets = [0, 0], sizes = [32, 16], strides = [1, 1]} : vector<32x64xbf16> to vector<32x16xbf16>
    %59 = vector.extract_strided_slice %55 {offsets = [0, 0], sizes = [32, 16], strides = [1, 1]} : vector<32x64xbf16> to vector<32x16xbf16>
    %60 = vector.extract_strided_slice %57 {offsets = [0, 0], sizes = [32, 16], strides = [1, 1]} : vector<32x64xbf16> to vector<32x16xbf16>
    %cst_37 = arith.constant dense<0.000000e+00> : vector<32x32xf32>
    %61 = tpu.matmul %58, %59, %cst_37 {dimension_numbers = #tpu.dot_dimension_numbers<[1], [1], [0], [0], [0, 0, 1, 0], [], []>} : vector<32x16xbf16>, vector<32x16xbf16>, vector<32x32xf32> -> vector<32x32xf32>
    %62 = arith.addf %61, %23 : vector<32x32xf32>
    %cst_38 = arith.constant dense<0xFF800000> : vector<32xf32>
    %63 = vector.multi_reduction <maximumf>, %62, %cst_38 [1] : vector<32x32xf32> to vector<32xf32>
    %64 = vector.shape_cast %63 : vector<32xf32> to vector<32x1xf32>
    %65 = vector.broadcast %64 : vector<32x1xf32> to vector<32x32xf32>
    %66 = arith.subf %62, %65 : vector<32x32xf32>
    %67 = math.exp %66 : vector<32x32xf32>
    %cst_39 = arith.constant dense<0.000000e+00> : vector<32xf32>
    %68 = vector.multi_reduction <add>, %67, %cst_39 [1] : vector<32x32xf32> to vector<32xf32>
    %69 = vector.shape_cast %68 : vector<32xf32> to vector<32x1xf32>
    %70 = tpu.reciprocal %69 {approx = true} : vector<32x1xf32> -> vector<32x1xf32>
    %71 = vector.broadcast %70 : vector<32x1xf32> to vector<32x32xf32>
    %72 = arith.mulf %67, %71 : vector<32x32xf32>
    %73 = arith.truncf %72 : vector<32x32xf32> to vector<32x32xbf16>
    %cst_40 = arith.constant dense<0.000000e+00> : vector<32x16xf32>
    %74 = tpu.matmul %73, %60, %cst_40 {dimension_numbers = #tpu.dot_dimension_numbers<[1], [0], [0], [1], [0, 0, 1, 1], [], []>} : vector<32x32xbf16>, vector<32x16xbf16>, vector<32x16xf32> -> vector<32x16xf32>
    %75 = vector.extract_strided_slice %49 {offsets = [0, 16], sizes = [32, 16], strides = [1, 1]} : vector<32x64xbf16> to vector<32x16xbf16>
    %76 = vector.extract_strided_slice %55 {offsets = [0, 16], sizes = [32, 16], strides = [1, 1]} : vector<32x64xbf16> to vector<32x16xbf16>
    %77 = vector.extract_strided_slice %57 {offsets = [0, 16], sizes = [32, 16], strides = [1, 1]} : vector<32x64xbf16> to vector<32x16xbf16>
    %cst_41 = arith.constant dense<0.000000e+00> : vector<32x32xf32>
    %78 = tpu.matmul %75, %76, %cst_41 {dimension_numbers = #tpu.dot_dimension_numbers<[1], [1], [0], [0], [0, 0, 1, 0], [], []>} : vector<32x16xbf16>, vector<32x16xbf16>, vector<32x32xf32> -> vector<32x32xf32>
    %79 = arith.addf %78, %23 : vector<32x32xf32>
    %cst_42 = arith.constant dense<0xFF800000> : vector<32xf32>
    %80 = vector.multi_reduction <maximumf>, %79, %cst_42 [1] : vector<32x32xf32> to vector<32xf32>
    %81 = vector.shape_cast %80 : vector<32xf32> to vector<32x1xf32>
    %82 = vector.broadcast %81 : vector<32x1xf32> to vector<32x32xf32>
    %83 = arith.subf %79, %82 : vector<32x32xf32>
    %84 = math.exp %83 : vector<32x32xf32>
    %cst_43 = arith.constant dense<0.000000e+00> : vector<32xf32>
    %85 = vector.multi_reduction <add>, %84, %cst_43 [1] : vector<32x32xf32> to vector<32xf32>
    %86 = vector.shape_cast %85 : vector<32xf32> to vector<32x1xf32>
    %87 = tpu.reciprocal %86 {approx = true} : vector<32x1xf32> -> vector<32x1xf32>
    %88 = vector.broadcast %87 : vector<32x1xf32> to vector<32x32xf32>
    %89 = arith.mulf %84, %88 : vector<32x32xf32>
    %90 = arith.truncf %89 : vector<32x32xf32> to vector<32x32xbf16>
    %cst_44 = arith.constant dense<0.000000e+00> : vector<32x16xf32>
    %91 = tpu.matmul %90, %77, %cst_44 {dimension_numbers = #tpu.dot_dimension_numbers<[1], [0], [0], [1], [0, 0, 1, 1], [], []>} : vector<32x32xbf16>, vector<32x16xbf16>, vector<32x16xf32> -> vector<32x16xf32>
    %92 = vector.extract_strided_slice %49 {offsets = [0, 32], sizes = [32, 16], strides = [1, 1]} : vector<32x64xbf16> to vector<32x16xbf16>
    %93 = vector.extract_strided_slice %55 {offsets = [0, 32], sizes = [32, 16], strides = [1, 1]} : vector<32x64xbf16> to vector<32x16xbf16>
    %94 = vector.extract_strided_slice %57 {offsets = [0, 32], sizes = [32, 16], strides = [1, 1]} : vector<32x64xbf16> to vector<32x16xbf16>
    %cst_45 = arith.constant dense<0.000000e+00> : vector<32x32xf32>
    %95 = tpu.matmul %92, %93, %cst_45 {dimension_numbers = #tpu.dot_dimension_numbers<[1], [1], [0], [0], [0, 0, 1, 0], [], []>} : vector<32x16xbf16>, vector<32x16xbf16>, vector<32x32xf32> -> vector<32x32xf32>
    %96 = arith.addf %95, %23 : vector<32x32xf32>
    %cst_46 = arith.constant dense<0xFF800000> : vector<32xf32>
    %97 = vector.multi_reduction <maximumf>, %96, %cst_46 [1] : vector<32x32xf32> to vector<32xf32>
    %98 = vector.shape_cast %97 : vector<32xf32> to vector<32x1xf32>
    %99 = vector.broadcast %98 : vector<32x1xf32> to vector<32x32xf32>
    %100 = arith.subf %96, %99 : vector<32x32xf32>
    %101 = math.exp %100 : vector<32x32xf32>
    %cst_47 = arith.constant dense<0.000000e+00> : vector<32xf32>
    %102 = vector.multi_reduction <add>, %101, %cst_47 [1] : vector<32x32xf32> to vector<32xf32>
    %103 = vector.shape_cast %102 : vector<32xf32> to vector<32x1xf32>
    %104 = tpu.reciprocal %103 {approx = true} : vector<32x1xf32> -> vector<32x1xf32>
    %105 = vector.broadcast %104 : vector<32x1xf32> to vector<32x32xf32>
    %106 = arith.mulf %101, %105 : vector<32x32xf32>
    %107 = arith.truncf %106 : vector<32x32xf32> to vector<32x32xbf16>
    %cst_48 = arith.constant dense<0.000000e+00> : vector<32x16xf32>
    %108 = tpu.matmul %107, %94, %cst_48 {dimension_numbers = #tpu.dot_dimension_numbers<[1], [0], [0], [1], [0, 0, 1, 1], [], []>} : vector<32x32xbf16>, vector<32x16xbf16>, vector<32x16xf32> -> vector<32x16xf32>
    %109 = vector.extract_strided_slice %49 {offsets = [0, 48], sizes = [32, 16], strides = [1, 1]} : vector<32x64xbf16> to vector<32x16xbf16>
    %110 = vector.extract_strided_slice %55 {offsets = [0, 48], sizes = [32, 16], strides = [1, 1]} : vector<32x64xbf16> to vector<32x16xbf16>
    %111 = vector.extract_strided_slice %57 {offsets = [0, 48], sizes = [32, 16], strides = [1, 1]} : vector<32x64xbf16> to vector<32x16xbf16>
    %cst_49 = arith.constant dense<0.000000e+00> : vector<32x32xf32>
    %112 = tpu.matmul %109, %110, %cst_49 {dimension_numbers = #tpu.dot_dimension_numbers<[1], [1], [0], [0], [0, 0, 1, 0], [], []>} : vector<32x16xbf16>, vector<32x16xbf16>, vector<32x32xf32> -> vector<32x32xf32>
    %113 = arith.addf %112, %23 : vector<32x32xf32>
    %cst_50 = arith.constant dense<0xFF800000> : vector<32xf32>
    %114 = vector.multi_reduction <maximumf>, %113, %cst_50 [1] : vector<32x32xf32> to vector<32xf32>
    %115 = vector.shape_cast %114 : vector<32xf32> to vector<32x1xf32>
    %116 = vector.broadcast %115 : vector<32x1xf32> to vector<32x32xf32>
    %117 = arith.subf %113, %116 : vector<32x32xf32>
    %118 = math.exp %117 : vector<32x32xf32>
    %cst_51 = arith.constant dense<0.000000e+00> : vector<32xf32>
    %119 = vector.multi_reduction <add>, %118, %cst_51 [1] : vector<32x32xf32> to vector<32xf32>
    %120 = vector.shape_cast %119 : vector<32xf32> to vector<32x1xf32>
    %121 = tpu.reciprocal %120 {approx = true} : vector<32x1xf32> -> vector<32x1xf32>
    %122 = vector.broadcast %121 : vector<32x1xf32> to vector<32x32xf32>
    %123 = arith.mulf %118, %122 : vector<32x32xf32>
    %124 = arith.truncf %123 : vector<32x32xf32> to vector<32x32xbf16>
    %cst_52 = arith.constant dense<0.000000e+00> : vector<32x16xf32>
    %125 = tpu.matmul %124, %111, %cst_52 {dimension_numbers = #tpu.dot_dimension_numbers<[1], [0], [0], [1], [0, 0, 1, 1], [], []>} : vector<32x32xbf16>, vector<32x16xbf16>, vector<32x16xf32> -> vector<32x16xf32>
    %126 = tpu.concatenate %74, %91, %108, %125 in 1 : vector<32x16xf32>, vector<32x16xf32>, vector<32x16xf32>, vector<32x16xf32> -> vector<32x64xf32>
    %127 = arith.truncf %126 : vector<32x64xf32> to vector<32x64xbf16>
    %c0_53 = arith.constant 0 : index
    %c0_54 = arith.constant 0 : index
    %c0_55 = arith.constant 0 : index
    %128 = vector.load %arg14[%c0_53, %c0_54, %c0_55] : memref<2x64x64xbf16, #tpu.memory_space<vmem>>, vector<1x64x64xbf16>
    %129 = vector.shape_cast %128 : vector<1x64x64xbf16> to vector<64x64xbf16>
    %cst_56 = arith.constant dense<0.000000e+00> : vector<32x64xf32>
    %130 = tpu.matmul %127, %129, %cst_56 {dimension_numbers = #tpu.dot_dimension_numbers<[1], [0], [0], [1], [0, 0, 1, 1], [], []>} : vector<32x64xbf16>, vector<64x64xbf16>, vector<32x64xf32> -> vector<32x64xf32>
    %131 = arith.addf %21, %130 : vector<32x64xf32>
    %c0_57 = arith.constant 0 : index
    %c0_58 = arith.constant 0 : index
    %c0_59 = arith.constant 0 : index
    %132 = vector.load %arg15[%c0_57, %c0_58, %c0_59] : memref<2x1x64xf32, #tpu.memory_space<vmem>>, vector<1x1x64xf32>
    %133 = vector.shape_cast %132 : vector<1x1x64xf32> to vector<1x64xf32>
    %134 = arith.mulf %131, %131 : vector<32x64xf32>
    %cst_60 = arith.constant dense<0.000000e+00> : vector<32xf32>
    %135 = vector.multi_reduction <add>, %134, %cst_60 [1] : vector<32x64xf32> to vector<32xf32>
    %136 = vector.shape_cast %135 : vector<32xf32> to vector<32x1xf32>
    %cst_61 = arith.constant 6.400000e+01 : f32
    %137 = vector.broadcast %cst_61 : f32 to vector<32x1xf32>
    %138 = arith.divf %136, %137 : vector<32x1xf32>
    %cst_62 = arith.constant 9.99999997E-7 : f32
    %139 = vector.broadcast %cst_62 : f32 to vector<32x1xf32>
    %140 = arith.addf %138, %139 : vector<32x1xf32>
    %141 = math.rsqrt %140 : vector<32x1xf32>
    %142 = vector.broadcast %141 : vector<32x1xf32> to vector<32x64xf32>
    %143 = arith.mulf %131, %142 : vector<32x64xf32>
    %144 = vector.broadcast %133 : vector<1x64xf32> to vector<32x64xf32>
    %145 = arith.mulf %143, %144 : vector<32x64xf32>
    %146 = arith.truncf %145 : vector<32x64xf32> to vector<32x64xbf16>
    %c0_63 = arith.constant 0 : index
    %c0_64 = arith.constant 0 : index
    %c0_65 = arith.constant 0 : index
    %147 = vector.load %arg16[%c0_63, %c0_64, %c0_65] : memref<2x64x256xbf16, #tpu.memory_space<vmem>>, vector<1x64x256xbf16>
    %148 = vector.shape_cast %147 : vector<1x64x256xbf16> to vector<64x256xbf16>
    %cst_66 = arith.constant dense<0.000000e+00> : vector<32x256xf32>
    %149 = tpu.matmul %146, %148, %cst_66 {dimension_numbers = #tpu.dot_dimension_numbers<[1], [0], [0], [1], [0, 0, 1, 1], [], []>} : vector<32x64xbf16>, vector<64x256xbf16>, vector<32x256xf32> -> vector<32x256xf32>
    %150 = vector.extract_strided_slice %149 {offsets = [0, 0], sizes = [32, 128], strides = [1, 1]} : vector<32x256xf32> to vector<32x128xf32>
    %151 = vector.extract_strided_slice %149 {offsets = [0, 128], sizes = [32, 128], strides = [1, 1]} : vector<32x256xf32> to vector<32x128xf32>
    %152 = arith.negf %150 : vector<32x128xf32>
    %153 = math.exp %152 : vector<32x128xf32>
    %cst_67 = arith.constant 1.000000e+00 : f32
    %154 = vector.broadcast %cst_67 : f32 to vector<32x128xf32>
    %155 = arith.addf %154, %153 : vector<32x128xf32>
    %156 = arith.divf %154, %155 : vector<32x128xf32>
    %157 = arith.mulf %150, %156 : vector<32x128xf32>
    %158 = arith.mulf %157, %151 : vector<32x128xf32>
    %159 = arith.truncf %158 : vector<32x128xf32> to vector<32x128xbf16>
    %c0_68 = arith.constant 0 : index
    %c0_69 = arith.constant 0 : index
    %c0_70 = arith.constant 0 : index
    %160 = vector.load %arg17[%c0_68, %c0_69, %c0_70] : memref<2x128x64xbf16, #tpu.memory_space<vmem>>, vector<1x128x64xbf16>
    %161 = vector.shape_cast %160 : vector<1x128x64xbf16> to vector<128x64xbf16>
    %cst_71 = arith.constant dense<0.000000e+00> : vector<32x64xf32>
    %162 = tpu.matmul %159, %161, %cst_71 {dimension_numbers = #tpu.dot_dimension_numbers<[1], [0], [0], [1], [0, 0, 1, 1], [], []>} : vector<32x128xbf16>, vector<128x64xbf16>, vector<32x64xf32> -> vector<32x64xf32>
    %163 = arith.addf %131, %162 : vector<32x64xf32>
    %c1 = arith.constant 1 : index
    %c0_72 = arith.constant 0 : index
    %c0_73 = arith.constant 0 : index
    %164 = vector.load %arg12[%c1, %c0_72, %c0_73] : memref<2x1x64xf32, #tpu.memory_space<vmem>>, vector<1x1x64xf32>
    %165 = vector.shape_cast %164 : vector<1x1x64xf32> to vector<1x64xf32>
    %166 = arith.mulf %163, %163 : vector<32x64xf32>
    %cst_74 = arith.constant dense<0.000000e+00> : vector<32xf32>
    %167 = vector.multi_reduction <add>, %166, %cst_74 [1] : vector<32x64xf32> to vector<32xf32>
    %168 = vector.shape_cast %167 : vector<32xf32> to vector<32x1xf32>
    %cst_75 = arith.constant 6.400000e+01 : f32
    %169 = vector.broadcast %cst_75 : f32 to vector<32x1xf32>
    %170 = arith.divf %168, %169 : vector<32x1xf32>
    %cst_76 = arith.constant 9.99999997E-7 : f32
    %171 = vector.broadcast %cst_76 : f32 to vector<32x1xf32>
    %172 = arith.addf %170, %171 : vector<32x1xf32>
    %173 = math.rsqrt %172 : vector<32x1xf32>
    %174 = vector.broadcast %173 : vector<32x1xf32> to vector<32x64xf32>
    %175 = arith.mulf %163, %174 : vector<32x64xf32>
    %176 = vector.broadcast %165 : vector<1x64xf32> to vector<32x64xf32>
    %177 = arith.mulf %175, %176 : vector<32x64xf32>
    %178 = arith.truncf %177 : vector<32x64xf32> to vector<32x64xbf16>
    %c1_77 = arith.constant 1 : index
    %c0_78 = arith.constant 0 : index
    %c0_79 = arith.constant 0 : index
    %179 = vector.load %arg13[%c1_77, %c0_78, %c0_79] : memref<2x64x320xbf16, #tpu.memory_space<vmem>>, vector<1x64x320xbf16>
    %180 = vector.shape_cast %179 : vector<1x64x320xbf16> to vector<64x320xbf16>
    %cst_80 = arith.constant dense<0.000000e+00> : vector<32x320xf32>
    %181 = tpu.matmul %178, %180, %cst_80 {dimension_numbers = #tpu.dot_dimension_numbers<[1], [0], [0], [1], [0, 0, 1, 1], [], []>} : vector<32x64xbf16>, vector<64x320xbf16>, vector<32x320xf32> -> vector<32x320xf32>
    %182 = vector.extract_strided_slice %181 {offsets = [0, 0], sizes = [32, 64], strides = [1, 1]} : vector<32x320xf32> to vector<32x64xf32>
    %183 = arith.mulf %182, %24 : vector<32x64xf32>
    %184 = vector.extract_strided_slice %181 {offsets = [0, 64], sizes = [32, 64], strides = [1, 1]} : vector<32x320xf32> to vector<32x64xf32>
    %185 = arith.mulf %184, %25 : vector<32x64xf32>
    %186 = arith.addf %183, %185 : vector<32x64xf32>
    %187 = arith.truncf %186 : vector<32x64xf32> to vector<32x64xbf16>
    %188 = vector.extract_strided_slice %181 {offsets = [0, 128], sizes = [32, 64], strides = [1, 1]} : vector<32x320xf32> to vector<32x64xf32>
    %189 = arith.mulf %188, %24 : vector<32x64xf32>
    %190 = vector.extract_strided_slice %181 {offsets = [0, 192], sizes = [32, 64], strides = [1, 1]} : vector<32x320xf32> to vector<32x64xf32>
    %191 = arith.mulf %190, %25 : vector<32x64xf32>
    %192 = arith.addf %189, %191 : vector<32x64xf32>
    %193 = arith.truncf %192 : vector<32x64xf32> to vector<32x64xbf16>
    %194 = vector.extract_strided_slice %181 {offsets = [0, 256], sizes = [32, 64], strides = [1, 1]} : vector<32x320xf32> to vector<32x64xf32>
    %195 = arith.truncf %194 : vector<32x64xf32> to vector<32x64xbf16>
    %196 = vector.extract_strided_slice %187 {offsets = [0, 0], sizes = [32, 16], strides = [1, 1]} : vector<32x64xbf16> to vector<32x16xbf16>
    %197 = vector.extract_strided_slice %193 {offsets = [0, 0], sizes = [32, 16], strides = [1, 1]} : vector<32x64xbf16> to vector<32x16xbf16>
    %198 = vector.extract_strided_slice %195 {offsets = [0, 0], sizes = [32, 16], strides = [1, 1]} : vector<32x64xbf16> to vector<32x16xbf16>
    %cst_81 = arith.constant dense<0.000000e+00> : vector<32x32xf32>
    %199 = tpu.matmul %196, %197, %cst_81 {dimension_numbers = #tpu.dot_dimension_numbers<[1], [1], [0], [0], [0, 0, 1, 0], [], []>} : vector<32x16xbf16>, vector<32x16xbf16>, vector<32x32xf32> -> vector<32x32xf32>
    %200 = arith.addf %199, %23 : vector<32x32xf32>
    %cst_82 = arith.constant dense<0xFF800000> : vector<32xf32>
    %201 = vector.multi_reduction <maximumf>, %200, %cst_82 [1] : vector<32x32xf32> to vector<32xf32>
    %202 = vector.shape_cast %201 : vector<32xf32> to vector<32x1xf32>
    %203 = vector.broadcast %202 : vector<32x1xf32> to vector<32x32xf32>
    %204 = arith.subf %200, %203 : vector<32x32xf32>
    %205 = math.exp %204 : vector<32x32xf32>
    %cst_83 = arith.constant dense<0.000000e+00> : vector<32xf32>
    %206 = vector.multi_reduction <add>, %205, %cst_83 [1] : vector<32x32xf32> to vector<32xf32>
    %207 = vector.shape_cast %206 : vector<32xf32> to vector<32x1xf32>
    %208 = tpu.reciprocal %207 {approx = true} : vector<32x1xf32> -> vector<32x1xf32>
    %209 = vector.broadcast %208 : vector<32x1xf32> to vector<32x32xf32>
    %210 = arith.mulf %205, %209 : vector<32x32xf32>
    %211 = arith.truncf %210 : vector<32x32xf32> to vector<32x32xbf16>
    %cst_84 = arith.constant dense<0.000000e+00> : vector<32x16xf32>
    %212 = tpu.matmul %211, %198, %cst_84 {dimension_numbers = #tpu.dot_dimension_numbers<[1], [0], [0], [1], [0, 0, 1, 1], [], []>} : vector<32x32xbf16>, vector<32x16xbf16>, vector<32x16xf32> -> vector<32x16xf32>
    %213 = vector.extract_strided_slice %187 {offsets = [0, 16], sizes = [32, 16], strides = [1, 1]} : vector<32x64xbf16> to vector<32x16xbf16>
    %214 = vector.extract_strided_slice %193 {offsets = [0, 16], sizes = [32, 16], strides = [1, 1]} : vector<32x64xbf16> to vector<32x16xbf16>
    %215 = vector.extract_strided_slice %195 {offsets = [0, 16], sizes = [32, 16], strides = [1, 1]} : vector<32x64xbf16> to vector<32x16xbf16>
    %cst_85 = arith.constant dense<0.000000e+00> : vector<32x32xf32>
    %216 = tpu.matmul %213, %214, %cst_85 {dimension_numbers = #tpu.dot_dimension_numbers<[1], [1], [0], [0], [0, 0, 1, 0], [], []>} : vector<32x16xbf16>, vector<32x16xbf16>, vector<32x32xf32> -> vector<32x32xf32>
    %217 = arith.addf %216, %23 : vector<32x32xf32>
    %cst_86 = arith.constant dense<0xFF800000> : vector<32xf32>
    %218 = vector.multi_reduction <maximumf>, %217, %cst_86 [1] : vector<32x32xf32> to vector<32xf32>
    %219 = vector.shape_cast %218 : vector<32xf32> to vector<32x1xf32>
    %220 = vector.broadcast %219 : vector<32x1xf32> to vector<32x32xf32>
    %221 = arith.subf %217, %220 : vector<32x32xf32>
    %222 = math.exp %221 : vector<32x32xf32>
    %cst_87 = arith.constant dense<0.000000e+00> : vector<32xf32>
    %223 = vector.multi_reduction <add>, %222, %cst_87 [1] : vector<32x32xf32> to vector<32xf32>
    %224 = vector.shape_cast %223 : vector<32xf32> to vector<32x1xf32>
    %225 = tpu.reciprocal %224 {approx = true} : vector<32x1xf32> -> vector<32x1xf32>
    %226 = vector.broadcast %225 : vector<32x1xf32> to vector<32x32xf32>
    %227 = arith.mulf %222, %226 : vector<32x32xf32>
    %228 = arith.truncf %227 : vector<32x32xf32> to vector<32x32xbf16>
    %cst_88 = arith.constant dense<0.000000e+00> : vector<32x16xf32>
    %229 = tpu.matmul %228, %215, %cst_88 {dimension_numbers = #tpu.dot_dimension_numbers<[1], [0], [0], [1], [0, 0, 1, 1], [], []>} : vector<32x32xbf16>, vector<32x16xbf16>, vector<32x16xf32> -> vector<32x16xf32>
    %230 = vector.extract_strided_slice %187 {offsets = [0, 32], sizes = [32, 16], strides = [1, 1]} : vector<32x64xbf16> to vector<32x16xbf16>
    %231 = vector.extract_strided_slice %193 {offsets = [0, 32], sizes = [32, 16], strides = [1, 1]} : vector<32x64xbf16> to vector<32x16xbf16>
    %232 = vector.extract_strided_slice %195 {offsets = [0, 32], sizes = [32, 16], strides = [1, 1]} : vector<32x64xbf16> to vector<32x16xbf16>
    %cst_89 = arith.constant dense<0.000000e+00> : vector<32x32xf32>
    %233 = tpu.matmul %230, %231, %cst_89 {dimension_numbers = #tpu.dot_dimension_numbers<[1], [1], [0], [0], [0, 0, 1, 0], [], []>} : vector<32x16xbf16>, vector<32x16xbf16>, vector<32x32xf32> -> vector<32x32xf32>
    %234 = arith.addf %233, %23 : vector<32x32xf32>
    %cst_90 = arith.constant dense<0xFF800000> : vector<32xf32>
    %235 = vector.multi_reduction <maximumf>, %234, %cst_90 [1] : vector<32x32xf32> to vector<32xf32>
    %236 = vector.shape_cast %235 : vector<32xf32> to vector<32x1xf32>
    %237 = vector.broadcast %236 : vector<32x1xf32> to vector<32x32xf32>
    %238 = arith.subf %234, %237 : vector<32x32xf32>
    %239 = math.exp %238 : vector<32x32xf32>
    %cst_91 = arith.constant dense<0.000000e+00> : vector<32xf32>
    %240 = vector.multi_reduction <add>, %239, %cst_91 [1] : vector<32x32xf32> to vector<32xf32>
    %241 = vector.shape_cast %240 : vector<32xf32> to vector<32x1xf32>
    %242 = tpu.reciprocal %241 {approx = true} : vector<32x1xf32> -> vector<32x1xf32>
    %243 = vector.broadcast %242 : vector<32x1xf32> to vector<32x32xf32>
    %244 = arith.mulf %239, %243 : vector<32x32xf32>
    %245 = arith.truncf %244 : vector<32x32xf32> to vector<32x32xbf16>
    %cst_92 = arith.constant dense<0.000000e+00> : vector<32x16xf32>
    %246 = tpu.matmul %245, %232, %cst_92 {dimension_numbers = #tpu.dot_dimension_numbers<[1], [0], [0], [1], [0, 0, 1, 1], [], []>} : vector<32x32xbf16>, vector<32x16xbf16>, vector<32x16xf32> -> vector<32x16xf32>
    %247 = vector.extract_strided_slice %187 {offsets = [0, 48], sizes = [32, 16], strides = [1, 1]} : vector<32x64xbf16> to vector<32x16xbf16>
    %248 = vector.extract_strided_slice %193 {offsets = [0, 48], sizes = [32, 16], strides = [1, 1]} : vector<32x64xbf16> to vector<32x16xbf16>
    %249 = vector.extract_strided_slice %195 {offsets = [0, 48], sizes = [32, 16], strides = [1, 1]} : vector<32x64xbf16> to vector<32x16xbf16>
    %cst_93 = arith.constant dense<0.000000e+00> : vector<32x32xf32>
    %250 = tpu.matmul %247, %248, %cst_93 {dimension_numbers = #tpu.dot_dimension_numbers<[1], [1], [0], [0], [0, 0, 1, 0], [], []>} : vector<32x16xbf16>, vector<32x16xbf16>, vector<32x32xf32> -> vector<32x32xf32>
    %251 = arith.addf %250, %23 : vector<32x32xf32>
    %cst_94 = arith.constant dense<0xFF800000> : vector<32xf32>
    %252 = vector.multi_reduction <maximumf>, %251, %cst_94 [1] : vector<32x32xf32> to vector<32xf32>
    %253 = vector.shape_cast %252 : vector<32xf32> to vector<32x1xf32>
    %254 = vector.broadcast %253 : vector<32x1xf32> to vector<32x32xf32>
    %255 = arith.subf %251, %254 : vector<32x32xf32>
    %256 = math.exp %255 : vector<32x32xf32>
    %cst_95 = arith.constant dense<0.000000e+00> : vector<32xf32>
    %257 = vector.multi_reduction <add>, %256, %cst_95 [1] : vector<32x32xf32> to vector<32xf32>
    %258 = vector.shape_cast %257 : vector<32xf32> to vector<32x1xf32>
    %259 = tpu.reciprocal %258 {approx = true} : vector<32x1xf32> -> vector<32x1xf32>
    %260 = vector.broadcast %259 : vector<32x1xf32> to vector<32x32xf32>
    %261 = arith.mulf %256, %260 : vector<32x32xf32>
    %262 = arith.truncf %261 : vector<32x32xf32> to vector<32x32xbf16>
    %cst_96 = arith.constant dense<0.000000e+00> : vector<32x16xf32>
    %263 = tpu.matmul %262, %249, %cst_96 {dimension_numbers = #tpu.dot_dimension_numbers<[1], [0], [0], [1], [0, 0, 1, 1], [], []>} : vector<32x32xbf16>, vector<32x16xbf16>, vector<32x16xf32> -> vector<32x16xf32>
    %264 = tpu.concatenate %212, %229, %246, %263 in 1 : vector<32x16xf32>, vector<32x16xf32>, vector<32x16xf32>, vector<32x16xf32> -> vector<32x64xf32>
    %265 = arith.truncf %264 : vector<32x64xf32> to vector<32x64xbf16>
    %c1_97 = arith.constant 1 : index
    %c0_98 = arith.constant 0 : index
    %c0_99 = arith.constant 0 : index
    %266 = vector.load %arg14[%c1_97, %c0_98, %c0_99] : memref<2x64x64xbf16, #tpu.memory_space<vmem>>, vector<1x64x64xbf16>
    %267 = vector.shape_cast %266 : vector<1x64x64xbf16> to vector<64x64xbf16>
    %cst_100 = arith.constant dense<0.000000e+00> : vector<32x64xf32>
    %268 = tpu.matmul %265, %267, %cst_100 {dimension_numbers = #tpu.dot_dimension_numbers<[1], [0], [0], [1], [0, 0, 1, 1], [], []>} : vector<32x64xbf16>, vector<64x64xbf16>, vector<32x64xf32> -> vector<32x64xf32>
    %269 = arith.addf %163, %268 : vector<32x64xf32>
    %c1_101 = arith.constant 1 : index
    %c0_102 = arith.constant 0 : index
    %c0_103 = arith.constant 0 : index
    %270 = vector.load %arg15[%c1_101, %c0_102, %c0_103] : memref<2x1x64xf32, #tpu.memory_space<vmem>>, vector<1x1x64xf32>
    %271 = vector.shape_cast %270 : vector<1x1x64xf32> to vector<1x64xf32>
    %272 = arith.mulf %269, %269 : vector<32x64xf32>
    %cst_104 = arith.constant dense<0.000000e+00> : vector<32xf32>
    %273 = vector.multi_reduction <add>, %272, %cst_104 [1] : vector<32x64xf32> to vector<32xf32>
    %274 = vector.shape_cast %273 : vector<32xf32> to vector<32x1xf32>
    %cst_105 = arith.constant 6.400000e+01 : f32
    %275 = vector.broadcast %cst_105 : f32 to vector<32x1xf32>
    %276 = arith.divf %274, %275 : vector<32x1xf32>
    %cst_106 = arith.constant 9.99999997E-7 : f32
    %277 = vector.broadcast %cst_106 : f32 to vector<32x1xf32>
    %278 = arith.addf %276, %277 : vector<32x1xf32>
    %279 = math.rsqrt %278 : vector<32x1xf32>
    %280 = vector.broadcast %279 : vector<32x1xf32> to vector<32x64xf32>
    %281 = arith.mulf %269, %280 : vector<32x64xf32>
    %282 = vector.broadcast %271 : vector<1x64xf32> to vector<32x64xf32>
    %283 = arith.mulf %281, %282 : vector<32x64xf32>
    %284 = arith.truncf %283 : vector<32x64xf32> to vector<32x64xbf16>
    %c1_107 = arith.constant 1 : index
    %c0_108 = arith.constant 0 : index
    %c0_109 = arith.constant 0 : index
    %285 = vector.load %arg16[%c1_107, %c0_108, %c0_109] : memref<2x64x256xbf16, #tpu.memory_space<vmem>>, vector<1x64x256xbf16>
    %286 = vector.shape_cast %285 : vector<1x64x256xbf16> to vector<64x256xbf16>
    %cst_110 = arith.constant dense<0.000000e+00> : vector<32x256xf32>
    %287 = tpu.matmul %284, %286, %cst_110 {dimension_numbers = #tpu.dot_dimension_numbers<[1], [0], [0], [1], [0, 0, 1, 1], [], []>} : vector<32x64xbf16>, vector<64x256xbf16>, vector<32x256xf32> -> vector<32x256xf32>
    %288 = vector.extract_strided_slice %287 {offsets = [0, 0], sizes = [32, 128], strides = [1, 1]} : vector<32x256xf32> to vector<32x128xf32>
    %289 = vector.extract_strided_slice %287 {offsets = [0, 128], sizes = [32, 128], strides = [1, 1]} : vector<32x256xf32> to vector<32x128xf32>
    %290 = arith.negf %288 : vector<32x128xf32>
    %291 = math.exp %290 : vector<32x128xf32>
    %cst_111 = arith.constant 1.000000e+00 : f32
    %292 = vector.broadcast %cst_111 : f32 to vector<32x128xf32>
    %293 = arith.addf %292, %291 : vector<32x128xf32>
    %294 = arith.divf %292, %293 : vector<32x128xf32>
    %295 = arith.mulf %288, %294 : vector<32x128xf32>
    %296 = arith.mulf %295, %289 : vector<32x128xf32>
    %297 = arith.truncf %296 : vector<32x128xf32> to vector<32x128xbf16>
    %c1_112 = arith.constant 1 : index
    %c0_113 = arith.constant 0 : index
    %c0_114 = arith.constant 0 : index
    %298 = vector.load %arg17[%c1_112, %c0_113, %c0_114] : memref<2x128x64xbf16, #tpu.memory_space<vmem>>, vector<1x128x64xbf16>
    %299 = vector.shape_cast %298 : vector<1x128x64xbf16> to vector<128x64xbf16>
    %cst_115 = arith.constant dense<0.000000e+00> : vector<32x64xf32>
    %300 = tpu.matmul %297, %299, %cst_115 {dimension_numbers = #tpu.dot_dimension_numbers<[1], [0], [0], [1], [0, 0, 1, 1], [], []>} : vector<32x128xbf16>, vector<128x64xbf16>, vector<32x64xf32> -> vector<32x64xf32>
    %301 = arith.addf %269, %300 : vector<32x64xf32>
    %c0_116 = arith.constant 0 : index
    %c0_117 = arith.constant 0 : index
    %302 = vector.load %arg18[%c0_116, %c0_117] : memref<1x64xf32, #tpu.memory_space<vmem>>, vector<1x64xf32>
    %303 = arith.mulf %301, %301 : vector<32x64xf32>
    %cst_118 = arith.constant dense<0.000000e+00> : vector<32xf32>
    %304 = vector.multi_reduction <add>, %303, %cst_118 [1] : vector<32x64xf32> to vector<32xf32>
    %305 = vector.shape_cast %304 : vector<32xf32> to vector<32x1xf32>
    %cst_119 = arith.constant 6.400000e+01 : f32
    %306 = vector.broadcast %cst_119 : f32 to vector<32x1xf32>
    %307 = arith.divf %305, %306 : vector<32x1xf32>
    %cst_120 = arith.constant 9.99999997E-7 : f32
    %308 = vector.broadcast %cst_120 : f32 to vector<32x1xf32>
    %309 = arith.addf %307, %308 : vector<32x1xf32>
    %310 = math.rsqrt %309 : vector<32x1xf32>
    %311 = vector.broadcast %310 : vector<32x1xf32> to vector<32x64xf32>
    %312 = arith.mulf %301, %311 : vector<32x64xf32>
    %313 = vector.broadcast %302 : vector<1x64xf32> to vector<32x64xf32>
    %314 = arith.mulf %312, %313 : vector<32x64xf32>
    %315 = arith.truncf %314 : vector<32x64xf32> to vector<32x64xbf16>
    %c0_121 = arith.constant 0 : index
    %c0_122 = arith.constant 0 : index
    %316 = vector.load %arg19[%c0_121, %c0_122] : memref<64x128xbf16, #tpu.memory_space<vmem>>, vector<64x128xbf16>
    %cst_123 = arith.constant dense<0.000000e+00> : vector<32x128xf32>
    %317 = tpu.matmul %315, %316, %cst_123 {dimension_numbers = #tpu.dot_dimension_numbers<[1], [0], [0], [1], [0, 0, 1, 1], [], []>} : vector<32x64xbf16>, vector<64x128xbf16>, vector<32x128xf32> -> vector<32x128xf32>
    %c0_124 = arith.constant 0 : index
    %c0_125 = arith.constant 0 : index
    %c0_126 = arith.constant 0 : index
    %318 = vector.load %arg20[%c0_124, %c0_125, %c0_126] : memref<1x32x128xf32, #tpu.memory_space<vmem>>, vector<1x32x128xf32>
    %319 = vector.shape_cast %318 : vector<1x32x128xf32> to vector<32x128xf32>
    %320 = vector.shape_cast %317 : vector<32x128xf32> to vector<1x32x128xf32>
    tpu.vector_store %arg20[%c0_124, %c0_125, %c0_126], %320 {strides = array<i32>} : memref<1x32x128xf32, #tpu.memory_space<vmem>>, vector<1x32x128xf32>,
    return
  }
  func.func @transform_0(%arg0: i32) -> (i32, i32, i32) {
    %c0_i32 = arith.constant 0 : i32
    %c0_i32_0 = arith.constant 0 : i32
    %c0_i32_1 = arith.constant 0 : i32
    return %arg0, %c0_i32, %c0_i32_0 : i32, i32, i32
  }
  func.func @transform_1(%arg0: i32) -> (i32, i32, i32) {
    %c0_i32 = arith.constant 0 : i32
    %c0_i32_0 = arith.constant 0 : i32
    %c0_i32_1 = arith.constant 0 : i32
    return %arg0, %c0_i32, %c0_i32_0 : i32, i32, i32
  }
  func.func @transform_2(%arg0: i32) -> (i32, i32, i32) {
    %c0_i32 = arith.constant 0 : i32
    %c0_i32_0 = arith.constant 0 : i32
    %c0_i32_1 = arith.constant 0 : i32
    return %arg0, %c0_i32, %c0_i32_0 : i32, i32, i32
  }
  func.func @transform_3(%arg0: i32) -> (i32, i32) {
    %c0_i32 = arith.constant 0 : i32
    %c0_i32_0 = arith.constant 0 : i32
    %c0_i32_1 = arith.constant 0 : i32
    return %c0_i32, %c0_i32_0 : i32, i32
  }
  func.func @transform_4(%arg0: i32) -> (i32, i32) {
    %c0_i32 = arith.constant 0 : i32
    %c0_i32_0 = arith.constant 0 : i32
    %c0_i32_1 = arith.constant 0 : i32
    return %c0_i32, %c0_i32_0 : i32, i32
  }
  func.func @transform_5(%arg0: i32) -> (i32, i32) {
    %c0_i32 = arith.constant 0 : i32
    %c0_i32_0 = arith.constant 0 : i32
    %c0_i32_1 = arith.constant 0 : i32
    return %c0_i32, %c0_i32_0 : i32, i32
  }
  func.func @transform_6(%arg0: i32) -> (i32, i32) {
    %c0_i32 = arith.constant 0 : i32
    %c0_i32_0 = arith.constant 0 : i32
    %c0_i32_1 = arith.constant 0 : i32
    return %c0_i32, %c0_i32_0 : i32, i32
  }
  func.func @transform_7(%arg0: i32) -> (i32, i32) {
    %c0_i32 = arith.constant 0 : i32
    %c0_i32_0 = arith.constant 0 : i32
    %c0_i32_1 = arith.constant 0 : i32
    return %c0_i32, %c0_i32_0 : i32, i32
  }
  func.func @transform_8(%arg0: i32) -> (i32, i32) {
    %c0_i32 = arith.constant 0 : i32
    %c0_i32_0 = arith.constant 0 : i32
    %c0_i32_1 = arith.constant 0 : i32
    return %c0_i32, %c0_i32_0 : i32, i32
  }
  func.func @transform_9(%arg0: i32) -> (i32, i32) {
    %c0_i32 = arith.constant 0 : i32
    %c0_i32_0 = arith.constant 0 : i32
    %c0_i32_1 = arith.constant 0 : i32
    return %c0_i32, %c0_i32_0 : i32, i32
  }
  func.func @transform_10(%arg0: i32) -> (i32, i32) {
    %c0_i32 = arith.constant 0 : i32
    %c0_i32_0 = arith.constant 0 : i32
    %c0_i32_1 = arith.constant 0 : i32
    return %c0_i32, %c0_i32_0 : i32, i32
  }
  func.func @transform_11(%arg0: i32) -> (i32, i32, i32) {
    %c0_i32 = arith.constant 0 : i32
    %c0_i32_0 = arith.constant 0 : i32
    %c0_i32_1 = arith.constant 0 : i32
    %c0_i32_2 = arith.constant 0 : i32
    return %c0_i32, %c0_i32_0, %c0_i32_1 : i32, i32, i32
  }
  func.func @transform_12(%arg0: i32) -> (i32, i32, i32) {
    %c0_i32 = arith.constant 0 : i32
    %c0_i32_0 = arith.constant 0 : i32
    %c0_i32_1 = arith.constant 0 : i32
    %c0_i32_2 = arith.constant 0 : i32
    return %c0_i32, %c0_i32_0, %c0_i32_1 : i32, i32, i32
  }
  func.func @transform_13(%arg0: i32) -> (i32, i32, i32) {
    %c0_i32 = arith.constant 0 : i32
    %c0_i32_0 = arith.constant 0 : i32
    %c0_i32_1 = arith.constant 0 : i32
    %c0_i32_2 = arith.constant 0 : i32
    return %c0_i32, %c0_i32_0, %c0_i32_1 : i32, i32, i32
  }
  func.func @transform_14(%arg0: i32) -> (i32, i32, i32) {
    %c0_i32 = arith.constant 0 : i32
    %c0_i32_0 = arith.constant 0 : i32
    %c0_i32_1 = arith.constant 0 : i32
    %c0_i32_2 = arith.constant 0 : i32
    return %c0_i32, %c0_i32_0, %c0_i32_1 : i32, i32, i32
  }
  func.func @transform_15(%arg0: i32) -> (i32, i32, i32) {
    %c0_i32 = arith.constant 0 : i32
    %c0_i32_0 = arith.constant 0 : i32
    %c0_i32_1 = arith.constant 0 : i32
    %c0_i32_2 = arith.constant 0 : i32
    return %c0_i32, %c0_i32_0, %c0_i32_1 : i32, i32, i32
  }
  func.func @transform_16(%arg0: i32) -> (i32, i32, i32) {
    %c0_i32 = arith.constant 0 : i32
    %c0_i32_0 = arith.constant 0 : i32
    %c0_i32_1 = arith.constant 0 : i32
    %c0_i32_2 = arith.constant 0 : i32
    return %c0_i32, %c0_i32_0, %c0_i32_1 : i32, i32, i32
  }
  func.func @transform_17(%arg0: i32) -> (i32, i32) {
    %c0_i32 = arith.constant 0 : i32
    %c0_i32_0 = arith.constant 0 : i32
    %c0_i32_1 = arith.constant 0 : i32
    return %c0_i32, %c0_i32_0 : i32, i32
  }
  func.func @transform_18(%arg0: i32) -> (i32, i32) {
    %c0_i32 = arith.constant 0 : i32
    %c0_i32_0 = arith.constant 0 : i32
    %c0_i32_1 = arith.constant 0 : i32
    return %c0_i32, %c0_i32_0 : i32, i32
  }
  func.func @transform_19(%arg0: i32) -> (i32, i32, i32) {
    %c0_i32 = arith.constant 0 : i32
    %c0_i32_0 = arith.constant 0 : i32
    %c0_i32_1 = arith.constant 0 : i32
    return %arg0, %c0_i32, %c0_i32_0 : i32, i32, i32
  }
}

</mosaic_0001>

<bundles_post_ra>
// kernel: tile.37
= control target key start
LH: loop header
LB: loop body
LE: loop exit
PB: predicated region body
PF: predicated region fallthrough
CT: control target
= control target key end

     0   :  { %s442_s0 = inlined_call_operand.vmem [shape: f32[16,8], index: 0, kind: input, shape index: {}]   ;;  %s443_s1 = inlined_call_operand.vmem [shape: f32[2,16,8,8], index: 1, kind: output, shape index: {}]  }
   0x1   :  { %v4_v0 = vld [vmem:[%s442_s0] ss:$0 sm:$0xff]  ;;  %v153_v1 = vld [vmem:[%s442_s0 + $0x1] ss:$0 sm:$0xff]  ;;  %v162_v2 = vld [vmem:[%s442_s0 + $0x2] ss:$0 sm:$0xff] }
   0x2   :  { %5 = vst [vmem:[%s443_s1] sm:$0x3] %v4_v0  ;;  %v171_v3 = vld [vmem:[%s442_s0 + $0x3] ss:$0 sm:$0xff]  ;;  %v180_v4 = vld [vmem:[%s442_s0 + $0x4] ss:$0 sm:$0xff] }
   0x3   :  { %146 = vst [vmem:[%s443_s1 + $0x10] sm:$0x3] %v4_v0  ;;  %v189_v5 = vld [vmem:[%s442_s0 + $0x5] ss:$0 sm:$0xff]  ;;  %v198_v6 = vld [vmem:[%s442_s0 + $0x6] ss:$0 sm:$0xff] }
   0x4   :  { %147 = vst [vmem:[%s443_s1 + $0x20] sm:$0x3] %v4_v0  ;;  %v207_v7 = vld [vmem:[%s442_s0 + $0x7] ss:$0 sm:$0xff] }
   0x5   :  { %148 = vst [vmem:[%s443_s1 + $0x30] sm:$0x3] %v4_v0 }
   0x6   :  { %149 = vst [vmem:[%s443_s1 + $0x40] sm:$0x3] %v4_v0 }
   0x7   :  { %150 = vst [vmem:[%s443_s1 + $0x50] sm:$0x3] %v4_v0 }
   0x8   :  { %151 = vst [vmem:[%s443_s1 + $0x60] sm:$0x3] %v4_v0 }
   0x9   :  { %152 = vst [vmem:[%s443_s1 + $0x70] sm:$0x3] %v4_v0 }
   0xa   :  { %154 = vst [vmem:[%s443_s1 + $0x2] sm:$0x3] %v153_v1 }
   0xb   :  { %155 = vst [vmem:[%s443_s1 + $0x12] sm:$0x3] %v153_v1 }
   0xc   :  { %156 = vst [vmem:[%s443_s1 + $0x22] sm:$0x3] %v153_v1 }
   0xd   :  { %157 = vst [vmem:[%s443_s1 + $0x32] sm:$0x3] %v153_v1 }
   0xe   :  { %158 = vst [vmem:[%s443_s1 + $0x42] sm:$0x3] %v153_v1 }
   0xf   :  { %159 = vst [vmem:[%s443_s1 + $0x52] sm:$0x3] %v153_v1 }
  0x10   :  { %160 = vst [vmem:[%s443_s1 + $0x62] sm:$0x3] %v153_v1 }
  0x11   :  { %161 = vst [vmem:[%s443_s1 + $0x72] sm:$0x3] %v153_v1 }
  0x12   :  { %163 = vst [vmem:[%s443_s1 + $0x4] sm:$0x3] %v162_v2 }
  0x13   :  { %164 = vst [vmem:[%s443_s1 + $0x14] sm:$0x3] %v162_v2 }
  0x14   :  { %165 = vst [vmem:[%s443_s1 + $0x24] sm:$0x3] %v162_v2 }
  0x15   :  { %166 = vst [vmem:[%s443_s1 + $0x34] sm:$0x3] %v162_v2 }
  0x16   :  { %167 = vst [vmem:[%s443_s1 + $0x44] sm:$0x3] %v162_v2 }
  0x17   :  { %168 = vst [vmem:[%s443_s1 + $0x54] sm:$0x3] %v162_v2 }
  0x18   :  { %169 = vst [vmem:[%s443_s1 + $0x64] sm:$0x3] %v162_v2 }
  0x19   :  { %170 = vst [vmem:[%s443_s1 + $0x74] sm:$0x3] %v162_v2 }
  0x1a   :  { %172 = vst [vmem:[%s443_s1 + $0x6] sm:$0x3] %v171_v3 }
  0x1b   :  { %173 = vst [vmem:[%s443_s1 + $0x16] sm:$0x3] %v171_v3 }
  0x1c   :  { %174 = vst [vmem:[%s443_s1 + $0x26] sm:$0x3] %v171_v3 }
  0x1d   :  { %175 = vst [vmem:[%s443_s1 + $0x36] sm:$0x3] %v171_v3 }
  0x1e   :  { %176 = vst [vmem:[%s443_s1 + $0x46] sm:$0x3] %v171_v3 }
  0x1f   :  { %177 = vst [vmem:[%s443_s1 + $0x56] sm:$0x3] %v171_v3 }
  0x20   :  { %178 = vst [vmem:[%s443_s1 + $0x66] sm:$0x3] %v171_v3 }
  0x21   :  { %179 = vst [vmem:[%s443_s1 + $0x76] sm:$0x3] %v171_v3 }
  0x22   :  { %181 = vst [vmem:[%s443_s1 + $0x8] sm:$0x3] %v180_v4 }
  0x23   :  { %182 = vst [vmem:[%s443_s1 + $0x18] sm:$0x3] %v180_v4 }
  0x24   :  { %183 = vst [vmem:[%s443_s1 + $0x28] sm:$0x3] %v180_v4 }
  0x25   :  { %184 = vst [vmem:[%s443_s1 + $0x38] sm:$0x3] %v180_v4 }
  0x26   :  { %185 = vst [vmem:[%s443_s1 + $0x48] sm:$0x3] %v180_v4 }
  0x27   :  { %186 = vst [vmem:[%s443_s1 + $0x58] sm:$0x3] %v180_v4 }
  0x28   :  { %187 = vst [vmem:[%s443_s1 + $0x68] sm:$0x3] %v180_v4 }
  0x29   :  { %188 = vst [vmem:[%s443_s1 + $0x78] sm:$0x3] %v180_v4 }
  0x2a   :  { %190 = vst [vmem:[%s443_s1 + $0xa] sm:$0x3] %v189_v5 }
  0x2b   :  { %191 = vst [vmem:[%s443_s1 + $0x1a] sm:$0x3] %v189_v5 }
  0x2c   :  { %192 = vst [vmem:[%s443_s1 + $0x2a] sm:$0x3] %v189_v5 }
  0x2d   :  { %193 = vst [vmem:[%s443_s1 + $0x3a] sm:$0x3] %v189_v5 }
  0x2e   :  { %194 = vst [vmem:[%s443_s1 + $0x4a] sm:$0x3] %v189_v5 }
  0x2f   :  { %195 = vst [vmem:[%s443_s1 + $0x5a] sm:$0x3] %v189_v5 }
  0x30   :  { %196 = vst [vmem:[%s443_s1 + $0x6a] sm:$0x3] %v189_v5 }
  0x31   :  { %197 = vst [vmem:[%s443_s1 + $0x7a] sm:$0x3] %v189_v5 }
  0x32   :  { %199 = vst [vmem:[%s443_s1 + $0xc] sm:$0x3] %v198_v6 }
  0x33   :  { %200 = vst [vmem:[%s443_s1 + $0x1c] sm:$0x3] %v198_v6 }
  0x34   :  { %201 = vst [vmem:[%s443_s1 + $0x2c] sm:$0x3] %v198_v6 }
  0x35   :  { %202 = vst [vmem:[%s443_s1 + $0x3c] sm:$0x3] %v198_v6 }
  0x36   :  { %203 = vst [vmem:[%s443_s1 + $0x4c] sm:$0x3] %v198_v6 }
  0x37   :  { %204 = vst [vmem:[%s443_s1 + $0x5c] sm:$0x3] %v198_v6 }
  0x38   :  { %205 = vst [vmem:[%s443_s1 + $0x6c] sm:$0x3] %v198_v6 }
  0x39   :  { %206 = vst [vmem:[%s443_s1 + $0x7c] sm:$0x3] %v198_v6 }
  0x3a   :  { %208 = vst [vmem:[%s443_s1 + $0xe] sm:$0x3] %v207_v7 }
  0x3b   :  { %209 = vst [vmem:[%s443_s1 + $0x1e] sm:$0x3] %v207_v7 }
  0x3c   :  { %210 = vst [vmem:[%s443_s1 + $0x2e] sm:$0x3] %v207_v7 }
  0x3d   :  { %211 = vst [vmem:[%s443_s1 + $0x3e] sm:$0x3] %v207_v7 }
  0x3e   :  { %212 = vst [vmem:[%s443_s1 + $0x4e] sm:$0x3] %v207_v7 }
  0x3f   :  { %213 = vst [vmem:[%s443_s1 + $0x5e] sm:$0x3] %v207_v7 }
  0x40   :  { %214 = vst [vmem:[%s443_s1 + $0x6e] sm:$0x3] %v207_v7 }
  0x41   :  { %215 = vst [vmem:[%s443_s1 + $0x7e] sm:$0x3] %v207_v7 }

// kernel: tile.38
= control target key start
LH: loop header
LB: loop body
LE: loop exit
PB: predicated region body
PF: predicated region fallthrough
CT: control target
= control target key end

     0   :  { %vm260_vm0 = vcmask 1047556   ;;  %s492_s15 = smov 16   ;;  %vm262_vm1 = vcmask 130048   ;;  %vm335_vm2 = vcmask 261248   ;;  %s783_s0 = inlined_call_operand.vmem [shape: f32[2,16,8,8], index: 0, kind: input, shape index: {}]   ;;  %s784_s1 = inlined_call_operand.vmem [shape: f32[32,64], index: 1, kind: output, shape index: {}]  }
   0x1   :  { %v470_v0 = vld [vmem:[%s783_s0 + $0xe] sm:$0x3]  ;;  %v471_v1 = vld [vmem:[%s783_s0 + $0xc] sm:$0x3]  ;;  %v472_v2 = vld [vmem:[%s783_s0 + $0xa] sm:$0x3] }
   0x2   :  { %231 = vst [vmem:[#allocation0 + $0x38] sm:$0x3] %v470_v0  ;;  %v473_v3 = vld [vmem:[%s783_s0 + $0x8] sm:$0x3]  ;;  %v474_v4 = vld [vmem:[%s783_s0 + $0x6] sm:$0x3] }
   0x3   :  { %235 = vst [vmem:[#allocation0 + $0x30] sm:$0x3] %v471_v1  ;;  %v475_v5 = vld [vmem:[%s783_s0 + $0x4] sm:$0x3]  ;;  %v476_v6 = vld [vmem:[%s783_s0 + $0x2] sm:$0x3] }
   0x4   :  { %239 = vst [vmem:[#allocation0 + $0x28] sm:$0x3] %v472_v2  ;;  %v256_v7 = vld [vmem:[%s783_s0] sm:$0x3]  ;;  %v462_v8 = vld [vmem:[%s783_s0 + $0x1e] sm:$0x3] }
   0x5   :  { %243 = vst [vmem:[#allocation0 + $0x20] sm:$0x3] %v473_v3  ;;  %v463_v9 = vld [vmem:[%s783_s0 + $0x1c] sm:$0x3]  ;;  %v464_v10 = vld [vmem:[%s783_s0 + $0x1a] sm:$0x3] }
   0x6   :  { %247 = vst [vmem:[#allocation0 + $0x18] sm:$0x3] %v474_v4  ;;  %v465_v11 = vld [vmem:[%s783_s0 + $0x18] sm:$0x3]  ;;  %v466_v12 = vld [vmem:[%s783_s0 + $0x16] sm:$0x3] }
   0x7   :  { %251 = vst [vmem:[#allocation0 + $0x10] sm:$0x3] %v475_v5  ;;  %v467_v13 = vld [vmem:[%s783_s0 + $0x14] sm:$0x3]  ;;  %v468_v14 = vld [vmem:[%s783_s0 + $0x12] sm:$0x3] }
   0x8   :  { %255 = vst [vmem:[#allocation0 + $0x8] sm:$0x3] %v476_v6  ;;  %v469_v15 = vld [vmem:[%s783_s0 + $0x10] sm:$0x3]  ;;  %v438_v17 = vld [vmem:[%s783_s0 + $0x4e] sm:$0x3] }
   0x9   :  { %257 = vst [vmem:[#allocation0] sm:$0x3] %v256_v7  ;;  %v439_v18 = vld [vmem:[%s783_s0 + $0x4c] sm:$0x3]  ;;  %v440_v21 = vld [vmem:[%s783_s0 + $0x4a] sm:$0x3] }
   0xa   :  { %199 = vst [vmem:[#allocation0 + $0x78] sm:$0x3] %v462_v8  ;;  %v441_v22 = vld [vmem:[%s783_s0 + $0x48] sm:$0x3]  ;;  %v442_v23 = vld [vmem:[%s783_s0 + $0x46] sm:$0x3] }
   0xb   :  { %203 = vst [vmem:[#allocation0 + $0x70] sm:$0x3] %v463_v9  ;;  %v443_v24 = vld [vmem:[%s783_s0 + $0x44] sm:$0x3]  ;;  %v444_v25 = vld [vmem:[%s783_s0 + $0x42] sm:$0x3] }
   0xc   :  { %207 = vst [vmem:[#allocation0 + $0x68] sm:$0x3] %v464_v10  ;;  %v330_v16 = vld [vmem:[#allocation0 + $0x1] ss:$8 sm:$0xf0]  }
   0xd   :  { %211 = vst [vmem:[#allocation0 + $0x60] sm:$0x3] %v465_v11  ;;  %v445_v26 = vld [vmem:[%s783_s0 + $0x40] sm:$0x3]  ;;  %v430_v28 = vld [vmem:[%s783_s0 + $0x5e] sm:$0x3] }
   0xe   :  { %215 = vst [vmem:[#allocation0 + $0x58] sm:$0x3] %v466_v12  ;;  %v431_v29 = vld [vmem:[%s783_s0 + $0x5c] sm:$0x3]  ;;  %v432_v32 = vld [vmem:[%s783_s0 + $0x5a] sm:$0x3] }
   0xf   :  { %219 = vst [vmem:[#allocation0 + $0x50] sm:$0x3] %v467_v13  ;;  %v433_v33 = vld [vmem:[%s783_s0 + $0x58] sm:$0x3]  ;;  %v434_v34 = vld [vmem:[%s783_s0 + $0x56] sm:$0x3] }
  0x10   :  { %v328_v19 = vld [vmem:[#allocation0 + $0x1] ss:$8 sm:$0xf]   ;;  %223 = vst [vmem:[#allocation0 + $0x48] sm:$0x3] %v468_v14 }
  0x11   :  { %v332_v20 = vsel %vm260_vm0, %v330_v16, %v328_v19  ;;  %227 = vst [vmem:[#allocation0 + $0x40] sm:$0x3] %v469_v15  ;;  %v435_v35 = vld [vmem:[%s783_s0 + $0x54] sm:$0x3]  ;;  %v436_v36 = vld [vmem:[%s783_s0 + $0x52] sm:$0x3] }
  0x12   :  { %333 = vrot.lane.b32.xlu0 %v332_v20, %s492_s15  ;;  %103 = vst [vmem:[#allocation0 + $0x138] sm:$0x3] %v438_v17  ;;  %v437_v37 = vld [vmem:[%s783_s0 + $0x50] sm:$0x3]  ;;  %v446_v39 = vld [vmem:[%s783_s0 + $0x3e] sm:$0x3] }
  0x13   :  { %107 = vst [vmem:[#allocation0 + $0x130] sm:$0x3] %v439_v18  ;;  %v447_v40 = vld [vmem:[%s783_s0 + $0x3c] sm:$0x3]  ;;  %v448_v43 = vld [vmem:[%s783_s0 + $0x3a] sm:$0x3] }
  0x14   :  { %111 = vst [vmem:[#allocation0 + $0x128] sm:$0x3] %v440_v21  ;;  %v351_v27 = vld [vmem:[#allocation0 + $0x41] ss:$8 sm:$0xf0]  }
  0x15   :  { %115 = vst [vmem:[#allocation0 + $0x120] sm:$0x3] %v441_v22  ;;  %v449_v44 = vld [vmem:[%s783_s0 + $0x38] sm:$0x3]  ;;  %v450_v45 = vld [vmem:[%s783_s0 + $0x36] sm:$0x3] }
  0x16   :  { %119 = vst [vmem:[#allocation0 + $0x118] sm:$0x3] %v442_v23  ;;  %v451_v46 = vld [vmem:[%s783_s0 + $0x34] sm:$0x3]  ;;  %v452_v47 = vld [vmem:[%s783_s0 + $0x32] sm:$0x3] }
  0x17   :  { %123 = vst [vmem:[#allocation0 + $0x110] sm:$0x3] %v443_v24  ;;  %v453_v48 = vld [vmem:[%s783_s0 + $0x30] sm:$0x3]  ;;  %v414_v50 = vld [vmem:[%s783_s0 + $0x7e] sm:$0x3] }
  0x18   :  { %v349_v30 = vld [vmem:[#allocation0 + $0x41] ss:$8 sm:$0xf]   ;;  %127 = vst [vmem:[#allocation0 + $0x108] sm:$0x3] %v444_v25 }
  0x19   :  { %v353_v31 = vsel %vm260_vm0, %v351_v27, %v349_v30  ;;  %131 = vst [vmem:[#allocation0 + $0x100] sm:$0x3] %v445_v26  ;;  %v415_v51 = vld [vmem:[%s783_s0 + $0x7c] sm:$0x3]  ;;  %v416_v54 = vld [vmem:[%s783_s0 + $0x7a] sm:$0x3] }
  0x1a   :  { %354 = vrot.lane.b32.xlu1 %v353_v31, %s492_s15  ;;  %71 = vst [vmem:[#allocation0 + $0x178] sm:$0x3] %v430_v28  ;;  %v417_v55 = vld [vmem:[%s783_s0 + $0x78] sm:$0x3]  ;;  %v418_v56 = vld [vmem:[%s783_s0 + $0x76] sm:$0x3] }
  0x1b   :  { %75 = vst [vmem:[#allocation0 + $0x170] sm:$0x3] %v431_v29  ;;  %v419_v57 = vld [vmem:[%s783_s0 + $0x74] sm:$0x3]  ;;  %v420_v58 = vld [vmem:[%s783_s0 + $0x72] sm:$0x3] }
  0x1c   :  { %79 = vst [vmem:[#allocation0 + $0x168] sm:$0x3] %v432_v32  ;;  %v340_v38 = vld [vmem:[#allocation0 + $0x101] ss:$8 sm:$0xf0]  }
  0x1d   :  { %83 = vst [vmem:[#allocation0 + $0x160] sm:$0x3] %v433_v33  ;;  %v421_v59 = vld [vmem:[%s783_s0 + $0x70] sm:$0x3]  ;;  %v454_v61 = vld [vmem:[%s783_s0 + $0x2e] sm:$0x3] }
  0x1e   :  { %87 = vst [vmem:[#allocation0 + $0x158] sm:$0x3] %v434_v34  ;;  %v455_v62 = vld [vmem:[%s783_s0 + $0x2c] sm:$0x3]  ;;  %v456_v1 = vld [vmem:[%s783_s0 + $0x2a] sm:$0x3] }
  0x1f   :  { %91 = vst [vmem:[#allocation0 + $0x150] sm:$0x3] %v435_v35  ;;  %v457_v2 = vld [vmem:[%s783_s0 + $0x28] sm:$0x3]  ;;  %v458_v3 = vld [vmem:[%s783_s0 + $0x26] sm:$0x3] }
  0x20   :  { %v338_v41 = vld [vmem:[#allocation0 + $0x101] ss:$8 sm:$0xf]   ;;  %95 = vst [vmem:[#allocation0 + $0x148] sm:$0x3] %v436_v36 }
  0x21   :  { %v342_v42 = vsel %vm260_vm0, %v340_v38, %v338_v41  ;;  %99 = vst [vmem:[#allocation0 + $0x140] sm:$0x3] %v437_v37  ;;  %v459_v4 = vld [vmem:[%s783_s0 + $0x24] sm:$0x3]  ;;  %v460_v5 = vld [vmem:[%s783_s0 + $0x22] sm:$0x3] }
  0x22   :  { %343 = vrot.lane.b32.xlu0 %v342_v42, %s492_s15  ;;  %135 = vst [vmem:[#allocation0 + $0xf8] sm:$0x3] %v446_v39  ;;  %v461_v6 = vld [vmem:[%s783_s0 + $0x20] sm:$0x3]  ;;  %v422_v8 = vld [vmem:[%s783_s0 + $0x6e] sm:$0x3] }
  0x23   :  { %139 = vst [vmem:[#allocation0 + $0xf0] sm:$0x3] %v447_v40  ;;  %v423_v9 = vld [vmem:[%s783_s0 + $0x6c] sm:$0x3]  ;;  %v424_v12 = vld [vmem:[%s783_s0 + $0x6a] sm:$0x3] }
  0x24   :  { %143 = vst [vmem:[#allocation0 + $0xe8] sm:$0x3] %v448_v43  ;;  %v362_v49 = vld [vmem:[#allocation0 + $0x141] ss:$8 sm:$0xf0]  }
  0x25   :  { %147 = vst [vmem:[#allocation0 + $0xe0] sm:$0x3] %v449_v44  ;;  %v425_v13 = vld [vmem:[%s783_s0 + $0x68] sm:$0x3]  ;;  %v426_v14 = vld [vmem:[%s783_s0 + $0x66] sm:$0x3] }
  0x26   :  { %151 = vst [vmem:[#allocation0 + $0xd8] sm:$0x3] %v450_v45  ;;  %v427_v15 = vld [vmem:[%s783_s0 + $0x64] sm:$0x3]  ;;  %v428_v16 = vld [vmem:[%s783_s0 + $0x62] sm:$0x3] }
  0x27   :  { %155 = vst [vmem:[#allocation0 + $0xd0] sm:$0x3] %v451_v46  ;;  %v429_v17 = vld [vmem:[%s783_s0 + $0x60] sm:$0x3] }
  0x28   :  { %v360_v52 = vld [vmem:[#allocation0 + $0x141] ss:$8 sm:$0xf]   ;;  %159 = vst [vmem:[#allocation0 + $0xc8] sm:$0x3] %v452_v47 }
  0x29   :  { %v364_v53 = vsel %vm260_vm0, %v362_v49, %v360_v52  ;;  %163 = vst [vmem:[#allocation0 + $0xc0] sm:$0x3] %v453_v48  ;;  %v258_v24 = vld [vmem:[#allocation0] ss:$8 sm:$0xf]  }
  0x2a   :  { %365 = vrot.lane.b32.xlu1 %v364_v53, %s492_s15  ;;  %7 = vst [vmem:[#allocation0 + $0x1f8] sm:$0x3] %v414_v50  ;;  %v259_v25 = vld [vmem:[#allocation0] ss:$8 sm:$0xf0]  }
  0x2b   :  { %11 = vst [vmem:[#allocation0 + $0x1f0] sm:$0x3] %v415_v51  ;;  %v261_v26 = vsel %vm260_vm0, %v259_v25, %v258_v24  ;;  %v265_v27 = vld [vmem:[#allocation0 + $0x40] ss:$8 sm:$0xf]  }
  0x2c   :  { %15 = vst [vmem:[#allocation0 + $0x1e8] sm:$0x3] %v416_v54  ;;  %v395_v60 = vld [vmem:[#allocation0 + $0xc1] ss:$8 sm:$0xf0]  }
  0x2d   :  { %19 = vst [vmem:[#allocation0 + $0x1e0] sm:$0x3] %v417_v55  ;;  %v267_v28 = vld [vmem:[#allocation0 + $0x40] ss:$8 sm:$0xf0]  }
  0x2e   :  { %23 = vst [vmem:[#allocation0 + $0x1d8] sm:$0x3] %v418_v56  ;;  %v269_v29 = vsel %vm260_vm0, %v267_v28, %v265_v27  ;;  %v292_v33 = vld [vmem:[#allocation0 + $0x100] ss:$8 sm:$0xf]  }
  0x2f   :  { %27 = vst [vmem:[#allocation0 + $0x1d0] sm:$0x3] %v419_v57  ;;  %v294_v34 = vld [vmem:[#allocation0 + $0x100] ss:$8 sm:$0xf0]  }
  0x30   :  { %v393_v63 = vld [vmem:[#allocation0 + $0xc1] ss:$8 sm:$0xf]   ;;  %31 = vst [vmem:[#allocation0 + $0x1c8] sm:$0x3] %v420_v58  ;;  %v296_v35 = vsel %vm260_vm0, %v294_v34, %v292_v33 }
  0x31   :  { %v397_v0 = vsel %vm260_vm0, %v395_v60, %v393_v63  ;;  %35 = vst [vmem:[#allocation0 + $0x1c0] sm:$0x3] %v421_v59  ;;  %v301_v36 = vld [vmem:[#allocation0 + $0x140] ss:$8 sm:$0xf]  }
  0x32   :  { %398 = vrot.lane.b32.xlu0 %v397_v0, %s492_s15  ;;  %167 = vst [vmem:[#allocation0 + $0xb8] sm:$0x3] %v454_v61  ;;  %v303_v37 = vld [vmem:[#allocation0 + $0x140] ss:$8 sm:$0xf0]  }
  0x33   :  { %171 = vst [vmem:[#allocation0 + $0xb0] sm:$0x3] %v455_v62  ;;  %v305_v38 = vsel %vm260_vm0, %v303_v37, %v301_v36  ;;  %v283_v39 = vld [vmem:[#allocation0 + $0xc0] ss:$8 sm:$0xf]  }
  0x34   :  { %175 = vst [vmem:[#allocation0 + $0xa8] sm:$0x3] %v456_v1  ;;  %v406_v7 = vld [vmem:[#allocation0 + $0x1c1] ss:$8 sm:$0xf0]  }
  0x35   :  { %179 = vst [vmem:[#allocation0 + $0xa0] sm:$0x3] %v457_v2  ;;  %v285_v40 = vld [vmem:[#allocation0 + $0xc0] ss:$8 sm:$0xf0]  }
  0x36   :  { %183 = vst [vmem:[#allocation0 + $0x98] sm:$0x3] %v458_v3  ;;  %v287_v41 = vsel %vm260_vm0, %v285_v40, %v283_v39  ;;  %v321_v47 = vld [vmem:[#allocation0 + $0x1c0] ss:$8 sm:$0xf0]  }
  0x37   :  { %187 = vst [vmem:[#allocation0 + $0x90] sm:$0x3] %v459_v4 }
  0x38   :  { %v404_v10 = vld [vmem:[#allocation0 + $0x1c1] ss:$8 sm:$0xf]   ;;  %191 = vst [vmem:[#allocation0 + $0x88] sm:$0x3] %v460_v5 }
  0x39   :  { %v408_v11 = vsel %vm260_vm0, %v406_v7, %v404_v10  ;;  %195 = vst [vmem:[#allocation0 + $0x80] sm:$0x3] %v461_v6  ;;  %v319_v46 = vld [vmem:[#allocation0 + $0x1c0] ss:$8 sm:$0xf]  }
  0x3a   :  { %409 = vrot.lane.b32.xlu1 %v408_v11, %s492_s15  ;;  %39 = vst [vmem:[#allocation0 + $0x1b8] sm:$0x3] %v422_v8  ;;  %v323_v48 = vsel %vm260_vm0, %v321_v47, %v319_v46 }
  0x3b   :  { %43 = vst [vmem:[#allocation0 + $0x1b0] sm:$0x3] %v423_v9 }
  0x3c   :  { %47 = vst [vmem:[#allocation0 + $0x1a8] sm:$0x3] %v424_v12  ;;  %v373_v18 = vld [vmem:[#allocation0 + $0x81] ss:$8 sm:$0xf0]  }
  0x3d   :  { %51 = vst [vmem:[#allocation0 + $0x1a0] sm:$0x3] %v425_v13  ;;  %v276_v31 = vld [vmem:[#allocation0 + $0x80] ss:$8 sm:$0xf0]  }
  0x3e   :  { %55 = vst [vmem:[#allocation0 + $0x198] sm:$0x3] %v426_v14 }
  0x3f   :  { %59 = vst [vmem:[#allocation0 + $0x190] sm:$0x3] %v427_v15 }
  0x40   :  { %v371_v19 = vld [vmem:[#allocation0 + $0x81] ss:$8 sm:$0xf]   ;;  %63 = vst [vmem:[#allocation0 + $0x188] sm:$0x3] %v428_v16 }
  0x41   :  { %v375_v20 = vsel %vm260_vm0, %v373_v18, %v371_v19  ;;  %67 = vst [vmem:[#allocation0 + $0x180] sm:$0x3] %v429_v17  ;;  %v274_v30 = vld [vmem:[#allocation0 + $0x80] ss:$8 sm:$0xf]  }
  0x42   :  { %376 = vrot.lane.b32.xlu2 %v375_v20, %s492_s15  ;;  %263 = vst.msk [vmem:[%s784_s1] sm:$0xff] %vm262_vm1, %v261_v26   ;;  %v278_v32 = vsel %vm260_vm0, %v276_v31, %v274_v30 }
  0x43   :  { %477 = vst.msk [vmem:[%s784_s1 + $0x8] sm:$0xff] %vm262_vm1, %v269_v29  }
  0x44   :  { %v384_v21 = vld [vmem:[#allocation0 + $0x181] ss:$8 sm:$0xf0]   ;;  %478 = vst.msk [vmem:[%s784_s1 + $0x10] sm:$0xff] %vm262_vm1, %v278_v32  }
  0x45   :  { %480 = vst.msk [vmem:[%s784_s1 + $0x20] sm:$0xff] %vm262_vm1, %v296_v35   ;;  %v312_v44 = vld [vmem:[#allocation0 + $0x180] ss:$8 sm:$0xf0]  }
  0x46   :  { %481 = vst.msk [vmem:[%s784_s1 + $0x28] sm:$0xff] %vm262_vm1, %v305_v38  }
  0x47   :  { %479 = vst.msk [vmem:[%s784_s1 + $0x18] sm:$0xff] %vm262_vm1, %v287_v41  }
  0x48   :  { %v382_v22 = vld [vmem:[#allocation0 + $0x181] ss:$8 sm:$0xf]   ;;  %v310_v43 = vld [vmem:[#allocation0 + $0x180] ss:$8 sm:$0xf]  }
  0x49   :  { %v386_v23 = vsel %vm260_vm0, %v384_v21, %v382_v22  ;;  %v314_v45 = vsel %vm260_vm0, %v312_v44, %v310_v43  ;;  %483 = vst.msk [vmem:[%s784_s1 + $0x38] sm:$0xff] %vm262_vm1, %v323_v48  }
  0x4a   :  { %387 = vrot.lane.b32.xlu2 %v386_v23, %s492_s15  ;;  %482 = vst.msk [vmem:[%s784_s1 + $0x30] sm:$0xff] %vm262_vm1, %v314_v45  }
  0x84   :  { %v334_v42 = vpop.permute.xlu0 %333  }
  0x85   :  { %336 = vst.msk [vmem:[%s784_s1] sm:$0xff] %vm335_vm2, %v334_v42  }
  0x8c   :  { %v355_v49 = vpop.permute.xlu1 %354  }
  0x8d   :  { %485 = vst.msk [vmem:[%s784_s1 + $0x8] sm:$0xff] %vm335_vm2, %v355_v49  }
  0x94   :  { %v344_v50 = vpop.permute.xlu0 %343  }
  0x95   :  { %484 = vst.msk [vmem:[%s784_s1 + $0x20] sm:$0xff] %vm335_vm2, %v344_v50  }
  0x9c   :  { %v377_v51 = vpop.permute.xlu2 %376   ;;  %v366_v52 = vpop.permute.xlu1 %365  }
  0x9d   :  { %487 = vst.msk [vmem:[%s784_s1 + $0x10] sm:$0xff] %vm335_vm2, %v377_v51  }
  0x9e   :  { %486 = vst.msk [vmem:[%s784_s1 + $0x28] sm:$0xff] %vm335_vm2, %v366_v52  }
  0xa4   :  { %v399_v53 = vpop.permute.xlu0 %398   ;;  %v388_v54 = vpop.permute.xlu2 %387  }
  0xa5   :  { %489 = vst.msk [vmem:[%s784_s1 + $0x18] sm:$0xff] %vm335_vm2, %v399_v53  }
  0xa6   :  { %488 = vst.msk [vmem:[%s784_s1 + $0x30] sm:$0xff] %vm335_vm2, %v388_v54  }
  0xac   :  { %v410_v55 = vpop.permute.xlu1 %409  }
  0xad   :  { %490 = vst.msk [vmem:[%s784_s1 + $0x38] sm:$0xff] %vm335_vm2, %v410_v55  }

// kernel: eq.40
= control target key start
LH: loop header
LB: loop body
LE: loop exit
PB: predicated region body
PF: predicated region fallthrough
CT: control target
= control target key end

     0   :  { %s37_s8 = smov 32   ;;  %s38_s9 = smov 64   ;;  %vm7_vm0 = vcmask 261120   ;;  %vm13_vm1 = vcmask 1048320   ;;  %vm19_vm2 = vcmask 785920   ;;  %vm25_vm3 = vcmask 523520   ;;  %s55_s0 = inlined_call_operand.vmem [shape: s32[4,32], index: 0, kind: input, shape index: {}]   ;;  %s56_s1 = inlined_call_operand.vmem [shape: s32[128], index: 1, kind: output, shape index: {}]  }
   0x1   :  { %v4_v0 = vld [vmem:[%s55_s0] sm:$0xf]  ;;  %s36_s0 = smov 96  }
   0x2   :  { %5 = vst [vmem:[#allocation1] sm:$0xf] %v4_v0 }
   0x9   :  { %v10_v1 = vld [vmem:[#allocation1 + $0x3] sm:$0x1]   ;;  %v22_v2 = vld [vmem:[#allocation1 + $0x1] sm:$0x1]   ;;  %v16_v3 = vld [vmem:[#allocation1 + $0x2] sm:$0x1]  }
   0xa   :  { %11 = vrot.lane.b32.xlu0 %v10_v1, %s36_s0  ;;  %23 = vrot.lane.b32.xlu1 %v22_v2, %s37_s8  ;;  %v6_v4 = vld [vmem:[#allocation1] sm:$0x1]  }
   0xb   :  { %8 = vst.msk [vmem:[#allocation0] sm:$0x1] %vm7_vm0, %v6_v4  }
  0x12   :  { %17 = vrot.lane.b32.xlu0 %v16_v3, %s38_s9 }
  0x7c   :  { %v12_v5 = vpop.permute.xlu0 %11   ;;  %v24_v6 = vpop.permute.xlu1 %23  }
  0x7d   :  { %14 = vst.msk [vmem:[#allocation0] sm:$0x1] %vm13_vm1, %v12_v5  }
  0x84   :  { %v18_v7 = vpop.permute.xlu0 %17  }
  0x85   :  { %20 = vst.msk [vmem:[#allocation0] sm:$0x1] %vm19_vm2, %v18_v7  }
  0x86   :  { %26 = vst.msk [vmem:[#allocation0] sm:$0x1] %vm25_vm3, %v24_v6  }
  0x8d   :  { %v29_v8 = vld [vmem:[#allocation0] sm:$0x1] }
  0x8e   :  { %32 = vst [vmem:[%s56_s1] sm:$0x1] %v29_v8 }

// kernel: prefix_llama_forward.1
= control target key start
LH: loop header
LB: loop body
LE: loop exit
PB: predicated region body
PF: predicated region fallthrough
CT: control target
= control target key end

     0   :  { %vm89_vm0 = vcmask 130048   ;;  %s3877_s26 = smov 64   ;;  %s3878_s27 = smov 32   ;;  %vm159_vm1 = vcmask 261120   ;;  %vm164_vm2 = vcmask 523264   ;;  %vm169_vm3 = vcmask 785408   ;;  %s5267_s7 = inlined_call_operand.vmem [shape: bf16[16,32], index: 7, kind: input, shape index: {}]   ;;  %s5268_s2 = inlined_call_operand.vmem [shape: bf16[1,32,16], index: 2, kind: input, shape index: {}]   ;;  %s5269_s8 = inlined_call_operand.vmem [shape: f32[1,32], index: 8, kind: input, shape index: {}]   ;;  %s5270_s10 = inlined_call_operand.vmem [shape: bf16[128,64], index: 10, kind: input, shape index: {}]   ;;  %s5271_s9 = inlined_call_operand.vmem [shape: bf16[128,64], index: 9, kind: input, shape index: {}]   ;;  %s5272_s0 = inlined_call_operand.vmem [shape: bf16[1,32,128], index: 0, kind: input, shape index: {}]   ;;  %s5273_s3 = inlined_call_operand.vmem [shape: f32[32,128], index: 3, kind: input, shape index: {}]   ;;  %s5274_s4 = inlined_call_operand.vmem [shape: f32[32,64], index: 4, kind: input, shape index: {}]   ;;  %s5275_s11 = inlined_call_operand.vmem [shape: f32[2,1,64], index: 11, kind: input, shape index: {}]   ;;  %s5276_s12 = inlined_call_operand.vmem [shape: bf16[2,64,320], index: 12, kind: input, shape index: {}]   ;;  %s5277_s6 = inlined_call_operand.vmem [shape: f32[32,64], index: 6, kind: input, shape index: {}]   ;;  %s5278_s5 = inlined_call_operand.vmem [shape: f32[32,64], index: 5, kind: input, shape index: {}]   ;;  %s5279_s1 = inlined_call_operand.vmem [shape: f32[1,32,32], index: 1, kind: input, shape index: {}]   ;;  %s5280_s13 = inlined_call_operand.vmem [shape: bf16[2,64,64], index: 13, kind: input, shape index: {}]   ;;  %s5281_s14 = inlined_call_operand.vmem [shape: f32[2,1,64], index: 14, kind: input, shape index: {}]   ;;  %s5282_s15 = inlined_call_operand.vmem [shape: bf16[2,64,256], index: 15, kind: input, shape index: {}]   ;;  %s5283_s16 = inlined_call_operand.vmem [shape: bf16[2,128,64], index: 16, kind: input, shape index: {}]   ;;  %s5284_s17 = inlined_call_operand.vmem [shape: f32[1,64], index: 17, kind: input, shape index: {}]   ;;  %s5285_s18 = inlined_call_operand.vmem [shape: bf16[64,128], index: 18, kind: input, shape index: {}]   ;;  %s5286_s19 = inlined_call_operand.vmem [shape: f32[1,32,128], index: 19, kind: output, shape index: {}]  }
   0x1   :  { %5290 = sst [smem:[#allocation2_spill]] %s5267_s7  ;;  %v3513_v18 = vld [vmem:[%s5271_s9 + $0x38] sm:$0xff]  ;;  %v3512_v20 = vld [vmem:[%s5271_s9 + $0x30] sm:$0xff]  ;;  %v3511_v22 = vld [vmem:[%s5271_s9 + $0x28] sm:$0xff]  ;;  %s3880_s23 = smov 112  }
   0x2   :  { %5291 = sst [smem:[#allocation3_spill]] %s5268_s2  ;;  %252 = vmatpush.bf16.msra.mxu1 %v3513_v18  ;;  %v3510_v24 = vld [vmem:[%s5271_s9 + $0x20] sm:$0xff]  ;;  %v3509_v26 = vld [vmem:[%s5271_s9 + $0x18] sm:$0xff]  ;;  %v3508_v28 = vld [vmem:[%s5271_s9 + $0x10] sm:$0xff]  ;;  %s3881_s24 = smov 80  }
   0x3   :  { %5292 = sst [smem:[#allocation4_spill]] %s5269_s8  ;;  %v3507_v30 = vld [vmem:[%s5271_s9 + $0x8] sm:$0xff]  ;;  %v3514_v31 = vld [vmem:[%s5272_s0] sm:$0xff]  ;;  %v176_v60 = vld [vmem:[%s5273_s3 + $0x10] sm:$0xff]  ;;  %s3883_s30 = smov 48  }
   0x4   :  { %5293 = sst [smem:[#allocation5_spill]] %s5270_s10  ;;  %s3876_s10 = smov 96   ;;  %v3506_v32 = vld [vmem:[%s5271_s9] sm:$0xff]  ;;  %v3515_v33 = vld [vmem:[%s5272_s0 + $0x8] sm:$0xff]  ;;  %v177_v61 = vld [vmem:[%s5273_s3 + $0x18] sm:$0xff] }
   0x5   :  { %5294 = sst [smem:[#allocation6_spill]] %s5281_s14  ;;  %v174_v44 = vld [vmem:[%s5273_s3] sm:$0xff]  ;;  %v175_v45 = vld [vmem:[%s5273_s3 + $0x8] sm:$0xff]  ;;  %v202_v18 = vld [vmem:[%s5274_s4 + $0x10] sm:$0xff] }
   0x6   :  { %s5295_s20 = sld [smem:[#allocation2_spill]]  ;;  %253 = vmatpush.bf16.msra.mxu1 %v3512_v20 }
   0x7   :  { %s5296_s14 = sld [smem:[#allocation3_spill]] }
   0x8   :  { %s5297_s25 = sld [smem:[#allocation4_spill]] }
   0x9   :  { %s5298_s29 = sld [smem:[#allocation5_spill]] }
   0xa   :  { %254 = vmatpush.bf16.msra.mxu1 %v3511_v22 }
   0xc   :  { %v3505_v0 = vld [vmem:[%s5295_s20] sm:$0xff]  ;;  %s5301_s20 = sld [smem:[#allocation6_spill]] }
   0xd   :  { %v3503_v1 = vld [vmem:[%s5296_s14] sm:$0xff]  ;;  %103 = vmatpush.bf16.msra.mxu0 %v3505_v0  ;;  %v3504_v2 = vld [vmem:[%s5296_s14 + $0x8] sm:$0xff] }
   0xe   :  { %v3660_v3 = vld [vmem:[%s5297_s25] ss:$0 sm:$0xff]  ;;  %255 = vmatpush.bf16.msra.mxu1 %v3510_v24  ;;  %v203_v24 = vld [vmem:[%s5274_s4 + $0x18] sm:$0xff] }
   0xf   :  { %v3523_v16 = vld [vmem:[%s5298_s29 + $0x38] sm:$0xff]  ;;  %v3522_v17 = vld [vmem:[%s5298_s29 + $0x30] sm:$0xff]  ;;  %v3521_v19 = vld [vmem:[%s5298_s29 + $0x28] sm:$0xff] }
  0x10   :  { %3041 = vmatmul.msk.bf16.vlgmr.msra.gmra.mxu0 %vm89_vm0, %v3503_v1  ;;  %351 = vmatpush.bf16.msra.mxu2 %v3523_v16  ;;  %v3520_v21 = vld [vmem:[%s5298_s29 + $0x20] sm:$0xff]  ;;  %v3519_v23 = vld [vmem:[%s5298_s29 + $0x18] sm:$0xff]  ;;  %v3518_v25 = vld [vmem:[%s5298_s29 + $0x10] sm:$0xff] }
  0x11   :  { %v3517_v27 = vld [vmem:[%s5298_s29 + $0x8] sm:$0xff]  ;;  %v3516_v29 = vld [vmem:[%s5298_s29] sm:$0xff] }
  0x12   :  { %256 = vmatpush.bf16.msra.mxu1 %v3509_v26 }
  0x14   :  { %352 = vmatpush.bf16.msra.mxu2 %v3522_v17 }
  0x16   :  { %257 = vmatpush.bf16.msra.mxu1 %v3508_v28 }
  0x18   :  { %353 = vmatpush.bf16.msra.mxu2 %v3521_v19 }
  0x1a   :  { %258 = vmatpush.bf16.msra.mxu1 %v3507_v30 }
  0x1c   :  { %354 = vmatpush.bf16.msra.mxu2 %v3520_v21 }
  0x1e   :  { %259 = vmatpush.bf16.msra.mxu1 %v3506_v32  ;;  %v3879_v32 = vmov 64.0  }
  0x1f   :  { %3666 = vrcp.f32 %v3879_v32  ;;  %v378_v32 = vld [vmem:[%s5277_s6] sm:$0xff] }
  0x20   :  { %3042 = vmatmul.msk.bf16.gmra.mxu0 %vm89_vm0, %v3504_v2  ;;  %355 = vmatpush.bf16.msra.mxu2 %v3519_v23 }
  0x24   :  { %356 = vmatpush.bf16.msra.mxu2 %v3518_v25 }
  0x28   :  { %357 = vmatpush.bf16.msra.mxu2 %v3517_v27 }
  0x2c   :  { %358 = vmatpush.bf16.msra.mxu2 %v3516_v29 }
  0x2f   :  { %359 = vmatmul.bf16.vlgmr.msra.gmra.mxu2 %v3514_v31 }
  0x3f   :  { %364 = vmatmul.bf16.gmra.mxu2 %v3515_v33  ;;  %v3667_v33 = vpop.eup %3666 }
  0x40   :  { %vm404_vm4 = vweird.f32 %v3667_v33 }
  0x8d   :  { %v105_v4 = vpop.f32.mrf.mxu0 }
  0x8e   :  { %v106_v5 = vadd.f32 %v3660_v3, %v105_v4  ;;  %v200_v4 = vld [vmem:[%s5274_s4] sm:$0xff] }
  0x90   :  { %v3998_v6 = vmax.f32 %v106_v5, 0.0 }
  0x92   :  { %147 = vrot.lane.b32.xlu2 %v3998_v6, %s3876_s10  ;;  %135 = vrot.lane.b32.xlu1 %v3998_v6, %s3877_s26 }
  0x93   :  { %123 = vrot.lane.b32.xlu0 %v3998_v6, %s3878_s27 }
  0x95   :  { %v107_v7 = vpop.f32.mrf.mxu0 }
  0x96   :  { %v108_v8 = vadd.f32 %v3660_v3, %v107_v7 }
  0x98   :  { %v4006_v9 = vmax.f32 %v108_v8, 0.0 }
  0x9a   :  { %149 = vrot.lane.b32.xlu2 %v4006_v9, %s3876_s10  ;;  %137 = vrot.lane.b32.xlu1 %v4006_v9, %s3877_s26 }
  0x9b   :  { %125 = vrot.lane.b32.xlu0 %v4006_v9, %s3878_s27 }
  0x9d   :  { %v110_v10 = vpop.f32.mrf.mxu0 }
  0x9e   :  { %v111_v11 = vadd.f32 %v3660_v3, %v110_v10  ;;  %v201_v10 = vld [vmem:[%s5274_s4 + $0x8] sm:$0xff] }
  0xa0   :  { %v4014_v12 = vmax.f32 %v111_v11, 0.0 }
  0xa2   :  { %139 = vrot.lane.b32.xlu2 %v4014_v12, %s3877_s26 }
  0xa3   :  { %127 = vrot.lane.b32.xlu0 %v4014_v12, %s3878_s27 }
  0xa5   :  { %v112_v13 = vpop.f32.mrf.mxu0 }
  0xa6   :  { %v113_v14 = vadd.f32 %v3660_v3, %v112_v13 }
  0xa8   :  { %v4020_v15 = vmax.f32 %v113_v14, 0.0 }
  0xaa   :  { %153 = vrot.lane.b32.xlu2 %v4020_v15, %s3876_s10  ;;  %129 = vrot.lane.b32.xlu1 %v4020_v15, %s3878_s27 }
  0xab   :  { %141 = vrot.lane.b32.xlu0 %v4020_v15, %s3877_s26 }
  0xb2   :  { %151 = vrot.lane.b32.xlu1 %v4014_v12, %s3876_s10 }
  0xec   :  { %v148_v34 = vpop.permute.xlu2 %147 }
  0xf4   :  { %v150_v41 = vpop.permute.xlu2 %149 }
  0xfc   :  { %v140_v52 = vpop.permute.xlu2 %139 }
 0x104   :  { %v136_v35 = vpop.permute.xlu1 %135  ;;  %v154_v58 = vpop.permute.xlu2 %153 }
 0x105   :  { %v124_v36 = vpop.permute.xlu0 %123 }
 0x106   :  { %v160_v37 = vsel %vm159_vm1, %v3998_v6, %v124_v36  ;;  %v360_v6 = vpop.f32.mrf.mxu2  ;;  %v3153_v36 = vld [vmem:[%s5276_s12 + $0x48] sm:$0xf] }
 0x107   :  { %v165_v38 = vsel %vm164_vm2, %v160_v37, %v136_v35  ;;  %v3534_v37 = vld [vmem:[%s5276_s12 + $0x50] sm:$0xf0] }
 0x108   :  { %v170_v43 = vsel %vm169_vm3, %v165_v38, %v148_v34  ;;  %v400_v34 = vmul.f32 64.0, %v3667_v33  ;;  %v3533_v38 = vld [vmem:[%s5276_s12 + $0x4c] sm:$0xf] }
 0x109   :  { %v178_v48 = vmul.f32 %v174_v44, %v170_v43  ;;  %v3141_v43 = vld [vmem:[%s5276_s12 + $0x30] sm:$0xf]  ;;  %v3531_v44 = vld [vmem:[%s5276_s12 + $0x38] sm:$0xf0] }
 0x10a   :  { %v401_v35 = vsub.f32 1.0, %v400_v34  ;;  %v3661_v34 = vld [vmem:[%s5275_s11] ss:$0 sm:$0xff] }
 0x10c   :  { %v138_v39 = vpop.permute.xlu1 %137 }
 0x10d   :  { %v126_v40 = vpop.permute.xlu0 %125 }
 0x10e   :  { %v161_v42 = vsel %vm159_vm1, %v4006_v9, %v126_v40  ;;  %v362_v14 = vpop.f32.mrf.mxu2  ;;  %v3155_v40 = vld [vmem:[%s5276_s12 + $0x54] sm:$0xf0] }
 0x10f   :  { %v166_v46 = vsel %vm164_vm2, %v161_v42, %v138_v39  ;;  %v3154_v39 = vor.u32 %v3534_v37, %v3153_v36  ;;  %v402_v42 = vmul.f32 %v3667_v33, %v401_v35 }
 0x110   :  { %v171_v47 = vsel %vm169_vm3, %v166_v46, %v150_v41  ;;  %v3158_v41 = vor.u32 %v3533_v38, %v3155_v40  ;;  %v3142_v46 = vor.u32 %v3531_v44, %v3141_v43  ;;  %v3137_v38 = vld [vmem:[%s5276_s12 + $0x20] sm:$0xf] }
 0x111   :  { %v179_v49 = vmul.f32 %v175_v45, %v171_v47  ;;  %557 = vmatpush.bf16.msra.mxu3 %v3154_v39  ;;  %v3530_v45 = vld [vmem:[%s5276_s12 + $0x34] sm:$0xf]  ;;  %v3143_v47 = vld [vmem:[%s5276_s12 + $0x3c] sm:$0xf0]  ;;  %v3529_v39 = vld [vmem:[%s5276_s12 + $0x28] sm:$0xf0] }
 0x112   :  { %576 = vmatpush.bf16.msrb.mxu0 %v3158_v41 }
 0x113   :  { %v182_v50 = vpack.c.bf16 %v179_v49, %v178_v48  ;;  %v3146_v48 = vor.u32 %v3530_v45, %v3143_v47  ;;  %v403_v49 = vadd.f32 %v3667_v33, %v402_v42  ;;  %v3138_v45 = vor.u32 %v3529_v39, %v3137_v38 }
 0x115   :  { %260 = vmatmul.bf16.vlgmr.msra.gmra.mxu1 %v182_v50  ;;  %v128_v51 = vpop.permute.xlu0 %127  ;;  %558 = vmatpush.bf16.msra.mxu3 %v3142_v46  ;;  %v3129_v50 = vld [vmem:[%s5276_s12 + $0x18] sm:$0xf] }
 0x116   :  { %v162_v57 = vsel %vm159_vm1, %v4014_v12, %v128_v51  ;;  %v365_v19 = vpop.f32.mrf.mxu2  ;;  %577 = vmatpush.bf16.msrb.mxu0 %v3146_v48  ;;  %v3528_v51 = vld [vmem:[%s5276_s12 + $0x20] sm:$0xf0] }
 0x117   :  { %v167_v63 = vsel %vm164_vm2, %v162_v57, %v140_v52  ;;  %v3527_v52 = vld [vmem:[%s5276_s12 + $0x1c] sm:$0xf]  ;;  %v3117_v57 = vld [vmem:[%s5276_s12] sm:$0xf] }
 0x11c   :  { %v130_v53 = vpop.permute.xlu1 %129 }
 0x11d   :  { %v163_v54 = vsel %vm159_vm1, %v4020_v15, %v130_v53  ;;  %v142_v55 = vpop.permute.xlu0 %141  ;;  %v3130_v53 = vor.u32 %v3528_v51, %v3129_v50  ;;  %v3526_v50 = vld [vmem:[%s5276_s12 + $0x10] sm:$0xf0] }
 0x11e   :  { %v168_v56 = vsel %vm164_vm2, %v163_v54, %v142_v55  ;;  %v367_v28 = vpop.f32.mrf.mxu2  ;;  %v3131_v54 = vld [vmem:[%s5276_s12 + $0x24] sm:$0xf0] }
 0x11f   :  { %v173_v59 = vsel %vm169_vm3, %v168_v56, %v154_v58  ;;  %v3134_v55 = vor.u32 %v3527_v52, %v3131_v54  ;;  %v4180_v56 = vsel %vm404_vm4, %v3667_v33, %v403_v49  ;;  %559 = vmatpush.bf16.msra.mxu3 %v3130_v53  ;;  %v3525_v58 = vld [vmem:[%s5276_s12 + $0x8] sm:$0xf0]  ;;  %v3125_v49 = vld [vmem:[%s5276_s12 + $0x8] sm:$0xf]  ;;  %vm1232_vm4 = vcmask 392192  }
 0x120   :  { %v181_v2 = vmul.f32 %v177_v61, %v173_v59  ;;  %v3524_v59 = vld [vmem:[%s5276_s12 + $0x4] sm:$0xf]  ;;  %v3118_v61 = vor.u32 %v3525_v58, %v3117_v57  ;;  %v3126_v53 = vor.u32 %v3526_v50, %v3125_v49 }
 0x121   :  { %578 = vmatpush.bf16.msrb.mxu0 %v3134_v55 }
 0x123   :  { %560 = vmatpush.bf16.msra.mxu3 %v3118_v61 }
 0x124   :  { %v152_v62 = vpop.permute.xlu1 %151 }
 0x125   :  { %v172_v0 = vsel %vm169_vm3, %v167_v63, %v152_v62  ;;  %v3119_v62 = vld [vmem:[%s5276_s12 + $0xc] sm:$0xf0] }
 0x126   :  { %v180_v1 = vmul.f32 %v176_v60, %v172_v0  ;;  %v3122_v0 = vor.u32 %v3524_v59, %v3119_v62  ;;  %v381_v59 = vld [vmem:[%s5277_s6 + $0x18] sm:$0xff] }
 0x128   :  { %v183_v3 = vpack.c.bf16 %v181_v2, %v180_v1  ;;  %579 = vmatpush.bf16.msrb.mxu0 %v3122_v0 }
 0x12a   :  { %265 = vmatmul.bf16.gmra.mxu1 %v183_v3 }
 0x192   :  { %v261_v5 = vpop.f32.mrf.mxu1 }
 0x193   :  { %v262_v7 = vadd.f32 %v261_v5, %v200_v4 }
 0x195   :  { %v4115_v8 = vadd.f32 %v360_v6, %v262_v7 }
 0x197   :  { %v383_v9 = vmul.f32 %v4115_v8, %v4115_v8 }
 0x199   :  { %v387_v11 = vsel %vm164_vm2, %v383_v9, 0.0  ;;  %v380_v9 = vld [vmem:[%s5277_s6 + $0x10] sm:$0xff] }
 0x19a   :  { %v263_v12 = vpop.f32.mrf.mxu1  ;;  %388 = vadd.xlane.f32.xlu0 %v387_v11 }
 0x19b   :  { %v264_v13 = vadd.f32 %v263_v12, %v201_v10 }
 0x19d   :  { %v4123_v15 = vadd.f32 %v362_v14, %v264_v13 }
 0x19f   :  { %v384_v16 = vmul.f32 %v4123_v15, %v4123_v15 }
 0x1a1   :  { %v390_v17 = vsel %vm164_vm2, %v384_v16, 0.0  ;;  %v379_v16 = vld [vmem:[%s5277_s6 + $0x8] sm:$0xff]  ;;  %s3882_s6 = smov 16  }
 0x1a2   :  { %391 = vadd.xlane.f32.xlu1 %v390_v17 }
 0x1a7   :  { %v266_v20 = vpop.f32.mrf.mxu1 }
 0x1a8   :  { %v267_v21 = vadd.f32 %v266_v20, %v202_v18 }
 0x1aa   :  { %v4131_v22 = vadd.f32 %v365_v19, %v267_v21 }
 0x1ac   :  { %v385_v23 = vmul.f32 %v4131_v22, %v4131_v22 }
 0x1ae   :  { %v393_v25 = vsel %vm164_vm2, %v385_v23, 0.0  ;;  %622 = vrot.lane.b32.xlu0 %v380_v9, %s3877_s26 }
 0x1af   :  { %v268_v26 = vpop.f32.mrf.mxu1  ;;  %394 = vadd.xlane.f32.xlu2 %v393_v25  ;;  %v3535_v25 = vld [vmem:[%s5276_s12 + $0x58] sm:$0xf0] }
 0x1b0   :  { %v269_v27 = vadd.f32 %v268_v26, %v203_v24  ;;  %v3161_v24 = vld [vmem:[%s5276_s12 + $0x50] sm:$0xf] }
 0x1b2   :  { %v4139_v29 = vadd.f32 %v367_v28, %v269_v27  ;;  %v3162_v28 = vor.u32 %v3535_v25, %v3161_v24 }
 0x1b4   :  { %v386_v30 = vmul.f32 %v4139_v29, %v4139_v29  ;;  %595 = vmatpush.bf16.msrb.mxu3 %v3162_v28 }
 0x1b6   :  { %v396_v31 = vsel %vm164_vm2, %v386_v30, 0.0  ;;  %620 = vrot.lane.b32.xlu0 %v379_v16, %s3877_s26  ;;  %v3149_v30 = vld [vmem:[%s5276_s12 + $0x38] sm:$0xf] }
 0x1b7   :  { %397 = vadd.xlane.f32.xlu2 %v396_v31  ;;  %v3532_v31 = vld [vmem:[%s5276_s12 + $0x40] sm:$0xf0] }
 0x1b8   :  { %v3150_v35 = vor.u32 %v3532_v31, %v3149_v30 }
 0x1ba   :  { %596 = vmatpush.bf16.msrb.mxu3 %v3150_v35 }
 0x1bb   :  { %624 = vrot.lane.b32.xlu1 %v381_v59, %s3877_s26 }
 0x1be   :  { %597 = vmatpush.bf16.msrb.mxu3 %v3138_v45 }
 0x1c2   :  { %598 = vmatpush.bf16.msrb.mxu3 %v3126_v53  ;;  %v375_v53 = vld [vmem:[%s5278_s5 + $0x8] sm:$0xff] }
 0x1cf   :  { %618 = vrot.lane.b32.xlu2 %v378_v32, %s3877_s26 }
 0x20d   :  { %v389_v60 = vpop.xlane.xlu0 %388 }
 0x20e   :  { %v406_v63 = vmul.f32 %v4180_v56, %v389_v60 }
 0x210   :  { %v410_v1 = vadd.f32 1e-06, %v406_v63 }
 0x212   :  { %3668 = vrsqrt.f32 %v410_v1  ;;  %vm420_vm6 = vweird.f32 %v410_v1 }
 0x215   :  { %v392_v2 = vpop.xlane.xlu1 %391 }
 0x216   :  { %v407_v3 = vmul.f32 %v4180_v56, %v392_v2 }
 0x218   :  { %v3669_v4 = vpop.eup %3668  ;;  %v411_v5 = vadd.f32 1e-06, %v407_v3 }
 0x219   :  { %v415_v6 = vmul.f32 %v3669_v4, %v410_v1  ;;  %vm421_vm5 = vweird.f32 %v3669_v4 }
 0x21a   :  { %3670 = vrsqrt.f32 %v411_v5  ;;  %vm4205_vm7 = vmor %vm420_vm6, %vm421_vm5  ;;  %vm430_vm9 = vweird.f32 %v411_v5 }
 0x21b   :  { %v416_v7 = vmul.f32 %v3669_v4, %v415_v6 }
 0x21d   :  { %v417_v10 = vmul.f32 0.5, %v416_v7 }
 0x21f   :  { %v418_v11 = vsub.f32 1.5, %v417_v10 }
 0x220   :  { %v3671_v12 = vpop.eup %3670 }
 0x221   :  { %v425_v13 = vmul.f32 %v3671_v12, %v411_v5  ;;  %v419_v17 = vmul.f32 %v3669_v4, %v418_v11  ;;  %vm431_vm8 = vweird.f32 %v3671_v12 }
 0x222   :  { %v395_v14 = vpop.xlane.xlu2 %394  ;;  %vm432_vm10 = vmor %vm430_vm9, %vm431_vm8 }
 0x223   :  { %v426_v18 = vmul.f32 %v3671_v12, %v425_v13  ;;  %v408_v19 = vmul.f32 %v4180_v56, %v395_v14  ;;  %v423_v26 = vsel %vm4205_vm7, %v3669_v4, %v419_v17 }
 0x224   :  { %v454_v37 = vmul.f32 %v423_v26, %v4115_v8 }
 0x225   :  { %v427_v20 = vmul.f32 0.5, %v426_v18  ;;  %v412_v21 = vadd.f32 1e-06, %v408_v19 }
 0x226   :  { %v461_v47 = vmul.f32 %v3661_v34, %v454_v37 }
 0x227   :  { %v428_v27 = vsub.f32 1.5, %v427_v20  ;;  %3672 = vrsqrt.f32 %v412_v21  ;;  %vm440_vm12 = vweird.f32 %v412_v21 }
 0x229   :  { %v429_v33 = vmul.f32 %v3671_v12, %v428_v27 }
 0x22a   :  { %v398_v36 = vpop.xlane.xlu2 %397 }
 0x22b   :  { %v409_v40 = vmul.f32 %v4180_v56, %v398_v36  ;;  %v433_v41 = vsel %vm432_vm10, %v3671_v12, %v429_v33  ;;  %v4262_v12 = vpop.permute.xlu0 %622 }
 0x22c   :  { %v455_v42 = vmul.f32 %v433_v41, %v4123_v15 }
 0x22d   :  { %v3673_v43 = vpop.eup %3672  ;;  %v413_v44 = vadd.f32 1e-06, %v409_v40  ;;  %v4274_v23 = vpop.permute.xlu1 %624 }
 0x22e   :  { %v435_v46 = vmul.f32 %v3673_v43, %v412_v21  ;;  %v462_v48 = vmul.f32 %v3661_v34, %v455_v42  ;;  %vm441_vm11 = vweird.f32 %v3673_v43 }
 0x22f   :  { %3674 = vrsqrt.f32 %v413_v44  ;;  %vm442_vm13 = vmor %vm440_vm12, %vm441_vm11  ;;  %vm450_vm15 = vweird.f32 %v413_v44 }
 0x230   :  { %v436_v51 = vmul.f32 %v3673_v43, %v435_v46  ;;  %v465_v52 = vpack.c.bf16 %v462_v48, %v461_v47  ;;  %v374_v46 = vld [vmem:[%s5278_s5] sm:$0xff]  ;;  %v376_v47 = vld [vmem:[%s5278_s5 + $0x10] sm:$0xff] }
 0x232   :  { %v437_v54 = vmul.f32 0.5, %v436_v51  ;;  %3163 = vmatmul.msk.bf16.vlgmr.msra.gmra.mxu3 %vm164_vm2, %v465_v52  ;;  %3165 = vmatmul.msk.bf16.vlgmr.msrb.gmra.mxu0 %vm164_vm2, %v465_v52  ;;  %v4258_v9 = vpop.permute.xlu2 %618 }
 0x233   :  { %v4266_v16 = vpop.permute.xlu0 %620 }
 0x234   :  { %v438_v55 = vsub.f32 1.5, %v437_v54  ;;  %v377_v54 = vld [vmem:[%s5278_s5 + $0x18] sm:$0xff] }
 0x235   :  { %v3675_v57 = vpop.eup %3674 }
 0x236   :  { %v445_v58 = vmul.f32 %v3675_v57, %v413_v44  ;;  %v439_v60 = vmul.f32 %v3673_v43, %v438_v55  ;;  %vm451_vm14 = vweird.f32 %v3675_v57 }
 0x237   :  { %vm452_vm3 = vmor %vm450_vm15, %vm451_vm14 }
 0x238   :  { %v446_v61 = vmul.f32 %v3675_v57, %v445_v58  ;;  %v443_v0 = vsel %vm442_vm13, %v3673_v43, %v439_v60 }
 0x239   :  { %v456_v2 = vmul.f32 %v443_v0, %v4131_v22 }
 0x23a   :  { %v447_v62 = vmul.f32 0.5, %v446_v61 }
 0x23b   :  { %v463_v5 = vmul.f32 %v3661_v34, %v456_v2 }
 0x23c   :  { %v448_v63 = vsub.f32 1.5, %v447_v62 }
 0x23e   :  { %v449_v1 = vmul.f32 %v3675_v57, %v448_v63 }
 0x240   :  { %v453_v3 = vsel %vm452_vm3, %v3675_v57, %v449_v1 }
 0x241   :  { %v457_v4 = vmul.f32 %v453_v3, %v4139_v29 }
 0x243   :  { %v464_v6 = vmul.f32 %v3661_v34, %v457_v4 }
 0x245   :  { %v466_v7 = vpack.c.bf16 %v464_v6, %v463_v5 }
 0x247   :  { %3164 = vmatmul.msk.bf16.gmra.mxu3 %vm164_vm2, %v466_v7  ;;  %3166 = vmatmul.msk.bf16.gmra.mxu0 %vm164_vm2, %v466_v7 }
 0x257   :  { %3167 = vmatmul.msk.bf16.vlgmr.msrb.gmra.mxu3 %vm164_vm2, %v465_v52 }
 0x267   :  { %3168 = vmatmul.msk.bf16.gmra.mxu3 %vm164_vm2, %v466_v7 }
 0x2af   :  { %v581_v10 = vpop.f32.mrf.mxu0 }
 0x2b0   :  { %v662_v11 = vmul.f32 %v4258_v9, %v581_v10  ;;  %v658_v50 = vmul.f32 %v581_v10, %v374_v46 }
 0x2b2   :  { %670 = vrot.lane.b32.xlu2 %v662_v11, %s3877_s26 }
 0x2b5   :  { %v4264_v13 = vpop.f32.mrf.mxu3 }
 0x2b6   :  { %v630_v28 = vmul.f32 %v4258_v9, %v4264_v13 }
 0x2b7   :  { %v583_v14 = vpop.f32.mrf.mxu0 }
 0x2b8   :  { %v663_v26 = vmul.f32 %v4266_v16, %v583_v14  ;;  %v659_v57 = vmul.f32 %v583_v14, %v375_v53 }
 0x2bd   :  { %v564_v17 = vpop.f32.mrf.mxu3 }
 0x2be   :  { %v631_v18 = vmul.f32 %v4266_v16, %v564_v17  ;;  %v611_v2 = vmul.f32 %v564_v17, %v375_v53 }
 0x2c0   :  { %640 = vrot.lane.b32.xlu2 %v631_v18, %s3877_s26  ;;  %v610_v18 = vmul.f32 %v4264_v13, %v374_v46 }
 0x2c4   :  { %v586_v19 = vpop.f32.mrf.mxu0 }
 0x2c5   :  { %v664_v20 = vmul.f32 %v4262_v12, %v586_v19  ;;  %v660_v51 = vmul.f32 %v586_v19, %v376_v47 }
 0x2c7   :  { %674 = vrot.lane.b32.xlu1 %v664_v20, %s3877_s26 }
 0x2ca   :  { %v4272_v21 = vpop.f32.mrf.mxu3 }
 0x2cb   :  { %v632_v30 = vmul.f32 %v4262_v12, %v4272_v21 }
 0x2cc   :  { %v588_v24 = vpop.f32.mrf.mxu0 }
 0x2cd   :  { %v665_v25 = vmul.f32 %v4274_v23, %v588_v24  ;;  %v661_v58 = vmul.f32 %v588_v24, %v377_v54 }
 0x2cf   :  { %676 = vrot.lane.b32.xlu0 %v665_v25, %s3877_s26  ;;  %672 = vrot.lane.b32.xlu1 %v663_v26, %s3877_s26 }
 0x2d2   :  { %v4280_v27 = vpop.f32.mrf.mxu3 }
 0x2d3   :  { %v633_v32 = vmul.f32 %v4274_v23, %v4280_v27 }
 0x2d7   :  { %638 = vrot.lane.b32.xlu0 %v630_v28, %s3877_s26  ;;  %642 = vrot.lane.b32.xlu1 %v632_v30, %s3877_s26  ;;  %v612_v28 = vmul.f32 %v4272_v21, %v376_v47 }
 0x2da   :  { %v600_v31 = vpop.f32.mrf.mxu3 }
 0x2db   :  { %v690_v39 = vpack.c.bf16 %v600_v31, %v600_v31 }
 0x2dd   :  { %v795_v44 = vunpack.c.l.b16 %v690_v39 }
 0x2df   :  { %644 = vrot.lane.b32.xlu0 %v633_v32, %s3877_s26 }
 0x2e2   :  { %v602_v33 = vpop.f32.mrf.mxu3 }
 0x2e3   :  { %v691_v37 = vpack.c.bf16 %v602_v33, %v602_v33 }
 0x2e5   :  { %v796_v42 = vunpack.c.l.b16 %v691_v37 }
 0x2e7   :  { %v4294_v45 = vpack.c.b16 %v796_v42, %v795_v44 }
 0x2ea   :  { %v605_v34 = vpop.f32.mrf.mxu3 }
 0x2eb   :  { %v692_v35 = vpack.c.bf16 %v605_v34, %v605_v34  ;;  %v613_v34 = vmul.f32 %v4280_v27, %v377_v54 }
 0x2ed   :  { %v797_v40 = vunpack.c.l.b16 %v692_v35 }
 0x2f2   :  { %v607_v36 = vpop.f32.mrf.mxu3 }
 0x2f3   :  { %v693_v38 = vpack.c.bf16 %v607_v36, %v607_v36 }
 0x2f5   :  { %v798_v41 = vunpack.c.l.b16 %v693_v38 }
 0x2f7   :  { %v4291_v43 = vpack.c.b16 %v798_v41, %v797_v40 }
 0x2f9   :  { %815 = vmatpush.bf16.msrb.mxu2 %v4291_v43 }
 0x2fd   :  { %816 = vmatpush.bf16.msrb.mxu2 %v4294_v45 }
 0x30c   :  { %v671_v49 = vpop.permute.xlu2 %670 }
 0x30d   :  { %v682_v52 = vadd.f32 %v671_v49, %v658_v50 }
 0x30f   :  { %v686_v59 = vpack.c.bf16 %v682_v52, %v682_v52 }
 0x311   :  { %v708_v5 = vunpack.c.l.b16 %v686_v59  ;;  %v4346_v59 = vld [vmem:[%s5279_s1] sm:$0xff] }
 0x31a   :  { %v641_v1 = vpop.permute.xlu2 %640 }
 0x31b   :  { %v651_v6 = vadd.f32 %v641_v1, %v611_v2  ;;  %v4353_v2 = vld [vmem:[%s5279_s1 + $0x8] sm:$0xff] }
 0x31d   :  { %v655_v24 = vpack.c.bf16 %v651_v6, %v651_v6 }
 0x31f   :  { %v699_v31 = vunpack.c.l.b16 %v655_v24 }
 0x339   :  { %v675_v48 = vpop.permute.xlu1 %674 }
 0x33a   :  { %v684_v55 = vadd.f32 %v675_v48, %v660_v51 }
 0x33c   :  { %v688_v62 = vpack.c.bf16 %v684_v55, %v684_v55 }
 0x33e   :  { %v710_v7 = vunpack.c.l.b16 %v688_v62 }
 0x341   :  { %v673_v60 = vpop.permute.xlu1 %672  ;;  %v677_v61 = vpop.permute.xlu0 %676 }
 0x342   :  { %v683_v63 = vadd.f32 %v673_v60, %v659_v57  ;;  %v685_v0 = vadd.f32 %v677_v61, %v661_v58 }
 0x344   :  { %v687_v3 = vpack.c.bf16 %v683_v63, %v683_v63  ;;  %v689_v4 = vpack.c.bf16 %v685_v0, %v685_v0 }
 0x346   :  { %v709_v10 = vunpack.c.l.b16 %v687_v3  ;;  %v711_v11 = vunpack.c.l.b16 %v689_v4 }
 0x348   :  { %v712_v19 = vpack.c.b16 %v709_v10, %v708_v5  ;;  %v713_v14 = vpack.c.b16 %v711_v11, %v710_v7  ;;  %v4362_v10 = vld [vmem:[%s5279_s1 + $0x10] sm:$0xff] }
 0x349   :  { %v639_v20 = vpop.permute.xlu0 %638  ;;  %v643_v26 = vpop.permute.xlu1 %642 }
 0x34a   :  { %v650_v25 = vadd.f32 %v639_v20, %v610_v18  ;;  %832 = vrot.lane.b32.xlu1 %v712_v19, %s3880_s23  ;;  %834 = vrot.lane.b32.xlu2 %v713_v14, %s3880_s23  ;;  %v724_v17 = vsel %vm89_vm0, %v713_v14, 0  ;;  %v652_v32 = vadd.f32 %v643_v26, %v612_v28  ;;  %v721_v38 = vsel %vm89_vm0, %v712_v19, 0  ;;  %v4369_v20 = vld [vmem:[%s5279_s1 + $0x18] sm:$0xff] }
 0x34b   :  { %732 = vmatpush.bf16.xpose.msrb.mxu1 %v724_v17 }
 0x34c   :  { %v654_v30 = vpack.c.bf16 %v650_v25, %v650_v25  ;;  %v656_v36 = vpack.c.bf16 %v652_v32, %v652_v32 }
 0x34e   :  { %v698_v13 = vunpack.c.l.b16 %v654_v30  ;;  %v700_v40 = vunpack.c.l.b16 %v656_v36 }
 0x350   :  { %v702_v33 = vpack.c.b16 %v699_v31, %v698_v13 }
 0x351   :  { %v645_v35 = vpop.permute.xlu0 %644 }
 0x352   :  { %v653_v37 = vadd.f32 %v645_v35, %v613_v34  ;;  %950 = vrot.lane.b32.xlu2 %v713_v14, %s3876_s10  ;;  %828 = vrot.lane.b32.xlu0 %v702_v33, %s3880_s23 }
 0x353   :  { %733 = vmatpush.bf16.xpose.msrb.mxu1 %v721_v38 }
 0x354   :  { %v657_v39 = vpack.c.bf16 %v653_v37, %v653_v37 }
 0x356   :  { %v701_v21 = vunpack.c.l.b16 %v657_v39 }
 0x358   :  { %v703_v41 = vpack.c.b16 %v701_v21, %v700_v40 }
 0x35a   :  { %948 = vrot.lane.b32.xlu2 %v712_v19, %s3876_s10  ;;  %1066 = vrot.lane.b32.xlu0 %v713_v14, %s3881_s24 }
 0x35b   :  { %3169 = vmatmul.msk.bf16.vlgmr.msrb.gmra.mxu1 %vm89_vm0, %v702_v33  ;;  %830 = vrot.lane.b32.xlu1 %v703_v41, %s3880_s23 }
 0x362   :  { %1060 = vrot.lane.b32.xlu2 %v702_v33, %s3881_s24  ;;  %944 = vrot.lane.b32.xlu0 %v702_v33, %s3876_s10 }
 0x363   :  { %1064 = vrot.lane.b32.xlu1 %v712_v19, %s3881_s24 }
 0x36a   :  { %913 = vrot.lane.b32.xlu2 %v4294_v45, %s3880_s23  ;;  %1062 = vrot.lane.b32.xlu0 %v703_v41, %s3881_s24 }
 0x36b   :  { %946 = vrot.lane.b32.xlu1 %v703_v41, %s3876_s10  ;;  %3170 = vmatmul.msk.bf16.gmra.mxu1 %vm89_vm0, %v703_v41 }
 0x372   :  { %915 = vrot.lane.b32.xlu0 %v4291_v43, %s3880_s23 }
 0x373   :  { %1031 = vrot.lane.b32.xlu1 %v4291_v43, %s3876_s10 }
 0x3a4   :  { %v835_v27 = vpop.permute.xlu2 %834 }
 0x3a5   :  { %v846_v42 = vsel %vm89_vm0, %v835_v27, 0 }
 0x3a6   :  { %854 = vmatpush.bf16.xpose.msra.mxu0 %v846_v42 }
 0x3ac   :  { %v951_v44 = vpop.permute.xlu2 %950 }
 0x3ad   :  { %v962_v46 = vsel %vm89_vm0, %v951_v44, 0 }
 0x3ae   :  { %970 = vmatpush.bf16.xpose.msra.mxu1 %v962_v46 }
 0x3b4   :  { %v949_v47 = vpop.permute.xlu2 %948 }
 0x3b5   :  { %v959_v48 = vsel %vm89_vm0, %v949_v47, 0 }
 0x3b6   :  { %971 = vmatpush.bf16.xpose.msra.mxu1 %v959_v48 }
 0x3bc   :  { %v833_v49 = vpop.permute.xlu1 %832  ;;  %v1061_v1 = vpop.permute.xlu2 %1060 }
 0x3bd   :  { %v843_v50 = vsel %vm89_vm0, %v833_v49, 0 }
 0x3be   :  { %855 = vmatpush.bf16.xpose.msra.mxu0 %v843_v50 }
 0x3c4   :  { %v829_v51 = vpop.permute.xlu0 %828  ;;  %v914_v11 = vpop.permute.xlu2 %913 }
 0x3c5   :  { %3173 = vmatmul.msk.bf16.vlgmr.msra.gmra.mxu0 %vm89_vm0, %v829_v51 }
 0x3cc   :  { %v1067_v52 = vpop.permute.xlu0 %1066 }
 0x3cd   :  { %v831_v53 = vpop.permute.xlu1 %830  ;;  %v1078_v54 = vsel %vm89_vm0, %v1067_v52, 0 }
 0x3ce   :  { %1086 = vmatpush.bf16.xpose.msrb.mxu0 %v1078_v54 }
 0x3d4   :  { %v945_v55 = vpop.permute.xlu0 %944 }
 0x3d5   :  { %v1065_v57 = vpop.permute.xlu1 %1064  ;;  %3174 = vmatmul.msk.bf16.gmra.mxu0 %vm89_vm0, %v831_v53  ;;  %3177 = vmatmul.msk.bf16.vlgmr.msra.gmra.mxu1 %vm89_vm0, %v945_v55 }
 0x3d6   :  { %v1075_v58 = vsel %vm89_vm0, %v1065_v57, 0 }
 0x3d7   :  { %1087 = vmatpush.bf16.xpose.msrb.mxu0 %v1075_v58 }
 0x3d8   :  { %v735_v60 = vpop.f32.mrf.mxu1 }
 0x3d9   :  { %v736_v61 = vadd.f32 %v735_v60, %v4346_v59 }
 0x3db   :  { %v745_v62 = vsel %vm159_vm1, %v736_v61, -inf }
 0x3dc   :  { %746 = vmax.xlane.f32.xlu2 %v745_v62  ;;  %v1063_v63 = vpop.permute.xlu0 %1062 }
 0x3dd   :  { %v947_v0 = vpop.permute.xlu1 %946 }
 0x3e0   :  { %v737_v3 = vpop.f32.mrf.mxu1 }
 0x3e1   :  { %v738_v4 = vadd.f32 %v737_v3, %v4353_v2 }
 0x3e3   :  { %v748_v5 = vsel %vm159_vm1, %v738_v4, -inf }
 0x3e4   :  { %749 = vmax.xlane.f32.xlu1 %v748_v5  ;;  %v916_v6 = vpop.permute.xlu0 %915 }
 0x3e5   :  { %v1032_v7 = vpop.permute.xlu1 %1031  ;;  %931 = vmatpush.bf16.msra.mxu3 %v916_v6  ;;  %3178 = vmatmul.msk.bf16.gmra.mxu1 %vm89_vm0, %v947_v0 }
 0x3e6   :  { %1047 = vmatpush.bf16.msra.mxu2 %v1032_v7  ;;  %3181 = vmatmul.msk.bf16.vlgmr.msrb.gmra.mxu0 %vm89_vm0, %v1061_v1 }
 0x3e8   :  { %v740_v18 = vpop.f32.mrf.mxu1 }
 0x3e9   :  { %v741_v19 = vadd.f32 %v740_v18, %v4362_v10  ;;  %932 = vmatpush.bf16.msra.mxu3 %v914_v11 }
 0x3eb   :  { %v751_v14 = vsel %vm159_vm1, %v741_v19, -inf }
 0x3ec   :  { %752 = vmax.xlane.f32.xlu1 %v751_v14 }
 0x3f0   :  { %v742_v24 = vpop.f32.mrf.mxu1 }
 0x3f1   :  { %v4372_v25 = vadd.f32 %v742_v24, %v4369_v20 }
 0x3f3   :  { %v754_v17 = vsel %vm159_vm1, %v4372_v25, -inf }
 0x3f4   :  { %755 = vmax.xlane.f32.xlu0 %v754_v17 }
 0x3f6   :  { %3182 = vmatmul.msk.bf16.gmra.mxu0 %vm89_vm0, %v1063_v63 }
 0x442   :  { %v857_v26 = vpop.f32.mrf.mxu0 }
 0x443   :  { %v4378_v28 = vadd.f32 %v857_v26, %v4346_v59 }
 0x445   :  { %v867_v30 = vsel %vm159_vm1, %v4378_v28, -inf }
 0x446   :  { %868 = vmax.xlane.f32.xlu0 %v867_v30 }
 0x44a   :  { %v859_v31 = vpop.f32.mrf.mxu0 }
 0x44b   :  { %v4383_v32 = vadd.f32 %v859_v31, %v4353_v2 }
 0x44d   :  { %v870_v13 = vsel %vm159_vm1, %v4383_v32, -inf }
 0x44e   :  { %871 = vmax.xlane.f32.xlu2 %v870_v13 }
 0x44f   :  { %v747_v33 = vpop.xlane.xlu2 %746 }
 0x450   :  { %v757_v34 = vsub.f32 %v736_v61, %v747_v33 }
 0x452   :  { %v761_v35 = vmul.f32 1.442695, %v757_v34  ;;  %v862_v36 = vpop.f32.mrf.mxu0  ;;  %v973_v37 = vpop.f32.mrf.mxu1 }
 0x453   :  { %v4388_v38 = vadd.f32 %v973_v37, %v4346_v59  ;;  %v4405_v50 = vadd.f32 %v862_v36, %v4362_v10 }
 0x454   :  { %3676 = vpow2.f32 %v761_v35 }
 0x455   :  { %v983_v39 = vsel %vm159_vm1, %v4388_v38, -inf  ;;  %v873_v60 = vsel %vm159_vm1, %v4405_v50, -inf }
 0x456   :  { %984 = vmax.xlane.f32.xlu0 %v983_v39 }
 0x457   :  { %v750_v40 = vpop.xlane.xlu1 %749 }
 0x458   :  { %v758_v21 = vsub.f32 %v738_v4, %v750_v40 }
 0x45a   :  { %v4392_v41 = vpop.eup %3676  ;;  %v763_v27 = vmul.f32 1.442695, %v758_v21  ;;  %v864_v42 = vpop.f32.mrf.mxu0 }
 0x45b   :  { %v975_v44 = vpop.f32.mrf.mxu1  ;;  %v769_v47 = vsel %vm159_vm1, %v4392_v41, 0.0  ;;  %v4402_v49 = vadd.f32 %v864_v42, %v4369_v20 }
 0x45c   :  { %v4395_v46 = vadd.f32 %v975_v44, %v4353_v2  ;;  %3678 = vpow2.f32 %v763_v27  ;;  %770 = vadd.xlane.f32.xlu1 %v769_v47 }
 0x45d   :  { %v876_v55 = vsel %vm159_vm1, %v4402_v49, -inf }
 0x45e   :  { %v986_v48 = vsel %vm159_vm1, %v4395_v46, -inf }
 0x45f   :  { %987 = vmax.xlane.f32.xlu2 %v986_v48  ;;  %v753_v51 = vpop.xlane.xlu1 %752 }
 0x460   :  { %v759_v58 = vsub.f32 %v741_v19, %v753_v51 }
 0x462   :  { %v4407_v52 = vpop.eup %3678  ;;  %v765_v61 = vmul.f32 1.442695, %v759_v58 }
 0x463   :  { %v978_v53 = vpop.f32.mrf.mxu1  ;;  %v1089_v54 = vpop.f32.mrf.mxu0  ;;  %v772_v57 = vsel %vm159_vm1, %v4407_v52, 0.0 }
 0x464   :  { %877 = vmax.xlane.f32.xlu1 %v876_v55  ;;  %773 = vadd.xlane.f32.xlu0 %v772_v57  ;;  %v4416_v62 = vadd.f32 %v978_v53, %v4362_v10  ;;  %3680 = vpow2.f32 %v765_v61  ;;  %v4441_v26 = vadd.f32 %v1089_v54, %v4346_v59 }
 0x466   :  { %v989_v5 = vsel %vm159_vm1, %v4416_v62, -inf }
 0x467   :  { %874 = vmax.xlane.f32.xlu2 %v873_v60  ;;  %v756_v7 = vpop.xlane.xlu0 %755 }
 0x468   :  { %v760_v19 = vsub.f32 %v4372_v25, %v756_v7 }
 0x46a   :  { %v4430_v11 = vpop.eup %3680  ;;  %v767_v17 = vmul.f32 1.442695, %v760_v19 }
 0x46b   :  { %v980_v63 = vpop.f32.mrf.mxu1  ;;  %v1091_v1 = vpop.f32.mrf.mxu0  ;;  %v775_v14 = vsel %vm159_vm1, %v4430_v11, 0.0 }
 0x46c   :  { %v4419_v0 = vadd.f32 %v980_v63, %v4369_v20  ;;  %v4422_v3 = vadd.f32 %v1091_v1, %v4353_v2  ;;  %3682 = vpow2.f32 %v767_v17 }
 0x46e   :  { %v992_v4 = vsel %vm159_vm1, %v4419_v0, -inf  ;;  %v1102_v6 = vsel %vm159_vm1, %v4422_v3, -inf }
 0x46f   :  { %993 = vmax.xlane.f32.xlu1 %v992_v4  ;;  %990 = vmax.xlane.f32.xlu2 %v989_v5 }
 0x470   :  { %1103 = vmax.xlane.f32.xlu0 %v1102_v6 }
 0x472   :  { %v4450_v13 = vpop.eup %3682 }
 0x473   :  { %v1094_v18 = vpop.f32.mrf.mxu0  ;;  %v778_v33 = vsel %vm159_vm1, %v4450_v13, 0.0 }
 0x474   :  { %v4434_v2 = vadd.f32 %v1094_v18, %v4362_v10  ;;  %v1099_v10 = vsel %vm159_vm1, %v4441_v26, -inf }
 0x476   :  { %v1105_v24 = vsel %vm159_vm1, %v4434_v2, -inf }
 0x477   :  { %776 = vadd.xlane.f32.xlu1 %v775_v14 }
 0x478   :  { %1106 = vmax.xlane.f32.xlu0 %v1105_v24 }
 0x47b   :  { %v1096_v30 = vpop.f32.mrf.mxu0 }
 0x47c   :  { %v4444_v31 = vadd.f32 %v1096_v30, %v4369_v20 }
 0x47e   :  { %v1108_v25 = vsel %vm159_vm1, %v4444_v31, -inf }
 0x47f   :  { %1100 = vmax.xlane.f32.xlu1 %v1099_v10  ;;  %1109 = vmax.xlane.f32.xlu2 %v1108_v25 }
 0x487   :  { %779 = vadd.xlane.f32.xlu1 %v778_v33 }
 0x4b9   :  { %v869_v59 = vpop.xlane.xlu0 %868 }
 0x4ba   :  { %v879_v34 = vsub.f32 %v4378_v28, %v869_v59 }
 0x4bc   :  { %v883_v35 = vmul.f32 1.442695, %v879_v34 }
 0x4be   :  { %3684 = vpow2.f32 %v883_v35 }
 0x4c1   :  { %v872_v20 = vpop.xlane.xlu2 %871 }
 0x4c2   :  { %v880_v36 = vsub.f32 %v4383_v32, %v872_v20 }
 0x4c4   :  { %v4456_v37 = vpop.eup %3684  ;;  %v885_v39 = vmul.f32 1.442695, %v880_v36 }
 0x4c5   :  { %v891_v40 = vsel %vm159_vm1, %v4456_v37, 0.0 }
 0x4c6   :  { %3686 = vpow2.f32 %v885_v39  ;;  %892 = vadd.xlane.f32.xlu2 %v891_v40 }
 0x4c9   :  { %v985_v21 = vpop.xlane.xlu0 %984 }
 0x4ca   :  { %v995_v27 = vsub.f32 %v4388_v38, %v985_v21 }
 0x4cc   :  { %v4461_v42 = vpop.eup %3686  ;;  %v999_v44 = vmul.f32 1.442695, %v995_v27 }
 0x4cd   :  { %v894_v28 = vsel %vm159_vm1, %v4461_v42, 0.0 }
 0x4ce   :  { %3688 = vpow2.f32 %v999_v44  ;;  %895 = vadd.xlane.f32.xlu1 %v894_v28 }
 0x4cf   :  { %v771_v32 = vpop.xlane.xlu1 %770 }
 0x4d0   :  { %3690 = vrcp.f32 %v771_v32 }
 0x4d2   :  { %v988_v47 = vpop.xlane.xlu2 %987 }
 0x4d3   :  { %v996_v48 = vsub.f32 %v4395_v46, %v988_v47 }
 0x4d4   :  { %v4466_v51 = vpop.eup %3688 }
 0x4d5   :  { %v1001_v53 = vmul.f32 1.442695, %v996_v48  ;;  %v1007_v54 = vsel %vm159_vm1, %v4466_v51, 0.0 }
 0x4d6   :  { %1008 = vadd.xlane.f32.xlu2 %v1007_v54  ;;  %v3691_v63 = vpop.eup %3690 }
 0x4d7   :  { %3692 = vpow2.f32 %v1001_v53  ;;  %v878_v38 = vpop.xlane.xlu1 %877  ;;  %v774_v55 = vpop.xlane.xlu0 %773  ;;  %v785_v6 = vmul.f32 %v3691_v63, %v4392_v41 }
 0x4d8   :  { %v882_v57 = vsub.f32 %v4402_v49, %v878_v38  ;;  %3694 = vrcp.f32 %v774_v55 }
 0x4da   :  { %v875_v58 = vpop.xlane.xlu2 %874  ;;  %v889_v60 = vmul.f32 1.442695, %v882_v57 }
 0x4db   :  { %v881_v61 = vsub.f32 %v4405_v50, %v875_v58 }
 0x4dc   :  { %3696 = vpow2.f32 %v889_v60 }
 0x4dd   :  { %v4472_v46 = vpop.eup %3692  ;;  %v887_v1 = vmul.f32 1.442695, %v881_v61 }
 0x4de   :  { %v1010_v4 = vsel %vm159_vm1, %v4472_v46, 0.0  ;;  %v3695_v5 = vpop.eup %3694 }
 0x4df   :  { %3698 = vpow2.f32 %v887_v1  ;;  %1011 = vadd.xlane.f32.xlu1 %v1010_v4  ;;  %v786_v49 = vmul.f32 %v3695_v5, %v4407_v52 }
 0x4e1   :  { %v789_v18 = vpack.c.bf16 %v786_v49, %v785_v6 }
 0x4e2   :  { %v994_v7 = vpop.xlane.xlu1 %993  ;;  %v4478_v19 = vpop.eup %3696 }
 0x4e3   :  { %3171 = vmatmul.msk.bf16.vlgmr.msrb.gmra.mxu2 %vm159_vm1, %v789_v18  ;;  %v900_v24 = vsel %vm159_vm1, %v4478_v19, 0.0  ;;  %v1104_v41 = vpop.xlane.xlu0 %1103  ;;  %v991_v28 = vpop.xlane.xlu2 %990  ;;  %v998_v57 = vsub.f32 %v4419_v0, %v994_v7 }
 0x4e4   :  { %v1112_v10 = vsub.f32 %v4422_v3, %v1104_v41  ;;  %v997_v32 = vsub.f32 %v4416_v62, %v991_v28 }
 0x4e5   :  { %v4481_v50 = vpop.eup %3698 }
 0x4e6   :  { %v897_v14 = vsel %vm159_vm1, %v4481_v50, 0.0  ;;  %v1117_v33 = vmul.f32 1.442695, %v1112_v10 }
 0x4e7   :  { %898 = vadd.xlane.f32.xlu0 %v897_v14  ;;  %901 = vadd.xlane.f32.xlu1 %v900_v24 }
 0x4ea   :  { %v777_v17 = vpop.xlane.xlu1 %776 }
 0x4eb   :  { %v1107_v40 = vpop.xlane.xlu0 %1106 }
 0x4ec   :  { %v1113_v27 = vsub.f32 %v4434_v2, %v1107_v40 }
 0x4ee   :  { %1029 = vrot.lane.b32.xlu2 %v4294_v45, %s3876_s10  ;;  %v1119_v44 = vmul.f32 1.442695, %v1113_v27 }
 0x4f2   :  { %v1101_v52 = vpop.xlane.xlu1 %1100  ;;  %v1110_v48 = vpop.xlane.xlu2 %1109 }
 0x4f3   :  { %v1111_v30 = vsub.f32 %v4441_v26, %v1101_v52  ;;  %v1114_v2 = vsub.f32 %v4444_v31, %v1110_v48  ;;  %v1005_v31 = vmul.f32 1.442695, %v998_v57 }
 0x4f5   :  { %v1115_v25 = vmul.f32 1.442695, %v1111_v30  ;;  %v1121_v53 = vmul.f32 1.442695, %v1114_v2 }
 0x4f7   :  { %3700 = vpow2.f32 %v1115_v25 }
 0x4f8   :  { %3702 = vrcp.f32 %v777_v17 }
 0x4fa   :  { %v780_v59 = vpop.xlane.xlu1 %779 }
 0x4fb   :  { %3704 = vrcp.f32 %v780_v59  ;;  %1147 = vrot.lane.b32.xlu0 %v4291_v43, %s3881_s24 }
 0x4fc   :  { %3706 = vpow2.f32 %v1117_v33 }
 0x4fd   :  { %v4493_v34 = vpop.eup %3700  ;;  %3708 = vpow2.f32 %v1119_v44 }
 0x4fe   :  { %v1123_v35 = vsel %vm159_vm1, %v4493_v34, 0.0  ;;  %v3703_v20 = vpop.eup %3702 }
 0x4ff   :  { %1124 = vadd.xlane.f32.xlu1 %v1123_v35  ;;  %v787_v3 = vmul.f32 %v3703_v20, %v4430_v11 }
 0x501   :  { %v3705_v26 = vpop.eup %3704 }
 0x502   :  { %v788_v36 = vmul.f32 %v3705_v26, %v4450_v13  ;;  %v4499_v39 = vpop.eup %3706  ;;  %v1003_v13 = vmul.f32 1.442695, %v997_v32 }
 0x503   :  { %v1126_v43 = vsel %vm159_vm1, %v4499_v39, 0.0  ;;  %v4506_v11 = vpop.eup %3708 }
 0x504   :  { %v790_v21 = vpack.c.bf16 %v788_v36, %v787_v3  ;;  %v1129_v47 = vsel %vm159_vm1, %v4506_v11, 0.0  ;;  %3710 = vpow2.f32 %v1003_v13 }
 0x505   :  { %3712 = vpow2.f32 %v1121_v53 }
 0x506   :  { %3172 = vmatmul.msk.bf16.gmra.mxu2 %vm159_vm1, %v790_v21  ;;  %3714 = vpow2.f32 %v1005_v31 }
 0x507   :  { %1127 = vadd.xlane.f32.xlu1 %v1126_v43 }
 0x50a   :  { %v4513_v54 = vpop.eup %3710 }
 0x50b   :  { %v1013_v62 = vsel %vm159_vm1, %v4513_v54, 0.0  ;;  %v4517_v38 = vpop.eup %3712 }
 0x50c   :  { %v1132_v55 = vsel %vm159_vm1, %v4517_v38, 0.0  ;;  %v4522_v60 = vpop.eup %3714 }
 0x50d   :  { %v1016_v1 = vsel %vm159_vm1, %v4522_v60, 0.0 }
 0x517   :  { %1130 = vadd.xlane.f32.xlu2 %v1129_v47 }
 0x520   :  { %1145 = vrot.lane.b32.xlu1 %v4294_v45, %s3881_s24 }
 0x525   :  { %1014 = vadd.xlane.f32.xlu0 %v1013_v62 }
 0x52d   :  { %1133 = vadd.xlane.f32.xlu0 %v1132_v55 }
 0x539   :  { %v893_v58 = vpop.xlane.xlu2 %892 }
 0x53a   :  { %3716 = vrcp.f32 %v893_v58 }
 0x540   :  { %v3717_v61 = vpop.eup %3716 }
 0x541   :  { %v896_v45 = vpop.xlane.xlu1 %895  ;;  %v907_v4 = vmul.f32 %v3717_v61, %v4456_v37 }
 0x542   :  { %3718 = vrcp.f32 %v896_v45 }
 0x548   :  { %v3719_v63 = vpop.eup %3718 }
 0x549   :  { %v908_v5 = vmul.f32 %v3719_v63, %v4461_v42  ;;  %v1009_v6 = vpop.xlane.xlu2 %1008 }
 0x54a   :  { %1017 = vadd.xlane.f32.xlu1 %v1016_v1  ;;  %3720 = vrcp.f32 %v1009_v6 }
 0x54b   :  { %v911_v0 = vpack.c.bf16 %v908_v5, %v907_v4 }
 0x54d   :  { %3175 = vmatmul.msk.bf16.vlgmr.msra.gmra.mxu3 %vm159_vm1, %v911_v0 }
 0x550   :  { %v3721_v18 = vpop.eup %3720 }
 0x551   :  { %v1030_v7 = vpop.permute.xlu2 %1029  ;;  %v1023_v24 = vmul.f32 %v3721_v18, %v4466_v51 }
 0x552   :  { %v1012_v49 = vpop.xlane.xlu1 %1011  ;;  %1048 = vmatpush.bf16.msra.mxu2 %v1030_v7  ;;  %v3539_v7 = vld [vmem:[%s5280_s13 + $0x18] sm:$0xff] }
 0x553   :  { %3722 = vrcp.f32 %v1012_v49  ;;  %1281 = vmatpush.bf16.msrb.mxu1 %v3539_v7  ;;  %v3231_v7 = vld [vmem:[%s5282_s15 + $0x38] sm:$0xf0] }
 0x559   :  { %v3723_v14 = vpop.eup %3722 }
 0x55a   :  { %v1024_v17 = vmul.f32 %v3723_v14, %v4472_v46  ;;  %v902_v41 = vpop.xlane.xlu1 %901  ;;  %v899_v37 = vpop.xlane.xlu0 %898  ;;  %v3538_v14 = vld [vmem:[%s5280_s13 + $0x10] sm:$0xff] }
 0x55b   :  { %3724 = vrcp.f32 %v902_v41  ;;  %1282 = vmatpush.bf16.msrb.mxu1 %v3538_v14  ;;  %v3221_v14 = vld [vmem:[%s5282_s15 + $0x20] sm:$0xf] }
 0x55c   :  { %v1027_v42 = vpack.c.bf16 %v1024_v17, %v1023_v24  ;;  %3726 = vrcp.f32 %v899_v37  ;;  %v3537_v24 = vld [vmem:[%s5280_s13 + $0x8] sm:$0xff]  ;;  %v3536_v37 = vld [vmem:[%s5280_s13] sm:$0xff] }
 0x55e   :  { %3179 = vmatmul.msk.bf16.vlgmr.msra.gmra.mxu2 %vm159_vm1, %v1027_v42 }
 0x55f   :  { %1283 = vmatpush.bf16.msrb.mxu1 %v3537_v24  ;;  %v3545_v24 = vld [vmem:[%s5282_s15 + $0x24] sm:$0xf0] }
 0x561   :  { %v3725_v52 = vpop.eup %3724 }
 0x562   :  { %v3727_v30 = vpop.eup %3726  ;;  %v910_v10 = vmul.f32 %v3725_v52, %v4478_v19 }
 0x563   :  { %v909_v25 = vmul.f32 %v3727_v30, %v4481_v50  ;;  %1284 = vmatpush.bf16.msrb.mxu1 %v3536_v37  ;;  %v3223_v37 = vld [vmem:[%s5282_s15 + $0x28] sm:$0xf0] }
 0x565   :  { %v912_v33 = vpack.c.bf16 %v910_v10, %v909_v25 }
 0x567   :  { %3176 = vmatmul.msk.bf16.gmra.mxu3 %vm159_vm1, %v912_v33 }
 0x56d   :  { %v1148_v59 = vpop.permute.xlu0 %1147 }
 0x56e   :  { %1163 = vmatpush.bf16.msrb.mxu3 %v1148_v59 }
 0x572   :  { %v1125_v51 = vpop.xlane.xlu1 %1124 }
 0x57a   :  { %v1128_v46 = vpop.xlane.xlu1 %1127 }
 0x57b   :  { %3728 = vrcp.f32 %v1128_v46 }
 0x57c   :  { %3730 = vrcp.f32 %v1125_v51 }
 0x581   :  { %v3729_v35 = vpop.eup %3728 }
 0x582   :  { %v3731_v20 = vpop.eup %3730  ;;  %v1140_v26 = vmul.f32 %v3729_v35, %v4499_v39 }
 0x583   :  { %v1139_v3 = vmul.f32 %v3731_v20, %v4493_v34  ;;  %v818_v34 = vpop.f32.mrf.mxu2 }
 0x585   :  { %v1143_v19 = vpack.c.bf16 %v1140_v26, %v1139_v3 }
 0x58a   :  { %v1131_v40 = vpop.xlane.xlu2 %1130 }
 0x58b   :  { %3732 = vrcp.f32 %v1131_v40  ;;  %v820_v53 = vpop.f32.mrf.mxu2 }
 0x591   :  { %v3733_v27 = vpop.eup %3732 }
 0x592   :  { %v1146_v36 = vpop.permute.xlu1 %1145  ;;  %v1141_v44 = vmul.f32 %v3733_v27, %v4506_v11 }
 0x593   :  { %1164 = vmatpush.bf16.msrb.mxu3 %v1146_v36  ;;  %v4544_v11 = vpop.f32.mrf.mxu2 }
 0x596   :  { %3183 = vmatmul.msk.bf16.vlgmr.msrb.gmra.mxu3 %vm159_vm1, %v1143_v19 }
 0x598   :  { %v1015_v50 = vpop.xlane.xlu0 %1014 }
 0x59b   :  { %v825_v55 = vpop.f32.mrf.mxu2 }
 0x5a0   :  { %v1134_v21 = vpop.xlane.xlu0 %1133 }
 0x5a1   :  { %3734 = vrcp.f32 %v1134_v21 }
 0x5a2   :  { %3736 = vrcp.f32 %v1015_v50 }
 0x5a7   :  { %v3735_v43 = vpop.eup %3734 }
 0x5a8   :  { %v1142_v28 = vmul.f32 %v3735_v43, %v4517_v38  ;;  %v3737_v13 = vpop.eup %3736 }
 0x5a9   :  { %v1025_v48 = vmul.f32 %v3737_v13, %v4513_v54 }
 0x5aa   :  { %v1144_v32 = vpack.c.bf16 %v1142_v28, %v1141_v44 }
 0x5ac   :  { %3184 = vmatmul.msk.bf16.gmra.mxu3 %vm159_vm1, %v1144_v32 }
 0x5bd   :  { %v1018_v39 = vpop.xlane.xlu1 %1017 }
 0x5be   :  { %3738 = vrcp.f32 %v1018_v39 }
 0x5c4   :  { %v3739_v47 = vpop.eup %3738 }
 0x5c5   :  { %v1026_v2 = vmul.f32 %v3739_v47, %v4522_v60 }
 0x5c7   :  { %v1028_v62 = vpack.c.bf16 %v1026_v2, %v1025_v48 }
 0x5c9   :  { %3180 = vmatmul.msk.bf16.gmra.mxu2 %vm159_vm1, %v1028_v62 }
 0x5d0   :  { %v934_v38 = vpop.f32.mrf.mxu3 }
 0x5d8   :  { %v936_v57 = vpop.f32.mrf.mxu3 }
 0x5d9   :  { %v3600_v31 = vpack.i.bf16 %v936_v57, %v934_v38 }
 0x5db   :  { %3601 = vrot.lane.b32.xlu1 %v3600_v31, %s3882_s6 }
 0x5e1   :  { %v1050_v58 = vpop.f32.mrf.mxu2 }
 0x5e9   :  { %v1052_v45 = vpop.f32.mrf.mxu2 }
 0x5ea   :  { %v939_v61 = vpop.f32.mrf.mxu3  ;;  %v3605_v63 = vpack.i.bf16 %v1052_v45, %v1050_v58 }
 0x5ec   :  { %3606 = vrot.lane.b32.xlu0 %v3605_v63, %s3878_s27 }
 0x5f2   :  { %v941_v54 = vpop.f32.mrf.mxu3 }
 0x5f3   :  { %v3615_v60 = vpack.i.bf16 %v941_v54, %v939_v61 }
 0x5f5   :  { %3616 = vrot.lane.b32.xlu0 %v3615_v60, %s3882_s6 }
 0x619   :  { %v1166_v1 = vpop.f32.mrf.mxu3 }
 0x621   :  { %v1168_v4 = vpop.f32.mrf.mxu3 }
 0x622   :  { %v3610_v5 = vpack.i.bf16 %v1168_v4, %v1166_v1 }
 0x624   :  { %3611 = vrot.lane.b32.xlu2 %v3610_v5, %s3883_s30 }
 0x62f   :  { %v1171_v6 = vpop.f32.mrf.mxu3 }
 0x637   :  { %v1173_v0 = vpop.f32.mrf.mxu3 }
 0x638   :  { %v3625_v49 = vpack.i.bf16 %v1173_v0, %v1171_v6  ;;  %v3547_v0 = vld [vmem:[%s5282_s15 + $0x34] sm:$0xf0] }
 0x63a   :  { %3626 = vrot.lane.b32.xlu2 %v3625_v49, %s3883_s30  ;;  %v3546_v49 = vld [vmem:[%s5282_s15 + $0x34] sm:$0xf] }
 0x64c   :  { %v1055_v18 = vpop.f32.mrf.mxu2 }
 0x64d   :  { %v3602_v42 = vpop.permute.xlu1 %3601 }
 0x64e   :  { %v3604_v30 = vunpack.i.h.bf16 %v3602_v42  ;;  %v3603_v10 = vunpack.i.l.bf16 %v3602_v42 }
 0x650   :  { %v1225_v51 = vsel %vm89_vm0, %v820_v53, %v3604_v30  ;;  %v1224_v46 = vsel %vm89_vm0, %v818_v34, %v3603_v10  ;;  %v3543_v30 = vld [vmem:[%s5282_s15 + $0x14] sm:$0xf0]  ;;  %v3542_v10 = vld [vmem:[%s5282_s15 + $0x14] sm:$0xf] }
 0x654   :  { %v1057_v17 = vpop.f32.mrf.mxu2 }
 0x655   :  { %v3620_v41 = vpack.i.bf16 %v1057_v17, %v1055_v18  ;;  %v3234_v18 = vor.u32 %v3546_v49, %v3231_v7  ;;  %v3544_v17 = vld [vmem:[%s5282_s15 + $0x24] sm:$0xf] }
 0x656   :  { %v3226_v42 = vor.u32 %v3544_v17, %v3223_v37 }
 0x657   :  { %3621 = vrot.lane.b32.xlu1 %v3620_v41, %s3878_s27  ;;  %1455 = vmatpush.bf16.msra.mxu0 %v3234_v18  ;;  %v3222_v41 = vor.u32 %v3545_v24, %v3221_v14 }
 0x65b   :  { %1456 = vmatpush.bf16.msra.mxu0 %v3226_v42 }
 0x65e   :  { %v3607_v52 = vpop.permute.xlu0 %3606 }
 0x65f   :  { %v3609_v25 = vunpack.i.h.bf16 %v3607_v52  ;;  %v3608_v33 = vunpack.i.l.bf16 %v3607_v52  ;;  %v3213_v52 = vld [vmem:[%s5282_s15 + $0x10] sm:$0xf] }
 0x661   :  { %v1229_v26 = vsel %vm159_vm1, %v1225_v51, %v3609_v25  ;;  %v1228_v3 = vsel %vm159_vm1, %v1224_v46, %v3608_v33  ;;  %v3214_v25 = vor.u32 %v3543_v30, %v3213_v52  ;;  %v3215_v33 = vld [vmem:[%s5282_s15 + $0x18] sm:$0xf0] }
 0x667   :  { %v3617_v40 = vpop.permute.xlu0 %3616 }
 0x668   :  { %v3619_v21 = vunpack.i.h.bf16 %v3617_v40  ;;  %v3618_v27 = vunpack.i.l.bf16 %v3617_v40 }
 0x66a   :  { %v1227_v34 = vsel %vm89_vm0, %v825_v55, %v3619_v21  ;;  %v1226_v39 = vsel %vm89_vm0, %v4544_v11, %v3618_v27 }
 0x67e   :  { %v3612_v59 = vpop.permute.xlu2 %3611 }
 0x67f   :  { %v3614_v35 = vunpack.i.h.bf16 %v3612_v59  ;;  %v3613_v20 = vunpack.i.l.bf16 %v3612_v59  ;;  %v3218_v59 = vor.u32 %v3542_v10, %v3215_v33 }
 0x681   :  { %v1233_v36 = vsel %vm1232_vm4, %v1228_v3, %v3613_v20  ;;  %v1234_v19 = vsel %vm1232_vm4, %v1229_v26, %v3614_v35  ;;  %1457 = vmatpush.bf16.msra.mxu0 %v3218_v59  ;;  %v3205_v35 = vld [vmem:[%s5282_s15] sm:$0xf]  ;;  %v3541_v20 = vld [vmem:[%s5282_s15 + $0x4] sm:$0xf0]  ;;  %v3540_v26 = vld [vmem:[%s5282_s15 + $0x4] sm:$0xf] }
 0x682   :  { %v1237_v50 = vpack.c.bf16 %v1234_v19, %v1233_v36  ;;  %v3206_v3 = vor.u32 %v3541_v20, %v3205_v35  ;;  %v3207_v36 = vld [vmem:[%s5282_s15 + $0x8] sm:$0xf0]  ;;  %v3555_v35 = vld [vmem:[%s5283_s16 + $0x38] sm:$0xff]  ;;  %v3554_v20 = vld [vmem:[%s5283_s16 + $0x30] sm:$0xff] }
 0x683   :  { %1620 = vmatpush.bf16.msra.mxu3 %v3555_v35 }
 0x684   :  { %3201 = vmatmul.msk.bf16.vlgmr.msrb.gmra.mxu1 %vm164_vm2, %v1237_v50  ;;  %v3210_v50 = vor.u32 %v3540_v26, %v3207_v36  ;;  %v3553_v26 = vld [vmem:[%s5283_s16 + $0x28] sm:$0xff]  ;;  %v3551_v36 = vld [vmem:[%s5283_s16 + $0x18] sm:$0xff] }
 0x686   :  { %1458 = vmatpush.bf16.msra.mxu0 %v3210_v50  ;;  %v3550_v50 = vld [vmem:[%s5283_s16 + $0x10] sm:$0xff] }
 0x687   :  { %1621 = vmatpush.bf16.msra.mxu3 %v3554_v20 }
 0x68b   :  { %1622 = vmatpush.bf16.msra.mxu3 %v3553_v26 }
 0x694   :  { %v3627_v43 = vpop.permute.xlu2 %3626 }
 0x695   :  { %v3629_v13 = vunpack.i.h.bf16 %v3627_v43  ;;  %v3628_v47 = vunpack.i.l.bf16 %v3627_v43 }
 0x6c9   :  { %v3622_v44 = vpop.permute.xlu1 %3621 }
 0x6ca   :  { %v3624_v28 = vunpack.i.h.bf16 %v3622_v44  ;;  %v3623_v32 = vunpack.i.l.bf16 %v3622_v44 }
 0x6cc   :  { %v1230_v48 = vsel %vm159_vm1, %v1226_v39, %v3623_v32  ;;  %v1231_v2 = vsel %vm159_vm1, %v1227_v34, %v3624_v28 }
 0x6cd   :  { %v1235_v53 = vsel %vm1232_vm4, %v1230_v48, %v3628_v47  ;;  %v1236_v62 = vsel %vm1232_vm4, %v1231_v2, %v3629_v13 }
 0x6ce   :  { %v1238_v38 = vpack.c.bf16 %v1236_v62, %v1235_v53 }
 0x6d0   :  { %3202 = vmatmul.msk.bf16.gmra.mxu1 %vm164_vm2, %v1238_v38 }
 0x701   :  { %v1286_v57 = vpop.f32.mrf.mxu1 }
 0x702   :  { %v4580_v31 = vadd.f32 %v1286_v57, %v4115_v8  ;;  %v3663_v57 = vld [vmem:[%s5301_s20] ss:$0 sm:$0xff] }
 0x704   :  { %v1301_v11 = vmul.f32 %v4580_v31, %v4580_v31 }
 0x706   :  { %v1305_v55 = vsel %vm164_vm2, %v1301_v11, 0.0 }
 0x707   :  { %1306 = vadd.xlane.f32.xlu0 %v1305_v55 }
 0x709   :  { %v1288_v58 = vpop.f32.mrf.mxu1 }
 0x70a   :  { %v4586_v45 = vadd.f32 %v1288_v58, %v4123_v15 }
 0x70c   :  { %v1302_v61 = vmul.f32 %v4586_v45, %v4586_v45 }
 0x70e   :  { %v1308_v63 = vsel %vm164_vm2, %v1302_v61, 0.0 }
 0x70f   :  { %1309 = vadd.xlane.f32.xlu1 %v1308_v63 }
 0x74d   :  { %v1291_v54 = vpop.f32.mrf.mxu1 }
 0x74e   :  { %v4592_v8 = vadd.f32 %v1291_v54, %v4131_v22  ;;  %v3229_v22 = vld [vmem:[%s5282_s15 + $0x30] sm:$0xf] }
 0x750   :  { %v1303_v60 = vmul.f32 %v4592_v8, %v4592_v8 }
 0x752   :  { %v1311_v1 = vsel %vm164_vm2, %v1303_v60, 0.0 }
 0x753   :  { %1312 = vadd.xlane.f32.xlu2 %v1311_v1 }
 0x755   :  { %v1293_v4 = vpop.f32.mrf.mxu1 }
 0x756   :  { %v4598_v15 = vadd.f32 %v1293_v4, %v4139_v29  ;;  %v3230_v29 = vor.u32 %v3547_v0, %v3229_v22 }
 0x758   :  { %v1304_v5 = vmul.f32 %v4598_v15, %v4598_v15  ;;  %1436 = vmatpush.bf16.msrb.mxu2 %v3230_v29 }
 0x75a   :  { %v1314_v6 = vsel %vm164_vm2, %v1304_v5, 0.0 }
 0x75b   :  { %1315 = vadd.xlane.f32.xlu0 %v1314_v6 }
 0x75c   :  { %1437 = vmatpush.bf16.msrb.mxu2 %v3222_v41 }
 0x760   :  { %1438 = vmatpush.bf16.msrb.mxu2 %v3214_v25 }
 0x764   :  { %1439 = vmatpush.bf16.msrb.mxu2 %v3206_v3  ;;  %v3552_v3 = vld [vmem:[%s5283_s16 + $0x20] sm:$0xff] }
 0x765   :  { %1623 = vmatpush.bf16.msra.mxu3 %v3552_v3 }
 0x769   :  { %1624 = vmatpush.bf16.msra.mxu3 %v3551_v36 }
 0x76d   :  { %1625 = vmatpush.bf16.msra.mxu3 %v3550_v50 }
 0x77a   :  { %v1307_v51 = vpop.xlane.xlu0 %1306 }
 0x77b   :  { %v1317_v46 = vmul.f32 %v1307_v51, %v4180_v56 }
 0x77d   :  { %v1321_v19 = vadd.f32 1e-06, %v1317_v46 }
 0x77f   :  { %3740 = vrsqrt.f32 %v1321_v19  ;;  %vm1331_vm6 = vweird.f32 %v1321_v19 }
 0x782   :  { %v1310_v40 = vpop.xlane.xlu1 %1309 }
 0x783   :  { %v1318_v21 = vmul.f32 %v1310_v40, %v4180_v56 }
 0x785   :  { %v3741_v27 = vpop.eup %3740  ;;  %v1322_v43 = vadd.f32 1e-06, %v1318_v21  ;;  %v3549_v21 = vld [vmem:[%s5283_s16 + $0x8] sm:$0xff] }
 0x786   :  { %v1326_v44 = vmul.f32 %v3741_v27, %v1321_v19  ;;  %vm1332_vm5 = vweird.f32 %v3741_v27  ;;  %1626 = vmatpush.bf16.msra.mxu3 %v3549_v21 }
 0x787   :  { %3742 = vrsqrt.f32 %v1322_v43  ;;  %vm1333_vm7 = vmor %vm1331_vm6, %vm1332_vm5  ;;  %vm1341_vm9 = vweird.f32 %v1322_v43 }
 0x788   :  { %v1327_v28 = vmul.f32 %v3741_v27, %v1326_v44 }
 0x78a   :  { %v1328_v32 = vmul.f32 0.5, %v1327_v28 }
 0x78c   :  { %v1329_v34 = vsub.f32 1.5, %v1328_v32 }
 0x78d   :  { %v3743_v39 = vpop.eup %3742 }
 0x78e   :  { %v1336_v13 = vmul.f32 %v3743_v39, %v1322_v43  ;;  %v1330_v47 = vmul.f32 %v3741_v27, %v1329_v34  ;;  %vm1342_vm8 = vweird.f32 %v3743_v39  ;;  %v3548_v43 = vld [vmem:[%s5283_s16] sm:$0xff] }
 0x78f   :  { %vm1343_vm10 = vmor %vm1341_vm9, %vm1342_vm8  ;;  %1627 = vmatpush.bf16.msra.mxu3 %v3548_v43 }
 0x790   :  { %v1337_v48 = vmul.f32 %v3743_v39, %v1336_v13  ;;  %v1334_v53 = vsel %vm1333_vm7, %v3741_v27, %v1330_v47 }
 0x791   :  { %v1365_v11 = vmul.f32 %v1334_v53, %v4580_v31 }
 0x792   :  { %v1338_v2 = vmul.f32 0.5, %v1337_v48 }
 0x793   :  { %v1372_v61 = vmul.f32 %v3663_v57, %v1365_v11 }
 0x794   :  { %v1339_v62 = vsub.f32 1.5, %v1338_v2 }
 0x796   :  { %v1340_v38 = vmul.f32 %v3743_v39, %v1339_v62 }
 0x798   :  { %v1344_v55 = vsel %vm1343_vm10, %v3743_v39, %v1340_v38 }
 0x799   :  { %v1366_v58 = vmul.f32 %v1344_v55, %v4586_v45 }
 0x79b   :  { %v1373_v63 = vmul.f32 %v3663_v57, %v1366_v58 }
 0x79d   :  { %v1376_v54 = vpack.c.bf16 %v1373_v63, %v1372_v61 }
 0x79f   :  { %3235 = vmatmul.msk.bf16.vlgmr.msrb.gmra.mxu2 %vm164_vm2, %v1376_v54  ;;  %3237 = vmatmul.msk.bf16.vlgmr.msra.gmra.mxu0 %vm164_vm2, %v1376_v54 }
 0x7c6   :  { %v1313_v60 = vpop.xlane.xlu2 %1312 }
 0x7c7   :  { %v1319_v1 = vmul.f32 %v1313_v60, %v4180_v56 }
 0x7c9   :  { %v1323_v4 = vadd.f32 1e-06, %v1319_v1 }
 0x7cb   :  { %3744 = vrsqrt.f32 %v1323_v4  ;;  %vm1351_vm12 = vweird.f32 %v1323_v4 }
 0x7ce   :  { %v1316_v5 = vpop.xlane.xlu0 %1315 }
 0x7cf   :  { %v1320_v6 = vmul.f32 %v1316_v5, %v4180_v56 }
 0x7d1   :  { %v3745_v22 = vpop.eup %3744  ;;  %v1324_v0 = vadd.f32 1e-06, %v1320_v6 }
 0x7d2   :  { %v1346_v49 = vmul.f32 %v3745_v22, %v1323_v4  ;;  %vm1352_vm11 = vweird.f32 %v3745_v22 }
 0x7d3   :  { %3746 = vrsqrt.f32 %v1324_v0  ;;  %vm1353_vm13 = vmor %vm1351_vm12, %vm1352_vm11  ;;  %vm1361_vm15 = vweird.f32 %v1324_v0 }
 0x7d4   :  { %v1347_v29 = vmul.f32 %v3745_v22, %v1346_v49 }
 0x7d6   :  { %v1348_v7 = vmul.f32 0.5, %v1347_v29 }
 0x7d8   :  { %v1349_v18 = vsub.f32 1.5, %v1348_v7 }
 0x7d9   :  { %v3747_v14 = vpop.eup %3746 }
 0x7da   :  { %v1356_v24 = vmul.f32 %v3747_v14, %v1324_v0  ;;  %v1350_v17 = vmul.f32 %v3745_v22, %v1349_v18  ;;  %vm1362_vm14 = vweird.f32 %v3747_v14 }
 0x7db   :  { %vm1363_vm3 = vmor %vm1361_vm15, %vm1362_vm14 }
 0x7dc   :  { %v1357_v41 = vmul.f32 %v3747_v14, %v1356_v24  ;;  %v1354_v42 = vsel %vm1353_vm13, %v3745_v22, %v1350_v17 }
 0x7dd   :  { %v1367_v10 = vmul.f32 %v1354_v42, %v4592_v8 }
 0x7de   :  { %v1358_v37 = vmul.f32 0.5, %v1357_v41 }
 0x7df   :  { %v1374_v59 = vmul.f32 %v3663_v57, %v1367_v10 }
 0x7e0   :  { %v1359_v52 = vsub.f32 1.5, %v1358_v37 }
 0x7e2   :  { %v1360_v30 = vmul.f32 %v3747_v14, %v1359_v52 }
 0x7e4   :  { %v1364_v25 = vsel %vm1363_vm3, %v3747_v14, %v1360_v30 }
 0x7e5   :  { %v1368_v33 = vmul.f32 %v1364_v25, %v4598_v15 }
 0x7e7   :  { %v1375_v51 = vmul.f32 %v3663_v57, %v1368_v33 }
 0x7e9   :  { %v1377_v46 = vpack.c.bf16 %v1375_v51, %v1374_v59 }
 0x7eb   :  { %3236 = vmatmul.msk.bf16.gmra.mxu2 %vm164_vm2, %v1377_v46  ;;  %3238 = vmatmul.msk.bf16.gmra.mxu0 %vm164_vm2, %v1377_v46 }
 0x81c   :  { %v1460_v55 = vpop.f32.mrf.mxu0 }
 0x822   :  { %v1441_v19 = vpop.f32.mrf.mxu2 }
 0x823   :  { %v3239_v40 = vmul.f32 -1.442695, %v1441_v19 }
 0x824   :  { %v1462_v7 = vpop.f32.mrf.mxu0 }
 0x825   :  { %3748 = vpow2.f32 %v3239_v40 }
 0x82a   :  { %v1443_v27 = vpop.f32.mrf.mxu2 }
 0x82b   :  { %v3749_v44 = vpop.eup %3748  ;;  %v3240_v28 = vmul.f32 -1.442695, %v1443_v27 }
 0x82c   :  { %v1482_v32 = vadd.f32 1.0, %v3749_v44 }
 0x82d   :  { %3750 = vpow2.f32 %v3240_v28 }
 0x82e   :  { %3752 = vrcp.f32 %v1482_v32  ;;  %v1497_v38 = vand.u32 2147483648, %v1482_v32  ;;  %vm1491_vm6 = vweird.f32 %v1482_v32  ;;  %v1495_v57 = vand.u32 2147483647, %v1482_v32 }
 0x830   :  { %v1498_v63 = vor.u32 1.1754944e-38, %v1497_v38  ;;  %vm1496_vm8 = vcmp.eq.f32.partialorder %v1495_v57, 8.507059e+37 }
 0x833   :  { %v3751_v34 = vpop.eup %3750 }
 0x834   :  { %v3753_v39 = vpop.eup %3752  ;;  %v1483_v13 = vadd.f32 1.0, %v3751_v34 }
 0x835   :  { %v1487_v47 = vmul.f32 %v3753_v39, %v1482_v32  ;;  %vm1492_vm5 = vweird.f32 %v3753_v39 }
 0x836   :  { %3754 = vrcp.f32 %v1483_v13  ;;  %vm1493_vm7 = vmor %vm1491_vm6, %vm1492_vm5  ;;  %v1512_v54 = vand.u32 2147483648, %v1483_v13  ;;  %v1510_v1 = vand.u32 2147483647, %v1483_v13  ;;  %vm1506_vm10 = vweird.f32 %v1483_v13 }
 0x837   :  { %v1488_v48 = vsub.f32 1.0, %v1487_v47 }
 0x838   :  { %v1513_v6 = vor.u32 1.1754944e-38, %v1512_v54  ;;  %vm1511_vm12 = vcmp.eq.f32.partialorder %v1510_v1, 8.507059e+37 }
 0x839   :  { %v1489_v2 = vmul.f32 %v3753_v39, %v1488_v48 }
 0x83b   :  { %v1490_v53 = vadd.f32 %v3753_v39, %v1489_v2 }
 0x83c   :  { %v3755_v62 = vpop.eup %3754 }
 0x83d   :  { %v1502_v11 = vmul.f32 %v3755_v62, %v1483_v13  ;;  %v1494_v58 = vsel %vm1493_vm7, %v3753_v39, %v1490_v53  ;;  %vm1507_vm9 = vweird.f32 %v3755_v62 }
 0x83e   :  { %v1499_v4 = vsel %vm1496_vm8, %v1498_v63, %v1494_v58  ;;  %vm1508_vm11 = vmor %vm1506_vm10, %vm1507_vm9 }
 0x83f   :  { %v1503_v61 = vsub.f32 1.0, %v1502_v11  ;;  %v1546_v22 = vmul.f32 %v1499_v4, %v1441_v19 }
 0x841   :  { %v1504_v60 = vmul.f32 %v3755_v62, %v1503_v61  ;;  %v1550_v18 = vmul.f32 %v1546_v22, %v1460_v55 }
 0x843   :  { %v1505_v5 = vadd.f32 %v3755_v62, %v1504_v60 }
 0x845   :  { %v1509_v0 = vsel %vm1508_vm11, %v3755_v62, %v1505_v5 }
 0x846   :  { %v1514_v49 = vsel %vm1511_vm12, %v1513_v6, %v1509_v0 }
 0x847   :  { %v1547_v29 = vmul.f32 %v1514_v49, %v1443_v27  ;;  %v3566_v49 = vld [vmem:[%s5276_s12 + $0xb0] sm:$0xf0] }
 0x849   :  { %v1551_v14 = vmul.f32 %v1547_v29, %v1462_v7  ;;  %v3565_v29 = vld [vmem:[%s5276_s12 + $0xac] sm:$0xf]  ;;  %v3332_v7 = vld [vmem:[%s5276_s12 + $0xb4] sm:$0xf0] }
 0x84b   :  { %v1554_v24 = vpack.c.bf16 %v1551_v14, %v1550_v18  ;;  %v3338_v18 = vld [vmem:[%s5276_s12 + $0xb0] sm:$0xf]  ;;  %v3567_v14 = vld [vmem:[%s5276_s12 + $0xb8] sm:$0xf0] }
 0x84d   :  { %1628 = vmatmul.bf16.vlgmr.msra.gmra.mxu3 %v1554_v24  ;;  %v3335_v24 = vor.u32 %v3565_v29, %v3332_v7 }
 0x84f   :  { %1832 = vmatpush.bf16.msra.mxu2 %v3335_v24 }
 0x868   :  { %v1465_v19 = vpop.f32.mrf.mxu0 }
 0x86e   :  { %v1446_v17 = vpop.f32.mrf.mxu2 }
 0x86f   :  { %v3241_v41 = vmul.f32 -1.442695, %v1446_v17 }
 0x870   :  { %v1467_v2 = vpop.f32.mrf.mxu0 }
 0x871   :  { %3756 = vpow2.f32 %v3241_v41  ;;  %v3318_v41 = vld [vmem:[%s5276_s12 + $0x90] sm:$0xf] }
 0x876   :  { %v1448_v37 = vpop.f32.mrf.mxu2 }
 0x877   :  { %v3757_v42 = vpop.eup %3756  ;;  %v3242_v52 = vmul.f32 -1.442695, %v1448_v37 }
 0x878   :  { %v1484_v30 = vadd.f32 1.0, %v3757_v42  ;;  %v3562_v42 = vld [vmem:[%s5276_s12 + $0x94] sm:$0xf] }
 0x879   :  { %3758 = vpow2.f32 %v3242_v52 }
 0x87a   :  { %3760 = vrcp.f32 %v1484_v30  ;;  %v1527_v26 = vand.u32 2147483648, %v1484_v30  ;;  %vm1521_vm14 = vweird.f32 %v1484_v30  ;;  %v1525_v3 = vand.u32 2147483647, %v1484_v30 }
 0x87c   :  { %v1528_v21 = vor.u32 1.1754944e-38, %v1527_v26  ;;  %vm1526_vm3 = vcmp.eq.f32.partialorder %v1525_v3, 8.507059e+37  ;;  %v3308_v26 = vld [vmem:[%s5276_s12 + $0x84] sm:$0xf0]  ;;  %v3314_v3 = vld [vmem:[%s5276_s12 + $0x80] sm:$0xf] }
 0x87f   :  { %v3759_v10 = vpop.eup %3758 }
 0x880   :  { %v3761_v25 = vpop.eup %3760  ;;  %v1485_v33 = vadd.f32 1.0, %v3759_v10  ;;  %v3326_v10 = vld [vmem:[%s5276_s12 + $0x98] sm:$0xf] }
 0x881   :  { %v1517_v59 = vmul.f32 %v3761_v25, %v1484_v30  ;;  %vm1522_vm13 = vweird.f32 %v3761_v25  ;;  %v3320_v30 = vld [vmem:[%s5276_s12 + $0x9c] sm:$0xf0] }
 0x882   :  { %3762 = vrcp.f32 %v1485_v33  ;;  %vm1523_vm15 = vmor %vm1521_vm14, %vm1522_vm13  ;;  %v1542_v27 = vand.u32 2147483648, %v1485_v33  ;;  %v1540_v44 = vand.u32 2147483647, %v1485_v33  ;;  %vm1536_vm6 = vweird.f32 %v1485_v33 }
 0x883   :  { %v1518_v51 = vsub.f32 1.0, %v1517_v59 }
 0x884   :  { %v1543_v34 = vor.u32 1.1754944e-38, %v1542_v27  ;;  %vm1541_vm8 = vcmp.eq.f32.partialorder %v1540_v44, 8.507059e+37  ;;  %v3294_v27 = vld [vmem:[%s5276_s12 + $0x60] sm:$0xf]  ;;  %v3556_v44 = vld [vmem:[%s5276_s12 + $0x64] sm:$0xf] }
 0x885   :  { %v1519_v46 = vmul.f32 %v3761_v25, %v1518_v51  ;;  %v3306_v51 = vld [vmem:[%s5276_s12 + $0x78] sm:$0xf] }
 0x887   :  { %v1520_v35 = vadd.f32 %v3761_v25, %v1519_v46  ;;  %v3560_v46 = vld [vmem:[%s5276_s12 + $0x80] sm:$0xf0] }
 0x888   :  { %v3763_v20 = vpop.eup %3762 }
 0x889   :  { %v1532_v36 = vmul.f32 %v3763_v20, %v1485_v33  ;;  %v1524_v50 = vsel %vm1523_vm15, %v3761_v25, %v1520_v35  ;;  %vm1537_vm5 = vweird.f32 %v3763_v20  ;;  %v3564_v25 = vld [vmem:[%s5276_s12 + $0xa0] sm:$0xf0]  ;;  %v3323_v33 = vor.u32 %v3562_v42, %v3320_v30  ;;  %v3559_v35 = vld [vmem:[%s5276_s12 + $0x7c] sm:$0xf] }
 0x88a   :  { %v1529_v28 = vsel %vm1526_vm3, %v1528_v21, %v1524_v50  ;;  %vm1538_vm7 = vmor %vm1536_vm6, %vm1537_vm5  ;;  %v3327_v59 = vor.u32 %v3564_v25, %v3326_v10 }
 0x88b   :  { %v1533_v40 = vsub.f32 1.0, %v1532_v36  ;;  %v1548_v39 = vmul.f32 %v1529_v28, %v1446_v17  ;;  %v3339_v17 = vor.u32 %v3567_v14, %v3338_v18  ;;  %1833 = vmatpush.bf16.msra.mxu2 %v3323_v33  ;;  %v3561_v36 = vld [vmem:[%s5276_s12 + $0x88] sm:$0xf0] }
 0x88c   :  { %v3315_v50 = vor.u32 %v3561_v36, %v3314_v3 }
 0x88d   :  { %v1534_v43 = vmul.f32 %v3763_v20, %v1533_v40  ;;  %v1552_v53 = vmul.f32 %v1548_v39, %v1465_v19  ;;  %1851 = vmatpush.bf16.msrb.mxu0 %v3339_v17  ;;  %v3311_v19 = vor.u32 %v3559_v35, %v3308_v26  ;;  %v3558_v39 = vld [vmem:[%s5276_s12 + $0x70] sm:$0xf0] }
 0x88f   :  { %v1535_v32 = vadd.f32 %v3763_v20, %v1534_v43  ;;  %1834 = vmatpush.bf16.msra.mxu2 %v3311_v19  ;;  %v3557_v43 = vld [vmem:[%s5276_s12 + $0x68] sm:$0xf0] }
 0x890   :  { %v3295_v28 = vor.u32 %v3557_v43, %v3294_v27 }
 0x891   :  { %v1539_v13 = vsel %vm1538_vm7, %v3763_v20, %v1535_v32  ;;  %1852 = vmatpush.bf16.msrb.mxu0 %v3327_v59  ;;  %v3307_v20 = vor.u32 %v3560_v46, %v3306_v51  ;;  %v3296_v32 = vld [vmem:[%s5276_s12 + $0x6c] sm:$0xf0] }
 0x892   :  { %v1544_v47 = vsel %vm1541_vm8, %v1543_v34, %v1539_v13  ;;  %v3302_v34 = vld [vmem:[%s5276_s12 + $0x68] sm:$0xf] }
 0x893   :  { %v1549_v48 = vmul.f32 %v1544_v47, %v1448_v37  ;;  %v3563_v37 = vld [vmem:[%s5276_s12 + $0x98] sm:$0xf0]  ;;  %v3299_v47 = vor.u32 %v3556_v44, %v3296_v32 }
 0x894   :  { %v3319_v52 = vor.u32 %v3563_v37, %v3318_v41 }
 0x895   :  { %v1553_v62 = vmul.f32 %v1549_v48, %v1467_v2  ;;  %1853 = vmatpush.bf16.msrb.mxu0 %v3315_v50  ;;  %v3303_v48 = vor.u32 %v3558_v39, %v3302_v34  ;;  %1835 = vmatpush.bf16.msra.mxu2 %v3299_v47 }
 0x897   :  { %v1555_v38 = vpack.c.bf16 %v1553_v62, %v1552_v53 }
 0x899   :  { %1633 = vmatmul.bf16.gmra.mxu3 %v1555_v38  ;;  %1854 = vmatpush.bf16.msrb.mxu0 %v3303_v48 }
 0x8d0   :  { %v1629_v57 = vpop.f32.mrf.mxu3 }
 0x8d1   :  { %v4691_v11 = vadd.f32 %v1629_v57, %v4580_v31 }
 0x8d3   :  { %v1645_v55 = vmul.f32 %v4691_v11, %v4691_v11 }
 0x8d5   :  { %v1649_v58 = vsel %vm164_vm2, %v1645_v55, 0.0 }
 0x8d6   :  { %1650 = vadd.xlane.f32.xlu1 %v1649_v58 }
 0x8d8   :  { %v1631_v61 = vpop.f32.mrf.mxu3 }
 0x8d9   :  { %v4697_v63 = vadd.f32 %v1631_v61, %v4586_v45 }
 0x8db   :  { %v1646_v54 = vmul.f32 %v4697_v63, %v4697_v63 }
 0x8dd   :  { %v1652_v60 = vsel %vm164_vm2, %v1646_v54, 0.0 }
 0x8de   :  { %1653 = vadd.xlane.f32.xlu2 %v1652_v60 }
 0x91c   :  { %v1634_v1 = vpop.f32.mrf.mxu3 }
 0x91d   :  { %v4703_v31 = vadd.f32 %v1634_v1, %v4592_v8  ;;  %v3330_v8 = vld [vmem:[%s5276_s12 + $0xa8] sm:$0xf] }
 0x91f   :  { %v1647_v4 = vmul.f32 %v4703_v31, %v4703_v31 }
 0x921   :  { %v1655_v5 = vsel %vm164_vm2, %v1647_v4, 0.0 }
 0x922   :  { %1656 = vadd.xlane.f32.xlu0 %v1655_v5 }
 0x924   :  { %v1636_v6 = vpop.f32.mrf.mxu3 }
 0x925   :  { %v4709_v45 = vadd.f32 %v1636_v6, %v4598_v15  ;;  %v3331_v15 = vor.u32 %v3566_v49, %v3330_v8  ;;  %v3662_v8 = vld [vmem:[%s5275_s11 + $0x1] ss:$0 sm:$0xff] }
 0x927   :  { %v1648_v22 = vmul.f32 %v4709_v45, %v4709_v45  ;;  %1813 = vmatpush.bf16.msra.mxu1 %v3331_v15 }
 0x929   :  { %v1658_v0 = vsel %vm164_vm2, %v1648_v22, 0.0 }
 0x92a   :  { %1659 = vadd.xlane.f32.xlu1 %v1658_v0 }
 0x92b   :  { %1814 = vmatpush.bf16.msra.mxu1 %v3319_v52 }
 0x92f   :  { %1815 = vmatpush.bf16.msra.mxu1 %v3307_v20 }
 0x933   :  { %1816 = vmatpush.bf16.msra.mxu1 %v3295_v28 }
 0x949   :  { %v1651_v40 = vpop.xlane.xlu1 %1650 }
 0x94a   :  { %v1661_v21 = vmul.f32 %v1651_v40, %v4180_v56 }
 0x94c   :  { %v1665_v13 = vadd.f32 1e-06, %v1661_v21 }
 0x94e   :  { %3764 = vrsqrt.f32 %v1665_v13  ;;  %vm1675_vm10 = vweird.f32 %v1665_v13 }
 0x951   :  { %v1654_v2 = vpop.xlane.xlu2 %1653 }
 0x952   :  { %v1662_v53 = vmul.f32 %v1654_v2, %v4180_v56 }
 0x954   :  { %v3765_v62 = vpop.eup %3764  ;;  %v1666_v38 = vadd.f32 1e-06, %v1662_v53 }
 0x955   :  { %v1670_v57 = vmul.f32 %v3765_v62, %v1665_v13  ;;  %vm1676_vm9 = vweird.f32 %v3765_v62 }
 0x956   :  { %3766 = vrsqrt.f32 %v1666_v38  ;;  %vm1677_vm11 = vmor %vm1675_vm10, %vm1676_vm9  ;;  %vm1685_vm13 = vweird.f32 %v1666_v38 }
 0x957   :  { %v1671_v55 = vmul.f32 %v3765_v62, %v1670_v57 }
 0x959   :  { %v1672_v58 = vmul.f32 0.5, %v1671_v55 }
 0x95b   :  { %v1673_v61 = vsub.f32 1.5, %v1672_v58 }
 0x95c   :  { %v3767_v54 = vpop.eup %3766 }
 0x95d   :  { %v1680_v60 = vmul.f32 %v3767_v54, %v1666_v38  ;;  %v1674_v1 = vmul.f32 %v3765_v62, %v1673_v61  ;;  %vm1686_vm12 = vweird.f32 %v3767_v54 }
 0x95e   :  { %vm1687_vm14 = vmor %vm1685_vm13, %vm1686_vm12 }
 0x95f   :  { %v1681_v4 = vmul.f32 %v3767_v54, %v1680_v60  ;;  %v1678_v6 = vsel %vm1677_vm11, %v3765_v62, %v1674_v1 }
 0x960   :  { %v1709_v49 = vmul.f32 %v1678_v6, %v4691_v11 }
 0x961   :  { %v1682_v5 = vmul.f32 0.5, %v1681_v4 }
 0x962   :  { %v1716_v7 = vmul.f32 %v3662_v8, %v1709_v49 }
 0x963   :  { %v1683_v22 = vsub.f32 1.5, %v1682_v5 }
 0x965   :  { %v1684_v0 = vmul.f32 %v3767_v54, %v1683_v22 }
 0x967   :  { %v1688_v29 = vsel %vm1687_vm14, %v3767_v54, %v1684_v0 }
 0x968   :  { %v1710_v15 = vmul.f32 %v1688_v29, %v4697_v63 }
 0x96a   :  { %v1717_v18 = vmul.f32 %v3662_v8, %v1710_v15 }
 0x96c   :  { %v1720_v14 = vpack.c.bf16 %v1717_v18, %v1716_v7 }
 0x96e   :  { %3340 = vmatmul.msk.bf16.vlgmr.msra.gmra.mxu1 %vm164_vm2, %v1720_v14  ;;  %3342 = vmatmul.msk.bf16.vlgmr.msra.gmra.mxu2 %vm164_vm2, %v1720_v14 }
 0x96f   :  { %3344 = vmatmul.msk.bf16.vlgmr.msrb.gmra.mxu0 %vm164_vm2, %v1720_v14 }
 0x995   :  { %v1657_v24 = vpop.xlane.xlu0 %1656 }
 0x996   :  { %v1663_v17 = vmul.f32 %v1657_v24, %v4180_v56 }
 0x998   :  { %v1667_v41 = vadd.f32 1e-06, %v1663_v17  ;;  %v3868_v17 = vld [vmem:[%s5278_s5] sm:$0xff] }
 0x99a   :  { %3768 = vrsqrt.f32 %v1667_v41  ;;  %vm1695_vm3 = vweird.f32 %v1667_v41 }
 0x99d   :  { %v1660_v37 = vpop.xlane.xlu1 %1659 }
 0x99e   :  { %v1664_v42 = vmul.f32 %v1660_v37, %v4180_v56 }
 0x9a0   :  { %v3769_v52 = vpop.eup %3768  ;;  %v1668_v30 = vadd.f32 1e-06, %v1664_v42 }
 0x9a1   :  { %v1690_v10 = vmul.f32 %v3769_v52, %v1667_v41  ;;  %vm1696_vm15 = vweird.f32 %v3769_v52 }
 0x9a2   :  { %3770 = vrsqrt.f32 %v1668_v30  ;;  %vm1697_vm5 = vmor %vm1695_vm3, %vm1696_vm15  ;;  %vm1705_vm7 = vweird.f32 %v1668_v30 }
 0x9a3   :  { %v1691_v25 = vmul.f32 %v3769_v52, %v1690_v10 }
 0x9a5   :  { %v1692_v33 = vmul.f32 0.5, %v1691_v25 }
 0x9a7   :  { %v1693_v59 = vsub.f32 1.5, %v1692_v33 }
 0x9a8   :  { %v3771_v51 = vpop.eup %3770 }
 0x9a9   :  { %v1700_v46 = vmul.f32 %v3771_v51, %v1668_v30  ;;  %v1694_v35 = vmul.f32 %v3769_v52, %v1693_v59  ;;  %vm1706_vm6 = vweird.f32 %v3771_v51  ;;  %v3870_v59 = vld [vmem:[%s5278_s5 + $0x10] sm:$0xff] }
 0x9aa   :  { %vm1707_vm8 = vmor %vm1705_vm7, %vm1706_vm6 }
 0x9ab   :  { %v1701_v20 = vmul.f32 %v3771_v51, %v1700_v46  ;;  %v1698_v3 = vsel %vm1697_vm5, %v3769_v52, %v1694_v35  ;;  %v3871_v35 = vld [vmem:[%s5278_s5 + $0x18] sm:$0xff] }
 0x9ac   :  { %v1711_v50 = vmul.f32 %v1698_v3, %v4703_v31 }
 0x9ad   :  { %v1702_v26 = vmul.f32 0.5, %v1701_v20 }
 0x9ae   :  { %v1718_v27 = vmul.f32 %v3662_v8, %v1711_v50 }
 0x9af   :  { %v1703_v36 = vsub.f32 1.5, %v1702_v26 }
 0x9b1   :  { %v1704_v19 = vmul.f32 %v3771_v51, %v1703_v36 }
 0x9b3   :  { %v1708_v40 = vsel %vm1707_vm8, %v3771_v51, %v1704_v19 }
 0x9b4   :  { %v1712_v21 = vmul.f32 %v1708_v40, %v4709_v45 }
 0x9b6   :  { %v1719_v43 = vmul.f32 %v3662_v8, %v1712_v21 }
 0x9b8   :  { %v1721_v44 = vpack.c.bf16 %v1719_v43, %v1718_v27 }
 0x9ba   :  { %3341 = vmatmul.msk.bf16.gmra.mxu1 %vm164_vm2, %v1721_v44  ;;  %3343 = vmatmul.msk.bf16.gmra.mxu2 %vm164_vm2, %v1721_v44 }
 0x9bb   :  { %3345 = vmatmul.msk.bf16.gmra.mxu0 %vm164_vm2, %v1721_v44 }
 0x9eb   :  { %v4803_v28 = vpop.f32.mrf.mxu1 }
 0x9ec   :  { %v1856_v47 = vpop.f32.mrf.mxu0  ;;  %v1870_v15 = vmul.f32 %v4803_v28, %v4258_v9  ;;  %v1866_v44 = vmul.f32 %v3868_v17, %v4803_v28 }
 0x9ed   :  { %v1930_v54 = vpack.c.bf16 %v1856_v47, %v1856_v47 }
 0x9ef   :  { %v2035_v8 = vunpack.c.l.b16 %v1930_v54 }
 0x9f1   :  { %v1837_v32 = vpop.f32.mrf.mxu2 }
 0x9f2   :  { %v1902_v34 = vmul.f32 %v1837_v32, %v4258_v9  ;;  %v1898_v41 = vmul.f32 %v3868_v17, %v1837_v32  ;;  %v3869_v9 = vld [vmem:[%s5278_s5 + $0x8] sm:$0xff] }
 0x9f3   :  { %v1820_v39 = vpop.f32.mrf.mxu1 }
 0x9f4   :  { %1910 = vrot.lane.b32.xlu1 %v1902_v34, %s3877_s26  ;;  %v1871_v13 = vmul.f32 %v1820_v39, %v4266_v16  ;;  %v1858_v48 = vpop.f32.mrf.mxu0  ;;  %v1867_v50 = vmul.f32 %v3869_v9, %v1820_v39 }
 0x9f5   :  { %v1931_v58 = vpack.c.bf16 %v1858_v48, %v1858_v48 }
 0x9f7   :  { %v2036_v4 = vunpack.c.l.b16 %v1931_v58 }
 0x9f9   :  { %v1839_v2 = vpop.f32.mrf.mxu2  ;;  %v4818_v49 = vpack.c.b16 %v2036_v4, %v2035_v8 }
 0x9fa   :  { %v1903_v22 = vmul.f32 %v1839_v2, %v4266_v16 }
 0x9fc   :  { %1880 = vrot.lane.b32.xlu1 %v1871_v13, %s3877_s26 }
 0xa37   :  { %v1823_v29 = vpop.f32.mrf.mxu1 }
 0xa38   :  { %v1861_v53 = vpop.f32.mrf.mxu0  ;;  %v1872_v7 = vmul.f32 %v1823_v29, %v4262_v12 }
 0xa39   :  { %v1932_v57 = vpack.c.bf16 %v1861_v53, %v1861_v53  ;;  %v1868_v53 = vmul.f32 %v3870_v59, %v1823_v29 }
 0xa3b   :  { %v2037_v60 = vunpack.c.l.b16 %v1932_v57 }
 0xa3d   :  { %v1842_v62 = vpop.f32.mrf.mxu2 }
 0xa3e   :  { %v1904_v38 = vmul.f32 %v1842_v62, %v4262_v12  ;;  %v1899_v12 = vmul.f32 %v3869_v9, %v1839_v2  ;;  %v1900_v51 = vmul.f32 %v3870_v59, %v1842_v62 }
 0xa3f   :  { %v1825_v16 = vpop.f32.mrf.mxu1 }
 0xa40   :  { %v1863_v55 = vpop.f32.mrf.mxu0  ;;  %1914 = vrot.lane.b32.xlu2 %v1904_v38, %s3877_s26  ;;  %v1873_v18 = vmul.f32 %v1825_v16, %v4274_v23 }
 0xa41   :  { %v1933_v61 = vpack.c.bf16 %v1863_v55, %v1863_v55  ;;  %v1869_v55 = vmul.f32 %v3871_v35, %v1825_v16 }
 0xa43   :  { %v2038_v1 = vunpack.c.l.b16 %v1933_v61 }
 0xa45   :  { %v4811_v5 = vpack.c.b16 %v2038_v1, %v2037_v60  ;;  %v1844_v6 = vpop.f32.mrf.mxu2 }
 0xa46   :  { %v1905_v0 = vmul.f32 %v1844_v6, %v4274_v23  ;;  %v1901_v20 = vmul.f32 %v3871_v35, %v1844_v6 }
 0xa47   :  { %2055 = vmatpush.bf16.msrb.mxu1 %v4811_v5 }
 0xa48   :  { %1912 = vrot.lane.b32.xlu2 %v1903_v22, %s3877_s26  ;;  %1916 = vrot.lane.b32.xlu0 %v1905_v0, %s3877_s26 }
 0xa4b   :  { %2056 = vmatpush.bf16.msrb.mxu1 %v4818_v49 }
 0xa50   :  { %1878 = vrot.lane.b32.xlu0 %v1870_v15, %s3877_s26  ;;  %1882 = vrot.lane.b32.xlu2 %v1872_v7, %s3877_s26 }
 0xa58   :  { %1884 = vrot.lane.b32.xlu0 %v1873_v18, %s3877_s26 }
 0xa66   :  { %v1911_v24 = vpop.permute.xlu1 %1910 }
 0xa67   :  { %v1922_v37 = vadd.f32 %v1911_v24, %v1898_v41 }
 0xa69   :  { %v1926_v52 = vpack.c.bf16 %v1922_v37, %v1922_v37 }
 0xa6b   :  { %v1948_v23 = vunpack.c.l.b16 %v1926_v52 }
 0xa6e   :  { %v1881_v19 = vpop.permute.xlu1 %1880 }
 0xa6f   :  { %v1891_v21 = vadd.f32 %v1881_v19, %v1867_v50  ;;  %v4891_v50 = vld [vmem:[%s5279_s1 + $0x10] sm:$0xff] }
 0xa71   :  { %v1895_v13 = vpack.c.bf16 %v1891_v21, %v1891_v21 }
 0xa73   :  { %v1939_v38 = vunpack.c.l.b16 %v1895_v13 }
 0xa9a   :  { %v1915_v14 = vpop.permute.xlu2 %1914 }
 0xa9b   :  { %v1924_v46 = vadd.f32 %v1915_v14, %v1900_v51 }
 0xa9d   :  { %v1928_v3 = vpack.c.bf16 %v1924_v46, %v1924_v46 }
 0xa9f   :  { %v1950_v27 = vunpack.c.l.b16 %v1928_v3 }
 0xaa2   :  { %v1913_v42 = vpop.permute.xlu2 %1912 }
 0xaa3   :  { %v1923_v30 = vadd.f32 %v1913_v42, %v1899_v12 }
 0xaa5   :  { %v1927_v10 = vpack.c.bf16 %v1923_v30, %v1923_v30 }
 0xaa7   :  { %v1949_v25 = vunpack.c.l.b16 %v1927_v10 }
 0xaa9   :  { %v1952_v33 = vpack.c.b16 %v1949_v25, %v1948_v23 }
 0xaaa   :  { %v1883_v2 = vpop.permute.xlu2 %1882 }
 0xaab   :  { %2072 = vrot.lane.b32.xlu2 %v1952_v33, %s3880_s23  ;;  %v1892_v39 = vadd.f32 %v1883_v2, %v1868_v53  ;;  %v1961_v60 = vsel %vm89_vm0, %v1952_v33, 0 }
 0xaad   :  { %v1896_v54 = vpack.c.bf16 %v1892_v39, %v1892_v39 }
 0xaaf   :  { %v1940_v4 = vunpack.c.l.b16 %v1896_v54 }
 0xaba   :  { %v1917_v26 = vpop.permute.xlu0 %1916 }
 0xabb   :  { %v1925_v36 = vadd.f32 %v1917_v26, %v1901_v20  ;;  %v4883_v20 = vld [vmem:[%s5279_s1 + $0x8] sm:$0xff] }
 0xabd   :  { %v1929_v40 = vpack.c.bf16 %v1925_v36, %v1925_v36 }
 0xabf   :  { %v1951_v43 = vunpack.c.l.b16 %v1929_v40 }
 0xac1   :  { %v1953_v32 = vpack.c.b16 %v1951_v43, %v1950_v27  ;;  %v4898_v43 = vld [vmem:[%s5279_s1 + $0x18] sm:$0xff] }
 0xac2   :  { %v1879_v34 = vpop.permute.xlu0 %1878 }
 0xac3   :  { %v1890_v47 = vadd.f32 %v1879_v34, %v1866_v44  ;;  %2074 = vrot.lane.b32.xlu1 %v1953_v32, %s3880_s23  ;;  %v1964_v48 = vsel %vm89_vm0, %v1953_v32, 0 }
 0xac4   :  { %1972 = vmatpush.bf16.xpose.msrb.mxu3 %v1964_v48 }
 0xac5   :  { %v1894_v62 = vpack.c.bf16 %v1890_v47, %v1890_v47 }
 0xac7   :  { %v1938_v57 = vunpack.c.l.b16 %v1894_v62 }
 0xac9   :  { %v1942_v58 = vpack.c.b16 %v1939_v38, %v1938_v57 }
 0xaca   :  { %v1885_v61 = vpop.permute.xlu0 %1884 }
 0xacb   :  { %v1893_v28 = vadd.f32 %v1885_v61, %v1869_v55  ;;  %2190 = vrot.lane.b32.xlu1 %v1953_v32, %s3876_s10  ;;  %2068 = vrot.lane.b32.xlu0 %v1942_v58, %s3880_s23 }
 0xacc   :  { %1973 = vmatpush.bf16.xpose.msrb.mxu3 %v1961_v60 }
 0xacd   :  { %v1897_v1 = vpack.c.bf16 %v1893_v28, %v1893_v28 }
 0xacf   :  { %v1941_v6 = vunpack.c.l.b16 %v1897_v1 }
 0xad1   :  { %v1943_v22 = vpack.c.b16 %v1941_v6, %v1940_v4 }
 0xad3   :  { %2188 = vrot.lane.b32.xlu1 %v1952_v33, %s3876_s10  ;;  %2070 = vrot.lane.b32.xlu2 %v1943_v22, %s3880_s23 }
 0xad4   :  { %2306 = vrot.lane.b32.xlu0 %v1953_v32, %s3881_s24  ;;  %3346 = vmatmul.msk.bf16.vlgmr.msrb.gmra.mxu3 %vm89_vm0, %v1942_v58 }
 0xadb   :  { %2304 = vrot.lane.b32.xlu2 %v1952_v33, %s3881_s24  ;;  %2300 = vrot.lane.b32.xlu1 %v1942_v58, %s3881_s24  ;;  %v4875_v33 = vld [vmem:[%s5279_s1] sm:$0xff] }
 0xadc   :  { %2184 = vrot.lane.b32.xlu0 %v1942_v58, %s3876_s10 }
 0xae3   :  { %2186 = vrot.lane.b32.xlu2 %v1943_v22, %s3876_s10  ;;  %2153 = vrot.lane.b32.xlu1 %v4818_v49, %s3880_s23 }
 0xae4   :  { %2302 = vrot.lane.b32.xlu0 %v1943_v22, %s3881_s24  ;;  %3347 = vmatmul.msk.bf16.gmra.mxu3 %vm89_vm0, %v1943_v22 }
 0xaeb   :  { %2271 = vrot.lane.b32.xlu2 %v4811_v5, %s3876_s10 }
 0xaec   :  { %2155 = vrot.lane.b32.xlu0 %v4811_v5, %s3880_s23 }
 0xb05   :  { %v2073_v0 = vpop.permute.xlu2 %2072 }
 0xb06   :  { %v2083_v14 = vsel %vm89_vm0, %v2073_v0, 0 }
 0xb2d   :  { %v2071_v8 = vpop.permute.xlu2 %2070 }
 0xb35   :  { %v2305_v29 = vpop.permute.xlu2 %2304  ;;  %v2075_v15 = vpop.permute.xlu1 %2074 }
 0xb36   :  { %v2086_v7 = vsel %vm89_vm0, %v2075_v15, 0  ;;  %v2315_v30 = vsel %vm89_vm0, %v2305_v29, 0 }
 0xb37   :  { %2094 = vmatpush.bf16.xpose.msrb.mxu2 %v2086_v7 }
 0xb3d   :  { %v2187_v16 = vpop.permute.xlu2 %2186  ;;  %v2069_v18 = vpop.permute.xlu0 %2068 }
 0xb3e   :  { %v2191_v24 = vpop.permute.xlu1 %2190 }
 0xb3f   :  { %v2202_v17 = vsel %vm89_vm0, %v2191_v24, 0  ;;  %2095 = vmatpush.bf16.xpose.msrb.mxu2 %v2083_v14 }
 0xb40   :  { %2210 = vmatpush.bf16.xpose.msra.mxu3 %v2202_v17 }
 0xb45   :  { %v2272_v41 = vpop.permute.xlu2 %2271 }
 0xb46   :  { %v2307_v37 = vpop.permute.xlu0 %2306  ;;  %v2189_v9 = vpop.permute.xlu1 %2188  ;;  %3350 = vmatmul.msk.bf16.vlgmr.msrb.gmra.mxu2 %vm89_vm0, %v2069_v18  ;;  %2287 = vmatpush.bf16.msra.mxu1 %v2272_v41 }
 0xb47   :  { %v2318_v12 = vsel %vm89_vm0, %v2307_v37, 0  ;;  %v2199_v42 = vsel %vm89_vm0, %v2189_v9, 0 }
 0xb48   :  { %2211 = vmatpush.bf16.xpose.msra.mxu3 %v2199_v42  ;;  %2326 = vmatpush.bf16.xpose.msra.mxu2 %v2318_v12 }
 0xb4e   :  { %v2185_v52 = vpop.permute.xlu0 %2184  ;;  %v2301_v25 = vpop.permute.xlu1 %2300 }
 0xb4f   :  { %3354 = vmatmul.msk.bf16.vlgmr.msra.gmra.mxu3 %vm89_vm0, %v2185_v52 }
 0xb50   :  { %2327 = vmatpush.bf16.xpose.msra.mxu2 %v2315_v30 }
 0xb56   :  { %v2303_v10 = vpop.permute.xlu0 %2302  ;;  %3351 = vmatmul.msk.bf16.gmra.mxu2 %vm89_vm0, %v2071_v8  ;;  %v2154_v3 = vpop.permute.xlu1 %2153 }
 0xb57   :  { %v1975_v23 = vpop.f32.mrf.mxu3 }
 0xb58   :  { %v1976_v59 = vadd.f32 %v4875_v33, %v1975_v23 }
 0xb5a   :  { %v1985_v51 = vsel %vm159_vm1, %v1976_v59, -inf }
 0xb5b   :  { %1986 = vmax.xlane.f32.xlu1 %v1985_v51 }
 0xb5e   :  { %v2156_v46 = vpop.permute.xlu0 %2155 }
 0xb5f   :  { %v1977_v35 = vpop.f32.mrf.mxu3  ;;  %2171 = vmatpush.bf16.msra.mxu0 %v2156_v46  ;;  %3355 = vmatmul.msk.bf16.gmra.mxu3 %vm89_vm0, %v2187_v16 }
 0xb60   :  { %v1978_v26 = vadd.f32 %v4883_v20, %v1977_v35 }
 0xb62   :  { %v1988_v36 = vsel %vm159_vm1, %v1978_v26, -inf }
 0xb63   :  { %1989 = vmax.xlane.f32.xlu2 %v1988_v36  ;;  %2172 = vmatpush.bf16.msra.mxu0 %v2154_v3 }
 0xb66   :  { %3358 = vmatmul.msk.bf16.vlgmr.msra.gmra.mxu2 %vm89_vm0, %v2301_v25 }
 0xb67   :  { %v1980_v19 = vpop.f32.mrf.mxu3 }
 0xb68   :  { %v1981_v40 = vadd.f32 %v4891_v50, %v1980_v19 }
 0xb6a   :  { %v1991_v21 = vsel %vm159_vm1, %v1981_v40, -inf }
 0xb6b   :  { %1992 = vmax.xlane.f32.xlu2 %v1991_v21 }
 0xb6f   :  { %v1982_v27 = vpop.f32.mrf.mxu3 }
 0xb70   :  { %v4901_v44 = vadd.f32 %v4898_v43, %v1982_v27 }
 0xb72   :  { %v1994_v32 = vsel %vm159_vm1, %v4901_v44, -inf }
 0xb73   :  { %1995 = vmax.xlane.f32.xlu0 %v1994_v32 }
 0xb76   :  { %3359 = vmatmul.msk.bf16.gmra.mxu2 %vm89_vm0, %v2303_v10 }
 0xbc9   :  { %v2097_v34 = vpop.f32.mrf.mxu2 }
 0xbca   :  { %v4907_v13 = vadd.f32 %v4875_v33, %v2097_v34 }
 0xbcc   :  { %v2107_v47 = vsel %vm159_vm1, %v4907_v13, -inf }
 0xbcd   :  { %2108 = vmax.xlane.f32.xlu0 %v2107_v47 }
 0xbce   :  { %v1987_v48 = vpop.xlane.xlu1 %1986 }
 0xbcf   :  { %v1997_v2 = vsub.f32 %v1976_v59, %v1987_v48 }
 0xbd1   :  { %v2001_v53 = vmul.f32 1.442695, %v1997_v2  ;;  %v2099_v62 = vpop.f32.mrf.mxu2 }
 0xbd2   :  { %v4912_v38 = vadd.f32 %v4883_v20, %v2099_v62  ;;  %v2213_v39 = vpop.f32.mrf.mxu3 }
 0xbd3   :  { %3772 = vpow2.f32 %v2001_v53  ;;  %v4915_v57 = vadd.f32 %v4875_v33, %v2213_v39 }
 0xbd4   :  { %v2110_v55 = vsel %vm159_vm1, %v4912_v38, -inf }
 0xbd5   :  { %2111 = vmax.xlane.f32.xlu1 %v2110_v55  ;;  %v2223_v58 = vsel %vm159_vm1, %v4915_v57, -inf }
 0xbd6   :  { %v1990_v61 = vpop.xlane.xlu2 %1989  ;;  %2224 = vmax.xlane.f32.xlu0 %v2223_v58 }
 0xbd7   :  { %v1998_v54 = vsub.f32 %v1978_v26, %v1990_v61 }
 0xbd9   :  { %v4921_v28 = vpop.eup %3772  ;;  %v2003_v60 = vmul.f32 1.442695, %v1998_v54  ;;  %v2102_v1 = vpop.f32.mrf.mxu2 }
 0xbda   :  { %v2215_v4 = vpop.f32.mrf.mxu3  ;;  %v2009_v6 = vsel %vm159_vm1, %v4921_v28, 0.0  ;;  %v4933_v29 = vadd.f32 %v4891_v50, %v2102_v1 }
 0xbdb   :  { %3774 = vpow2.f32 %v2003_v60  ;;  %v4926_v22 = vadd.f32 %v4883_v20, %v2215_v4  ;;  %2010 = vadd.xlane.f32.xlu2 %v2009_v6 }
 0xbdc   :  { %v2113_v41 = vsel %vm159_vm1, %v4933_v29, -inf }
 0xbdd   :  { %v2226_v0 = vsel %vm159_vm1, %v4926_v22, -inf }
 0xbde   :  { %2227 = vmax.xlane.f32.xlu1 %v2226_v0  ;;  %v1993_v15 = vpop.xlane.xlu2 %1992 }
 0xbdf   :  { %v1999_v24 = vsub.f32 %v1981_v40, %v1993_v15 }
 0xbe1   :  { %v4930_v8 = vpop.eup %3774  ;;  %v2104_v7 = vpop.f32.mrf.mxu2  ;;  %v2005_v37 = vmul.f32 1.442695, %v1999_v24 }
 0xbe2   :  { %v4936_v16 = vadd.f32 %v4898_v43, %v2104_v7  ;;  %v2218_v18 = vpop.f32.mrf.mxu3  ;;  %v2012_v14 = vsel %vm159_vm1, %v4930_v8, 0.0 }
 0xbe3   :  { %2013 = vadd.xlane.f32.xlu0 %v2012_v14  ;;  %v4945_v9 = vadd.f32 %v4891_v50, %v2218_v18  ;;  %3776 = vpow2.f32 %v2005_v37 }
 0xbe4   :  { %v2116_v17 = vsel %vm159_vm1, %v4936_v16, -inf }
 0xbe5   :  { %2117 = vmax.xlane.f32.xlu2 %v2116_v17  ;;  %v2229_v30 = vsel %vm159_vm1, %v4945_v9, -inf }
 0xbe6   :  { %2114 = vmax.xlane.f32.xlu1 %v2113_v41  ;;  %v1996_v23 = vpop.xlane.xlu0 %1995 }
 0xbe7   :  { %v2000_v46 = vsub.f32 %v4901_v44, %v1996_v23 }
 0xbe9   :  { %v2329_v12 = vpop.f32.mrf.mxu2  ;;  %v4954_v59 = vpop.eup %3776  ;;  %v2007_v3 = vmul.f32 1.442695, %v2000_v46 }
 0xbea   :  { %v2220_v42 = vpop.f32.mrf.mxu3  ;;  %v2015_v26 = vsel %vm159_vm1, %v4954_v59, 0.0  ;;  %v4965_v36 = vadd.f32 %v4875_v33, %v2329_v12 }
 0xbeb   :  { %v4948_v52 = vadd.f32 %v4898_v43, %v2220_v42  ;;  %3778 = vpow2.f32 %v2007_v3 }
 0xbec   :  { %v2339_v21 = vsel %vm159_vm1, %v4965_v36, -inf }
 0xbed   :  { %v2232_v10 = vsel %vm159_vm1, %v4948_v52, -inf }
 0xbee   :  { %2230 = vmax.xlane.f32.xlu1 %v2229_v30  ;;  %2233 = vmax.xlane.f32.xlu2 %v2232_v10 }
 0xbf1   :  { %v2331_v25 = vpop.f32.mrf.mxu2  ;;  %v4974_v44 = vpop.eup %3778 }
 0xbf2   :  { %v4957_v51 = vadd.f32 %v4883_v20, %v2331_v25 }
 0xbf4   :  { %v2342_v35 = vsel %vm159_vm1, %v4957_v51, -inf }
 0xbf5   :  { %2343 = vmax.xlane.f32.xlu0 %v2342_v35 }
 0xbf6   :  { %2016 = vadd.xlane.f32.xlu2 %v2015_v26 }
 0xbf9   :  { %v2334_v19 = vpop.f32.mrf.mxu2 }
 0xbfa   :  { %v4968_v40 = vadd.f32 %v4891_v50, %v2334_v19  ;;  %v2018_v50 = vsel %vm159_vm1, %v4974_v44, 0.0 }
 0xbfc   :  { %v2345_v20 = vsel %vm159_vm1, %v4968_v40, -inf }
 0xbfd   :  { %2346 = vmax.xlane.f32.xlu0 %v2345_v20 }
 0xbfe   :  { %2340 = vmax.xlane.f32.xlu2 %v2339_v21 }
 0xc01   :  { %v2336_v27 = vpop.f32.mrf.mxu2 }
 0xc02   :  { %v4977_v32 = vadd.f32 %v4898_v43, %v2336_v27 }
 0xc04   :  { %v2348_v33 = vsel %vm159_vm1, %v4977_v32, -inf }
 0xc05   :  { %2349 = vmax.xlane.f32.xlu1 %v2348_v33 }
 0xc06   :  { %2019 = vadd.xlane.f32.xlu2 %v2018_v50 }
 0xc40   :  { %v2109_v34 = vpop.xlane.xlu0 %2108 }
 0xc41   :  { %v2119_v47 = vsub.f32 %v4907_v13, %v2109_v34 }
 0xc43   :  { %v2123_v48 = vmul.f32 1.442695, %v2119_v47 }
 0xc45   :  { %3780 = vpow2.f32 %v2123_v48 }
 0xc48   :  { %v2112_v2 = vpop.xlane.xlu1 %2111 }
 0xc49   :  { %v2225_v53 = vpop.xlane.xlu0 %2224  ;;  %v2120_v55 = vsub.f32 %v4912_v38, %v2112_v2 }
 0xc4a   :  { %v2235_v62 = vsub.f32 %v4915_v57, %v2225_v53 }
 0xc4b   :  { %v4985_v39 = vpop.eup %3780  ;;  %v2125_v61 = vmul.f32 1.442695, %v2120_v55 }
 0xc4c   :  { %v2239_v43 = vmul.f32 1.442695, %v2235_v62  ;;  %v2131_v58 = vsel %vm159_vm1, %v4985_v39, 0.0 }
 0xc4d   :  { %2132 = vadd.xlane.f32.xlu1 %v2131_v58 }
 0xc4e   :  { %3782 = vpow2.f32 %v2239_v43  ;;  %v2011_v54 = vpop.xlane.xlu2 %2010 }
 0xc4f   :  { %3784 = vpow2.f32 %v2125_v61 }
 0xc50   :  { %3786 = vrcp.f32 %v2011_v54 }
 0xc51   :  { %v2228_v60 = vpop.xlane.xlu1 %2227 }
 0xc52   :  { %v2236_v13 = vsub.f32 %v4926_v22, %v2228_v60 }
 0xc54   :  { %v4991_v1 = vpop.eup %3782  ;;  %v2241_v4 = vmul.f32 1.442695, %v2236_v13 }
 0xc55   :  { %v2247_v57 = vsel %vm159_vm1, %v4991_v1, 0.0  ;;  %v4996_v7 = vpop.eup %3784 }
 0xc56   :  { %3788 = vpow2.f32 %v2241_v4  ;;  %v2014_v38 = vpop.xlane.xlu0 %2013  ;;  %2248 = vadd.xlane.f32.xlu2 %v2247_v57  ;;  %v3787_v18 = vpop.eup %3786  ;;  %v2134_v37 = vsel %vm159_vm1, %v4996_v7, 0.0 }
 0xc57   :  { %3790 = vrcp.f32 %v2014_v38 }
 0xc58   :  { %v2118_v6 = vpop.xlane.xlu2 %2117 }
 0xc59   :  { %v2122_v0 = vsub.f32 %v4936_v16, %v2118_v6  ;;  %v2115_v15 = vpop.xlane.xlu1 %2114  ;;  %v2025_v16 = vmul.f32 %v3787_v18, %v4921_v28 }
 0xc5a   :  { %v2121_v22 = vsub.f32 %v4933_v29, %v2115_v15 }
 0xc5b   :  { %v2129_v14 = vmul.f32 1.442695, %v2122_v0 }
 0xc5c   :  { %v4999_v24 = vpop.eup %3788  ;;  %v2127_v17 = vmul.f32 1.442695, %v2121_v22 }
 0xc5d   :  { %v3791_v41 = vpop.eup %3790  ;;  %3792 = vpow2.f32 %v2129_v14  ;;  %v2250_v12 = vsel %vm159_vm1, %v4999_v24, 0.0 }
 0xc5e   :  { %v2026_v42 = vmul.f32 %v3791_v41, %v4930_v8  ;;  %3794 = vpow2.f32 %v2127_v17  ;;  %2135 = vadd.xlane.f32.xlu2 %v2134_v37  ;;  %2251 = vadd.xlane.f32.xlu1 %v2250_v12 }
 0xc60   :  { %v2029_v29 = vpack.c.bf16 %v2026_v42, %v2025_v16 }
 0xc61   :  { %v2234_v30 = vpop.xlane.xlu2 %2233  ;;  %v2231_v53 = vpop.xlane.xlu1 %2230 }
 0xc62   :  { %3348 = vmatmul.msk.bf16.vlgmr.msrb.gmra.mxu1 %vm159_vm1, %v2029_v29  ;;  %v2237_v43 = vsub.f32 %v4945_v9, %v2231_v53  ;;  %v2238_v4 = vsub.f32 %v4948_v52, %v2234_v30 }
 0xc63   :  { %v5008_v10 = vpop.eup %3792 }
 0xc64   :  { %v5010_v23 = vpop.eup %3794  ;;  %v2140_v25 = vsel %vm159_vm1, %v5008_v10, 0.0  ;;  %v2243_v58 = vmul.f32 1.442695, %v2237_v43 }
 0xc65   :  { %v2137_v46 = vsel %vm159_vm1, %v5010_v23, 0.0 }
 0xc66   :  { %2141 = vadd.xlane.f32.xlu2 %v2140_v25  ;;  %2138 = vadd.xlane.f32.xlu0 %v2137_v46 }
 0xc68   :  { %v2344_v8 = vpop.xlane.xlu0 %2343 }
 0xc69   :  { %v2017_v28 = vpop.xlane.xlu2 %2016  ;;  %v2352_v3 = vsub.f32 %v4957_v51, %v2344_v8 }
 0xc6b   :  { %v2357_v20 = vmul.f32 1.442695, %v2352_v3 }
 0xc70   :  { %v2347_v2 = vpop.xlane.xlu0 %2346 }
 0xc71   :  { %v2341_v35 = vpop.xlane.xlu2 %2340  ;;  %v2353_v62 = vsub.f32 %v4968_v40, %v2347_v2 }
 0xc72   :  { %v2351_v26 = vsub.f32 %v4965_v36, %v2341_v35 }
 0xc73   :  { %v2359_v55 = vmul.f32 1.442695, %v2353_v62 }
 0xc74   :  { %v2355_v19 = vmul.f32 1.442695, %v2351_v26 }
 0xc76   :  { %3796 = vpow2.f32 %v2355_v19 }
 0xc77   :  { %2269 = vrot.lane.b32.xlu1 %v4818_v49, %s3876_s10  ;;  %3798 = vrcp.f32 %v2017_v28 }
 0xc79   :  { %v2020_v21 = vpop.xlane.xlu2 %2019 }
 0xc7a   :  { %3800 = vrcp.f32 %v2020_v21  ;;  %2387 = vrot.lane.b32.xlu0 %v4811_v5, %s3881_s24 }
 0xc7b   :  { %3802 = vpow2.f32 %v2357_v20 }
 0xc7c   :  { %v5022_v27 = vpop.eup %3796  ;;  %3804 = vpow2.f32 %v2359_v55 }
 0xc7d   :  { %v2363_v36 = vsel %vm159_vm1, %v5022_v27, 0.0  ;;  %v3799_v33 = vpop.eup %3798  ;;  %3806 = vpow2.f32 %v2243_v58 }
 0xc7e   :  { %2364 = vadd.xlane.f32.xlu2 %v2363_v36  ;;  %v2027_v50 = vmul.f32 %v3799_v33, %v4954_v59  ;;  %v2350_v59 = vpop.xlane.xlu1 %2349 }
 0xc80   :  { %v3801_v51 = vpop.eup %3800 }
 0xc81   :  { %v2028_v34 = vmul.f32 %v3801_v51, %v4974_v44  ;;  %v5028_v47 = vpop.eup %3802  ;;  %v2354_v44 = vsub.f32 %v4977_v32, %v2350_v59 }
 0xc82   :  { %v2366_v5 = vsel %vm159_vm1, %v5028_v47, 0.0  ;;  %v5036_v61 = vpop.eup %3804 }
 0xc83   :  { %v2030_v48 = vpack.c.bf16 %v2028_v34, %v2027_v50  ;;  %v2361_v54 = vmul.f32 1.442695, %v2354_v44  ;;  %v5040_v60 = vpop.eup %3806  ;;  %v2369_v40 = vsel %vm159_vm1, %v5036_v61, 0.0 }
 0xc84   :  { %v2253_v9 = vsel %vm159_vm1, %v5040_v60, 0.0 }
 0xc85   :  { %3349 = vmatmul.msk.bf16.gmra.mxu1 %vm159_vm1, %v2030_v48  ;;  %3808 = vpow2.f32 %v2361_v54 }
 0xc86   :  { %2367 = vadd.xlane.f32.xlu2 %v2366_v5 }
 0xc8b   :  { %v5046_v13 = vpop.eup %3808 }
 0xc8c   :  { %v2372_v32 = vsel %vm159_vm1, %v5046_v13, 0.0 }
 0xc9e   :  { %2385 = vrot.lane.b32.xlu2 %v4818_v49, %s3881_s24  ;;  %v2245_v49 = vmul.f32 1.442695, %v2238_v4 }
 0xca0   :  { %3810 = vpow2.f32 %v2245_v49 }
 0xca1   :  { %2370 = vadd.xlane.f32.xlu1 %v2369_v40 }
 0xca4   :  { %2254 = vadd.xlane.f32.xlu0 %v2253_v9 }
 0xca6   :  { %v5051_v57 = vpop.eup %3810 }
 0xca7   :  { %v2256_v38 = vsel %vm159_vm1, %v5051_v57, 0.0 }
 0xcac   :  { %2373 = vadd.xlane.f32.xlu0 %v2372_v32 }
 0xcc0   :  { %v2133_v0 = vpop.xlane.xlu1 %2132 }
 0xcc1   :  { %3812 = vrcp.f32 %v2133_v0 }
 0xcc7   :  { %2257 = vadd.xlane.f32.xlu2 %v2256_v38  ;;  %v3813_v22 = vpop.eup %3812 }
 0xcc8   :  { %v2147_v14 = vmul.f32 %v3813_v22, %v4985_v39 }
 0xcc9   :  { %v2249_v6 = vpop.xlane.xlu2 %2248 }
 0xcd1   :  { %v2136_v15 = vpop.xlane.xlu2 %2135  ;;  %v2252_v52 = vpop.xlane.xlu1 %2251 }
 0xcd2   :  { %3814 = vrcp.f32 %v2136_v15 }
 0xcd3   :  { %3816 = vrcp.f32 %v2252_v52 }
 0xcd8   :  { %v3815_v18 = vpop.eup %3814 }
 0xcd9   :  { %v2148_v17 = vmul.f32 %v3815_v18, %v4996_v7  ;;  %v2142_v41 = vpop.xlane.xlu2 %2141  ;;  %v2139_v12 = vpop.xlane.xlu0 %2138 }
 0xcda   :  { %3818 = vrcp.f32 %v2142_v41  ;;  %v3817_v16 = vpop.eup %3816 }
 0xcdb   :  { %v2151_v37 = vpack.c.bf16 %v2148_v17, %v2147_v14  ;;  %3820 = vrcp.f32 %v2139_v12  ;;  %v2264_v25 = vmul.f32 %v3817_v16, %v4999_v24  ;;  %v3571_v17 = vld [vmem:[%s5280_s13 + $0x38] sm:$0xff]  ;;  %v3569_v12 = vld [vmem:[%s5280_s13 + $0x28] sm:$0xff]  ;;  %v3568_v16 = vld [vmem:[%s5280_s13 + $0x20] sm:$0xff] }
 0xcdc   :  { %3822 = vrcp.f32 %v2249_v6  ;;  %2521 = vmatpush.bf16.msrb.mxu3 %v3571_v17 }
 0xcdd   :  { %3352 = vmatmul.msk.bf16.vlgmr.msra.gmra.mxu0 %vm159_vm1, %v2151_v37  ;;  %v3570_v37 = vld [vmem:[%s5280_s13 + $0x30] sm:$0xff] }
 0xcdf   :  { %v2058_v58 = vpop.f32.mrf.mxu1 }
 0xce0   :  { %v3819_v42 = vpop.eup %3818  ;;  %2522 = vmatpush.bf16.msrb.mxu3 %v3570_v37  ;;  %v3407_v37 = vld [vmem:[%s5282_s15 + $0x50] sm:$0xf] }
 0xce1   :  { %v3821_v29 = vpop.eup %3820  ;;  %v2150_v39 = vmul.f32 %v3819_v42, %v5008_v10 }
 0xce2   :  { %v3823_v30 = vpop.eup %3822  ;;  %v2149_v7 = vmul.f32 %v3821_v29, %v5010_v23 }
 0xce3   :  { %v2263_v46 = vmul.f32 %v3823_v30, %v4991_v1 }
 0xce4   :  { %v2152_v35 = vpack.c.bf16 %v2150_v39, %v2149_v7  ;;  %2523 = vmatpush.bf16.msrb.mxu3 %v3569_v12  ;;  %v3575_v12 = vld [vmem:[%s5282_s15 + $0x54] sm:$0xf0] }
 0xce5   :  { %v2267_v8 = vpack.c.bf16 %v2264_v25, %v2263_v46 }
 0xce7   :  { %v2060_v59 = vpop.f32.mrf.mxu1 }
 0xce8   :  { %2524 = vmatpush.bf16.msrb.mxu3 %v3568_v16  ;;  %v3574_v16 = vld [vmem:[%s5282_s15 + $0x54] sm:$0xf] }
 0xce9   :  { %v2270_v28 = vpop.permute.xlu1 %2269 }
 0xcea   :  { %2288 = vmatpush.bf16.msra.mxu1 %v2270_v28 }
 0xcec   :  { %v2388_v26 = vpop.permute.xlu0 %2387 }
 0xced   :  { %3353 = vmatmul.msk.bf16.gmra.mxu0 %vm159_vm1, %v2152_v35  ;;  %3356 = vmatmul.msk.bf16.vlgmr.msra.gmra.mxu1 %vm159_vm1, %v2267_v8 }
 0xcee   :  { %2403 = vmatpush.bf16.msrb.mxu0 %v2388_v26 }
 0xcf1   :  { %v2365_v3 = vpop.xlane.xlu2 %2364 }
 0xcf2   :  { %3824 = vrcp.f32 %v2365_v3 }
 0xcf8   :  { %v3825_v24 = vpop.eup %3824 }
 0xcf9   :  { %v2368_v19 = vpop.xlane.xlu2 %2367  ;;  %v2379_v23 = vmul.f32 %v3825_v24, %v5022_v27 }
 0xcfa   :  { %3826 = vrcp.f32 %v2368_v19 }
 0xd00   :  { %v3827_v10 = vpop.eup %3826 }
 0xd01   :  { %v2380_v1 = vmul.f32 %v3827_v10, %v5028_v47  ;;  %v2386_v20 = vpop.permute.xlu2 %2385 }
 0xd02   :  { %2404 = vmatpush.bf16.msrb.mxu0 %v2386_v20  ;;  %v2063_v44 = vpop.f32.mrf.mxu1 }
 0xd03   :  { %v2383_v21 = vpack.c.bf16 %v2380_v1, %v2379_v23 }
 0xd05   :  { %3360 = vmatmul.msk.bf16.vlgmr.msrb.gmra.mxu0 %vm159_vm1, %v2383_v21 }
 0xd0a   :  { %v2065_v54 = vpop.f32.mrf.mxu1 }
 0xd14   :  { %v2371_v33 = vpop.xlane.xlu1 %2370 }
 0xd15   :  { %3828 = vrcp.f32 %v2371_v33 }
 0xd17   :  { %v2255_v36 = vpop.xlane.xlu0 %2254 }
 0xd1b   :  { %v3829_v50 = vpop.eup %3828 }
 0xd1c   :  { %v2381_v48 = vmul.f32 %v3829_v50, %v5036_v61 }
 0xd1f   :  { %v2374_v51 = vpop.xlane.xlu0 %2373 }
 0xd20   :  { %3830 = vrcp.f32 %v2374_v51 }
 0xd21   :  { %3832 = vrcp.f32 %v2255_v36 }
 0xd26   :  { %v3831_v34 = vpop.eup %3830 }
 0xd27   :  { %v2382_v5 = vmul.f32 %v3831_v34, %v5046_v13  ;;  %v3833_v47 = vpop.eup %3832 }
 0xd28   :  { %v2265_v62 = vmul.f32 %v3833_v47, %v5040_v60 }
 0xd29   :  { %v2384_v2 = vpack.c.bf16 %v2382_v5, %v2381_v48 }
 0xd2b   :  { %3361 = vmatmul.msk.bf16.gmra.mxu0 %vm159_vm1, %v2384_v2 }
 0xd3a   :  { %v2258_v27 = vpop.xlane.xlu2 %2257 }
 0xd3b   :  { %3834 = vrcp.f32 %v2258_v27 }
 0xd41   :  { %v3835_v53 = vpop.eup %3834 }
 0xd42   :  { %v2266_v43 = vmul.f32 %v3835_v53, %v5051_v57 }
 0xd44   :  { %v2268_v55 = vpack.c.bf16 %v2266_v43, %v2265_v62 }
 0xd46   :  { %3357 = vmatmul.msk.bf16.gmra.mxu1 %vm159_vm1, %v2268_v55 }
 0xd5a   :  { %v2174_v61 = vpop.f32.mrf.mxu0 }
 0xd62   :  { %v2176_v40 = vpop.f32.mrf.mxu0 }
 0xd63   :  { %v3630_v9 = vpack.i.bf16 %v2176_v40, %v2174_v61 }
 0xd65   :  { %3631 = vrot.lane.b32.xlu2 %v3630_v9, %s3882_s6 }
 0xd6a   :  { %v2179_v13 = vpop.f32.mrf.mxu0  ;;  %v2290_v32 = vpop.f32.mrf.mxu1 }
 0xd72   :  { %v2181_v4 = vpop.f32.mrf.mxu0  ;;  %v2292_v49 = vpop.f32.mrf.mxu1 }
 0xd73   :  { %v3645_v38 = vpack.i.bf16 %v2181_v4, %v2179_v13  ;;  %v3635_v60 = vpack.i.bf16 %v2292_v49, %v2290_v32 }
 0xd75   :  { %3646 = vrot.lane.b32.xlu2 %v3645_v38, %s3882_s6  ;;  %3636 = vrot.lane.b32.xlu0 %v3635_v60, %s3878_s27 }
 0xd82   :  { %v2406_v57 = vpop.f32.mrf.mxu0 }
 0xd8a   :  { %v2408_v6 = vpop.f32.mrf.mxu0 }
 0xd8b   :  { %v3640_v0 = vpack.i.bf16 %v2408_v6, %v2406_v57  ;;  %v3579_v57 = vld [vmem:[%s5282_s15 + $0x74] sm:$0xf0]  ;;  %v3578_v6 = vld [vmem:[%s5282_s15 + $0x74] sm:$0xf] }
 0xd8d   :  { %3641 = vrot.lane.b32.xlu1 %v3640_v0, %s3883_s30  ;;  %v3425_v0 = vld [vmem:[%s5282_s15 + $0x78] sm:$0xf0] }
 0xda8   :  { %v2411_v15 = vpop.f32.mrf.mxu0 }
 0xdb0   :  { %v2413_v22 = vpop.f32.mrf.mxu0 }
 0xdb1   :  { %v3655_v18 = vpack.i.bf16 %v2413_v22, %v2411_v15  ;;  %v3428_v15 = vor.u32 %v3578_v6, %v3425_v0  ;;  %v3415_v22 = vld [vmem:[%s5282_s15 + $0x60] sm:$0xf] }
 0xdb3   :  { %3656 = vrot.lane.b32.xlu2 %v3655_v18, %s3883_s30  ;;  %2697 = vmatpush.bf16.msrb.mxu2 %v3428_v15  ;;  %v3577_v18 = vld [vmem:[%s5282_s15 + $0x64] sm:$0xf0] }
 0xdb4   :  { %v3416_v17 = vor.u32 %v3577_v18, %v3415_v22 }
 0xdbf   :  { %v3632_v42 = vpop.permute.xlu2 %3631 }
 0xdc0   :  { %v3634_v30 = vunpack.i.h.bf16 %v3632_v42  ;;  %v3633_v25 = vunpack.i.l.bf16 %v3632_v42  ;;  %v3408_v42 = vor.u32 %v3575_v12, %v3407_v37 }
 0xdc2   :  { %v2465_v28 = vsel %vm89_vm0, %v2060_v59, %v3634_v30  ;;  %v2464_v8 = vsel %vm89_vm0, %v2058_v58, %v3633_v25 }
 0xdc3   :  { %v2295_v14 = vpop.f32.mrf.mxu1 }
 0xdcb   :  { %v2297_v52 = vpop.f32.mrf.mxu1 }
 0xdcc   :  { %v3650_v41 = vpack.i.bf16 %v2297_v52, %v2295_v14  ;;  %v3576_v14 = vld [vmem:[%s5282_s15 + $0x64] sm:$0xf]  ;;  %v3417_v52 = vld [vmem:[%s5282_s15 + $0x68] sm:$0xf0] }
 0xdce   :  { %3651 = vrot.lane.b32.xlu0 %v3650_v41, %s3878_s27  ;;  %v3420_v41 = vor.u32 %v3576_v14, %v3417_v52 }
 0xdcf   :  { %v3647_v1 = vpop.permute.xlu2 %3646 }
 0xdd0   :  { %v3649_v20 = vunpack.i.h.bf16 %v3647_v1  ;;  %v3648_v21 = vunpack.i.l.bf16 %v3647_v1  ;;  %2698 = vmatpush.bf16.msrb.mxu2 %v3420_v41 }
 0xdd2   :  { %v2467_v34 = vsel %vm89_vm0, %v2065_v54, %v3649_v20  ;;  %v2466_v48 = vsel %vm89_vm0, %v2063_v44, %v3648_v21 }
 0xde7   :  { %v3637_v29 = vpop.permute.xlu0 %3636 }
 0xde8   :  { %v3639_v39 = vunpack.i.h.bf16 %v3637_v29  ;;  %v3638_v7 = vunpack.i.l.bf16 %v3637_v29  ;;  %v3409_v29 = vld [vmem:[%s5282_s15 + $0x58] sm:$0xf0] }
 0xde9   :  { %v3412_v30 = vor.u32 %v3574_v16, %v3409_v29  ;;  %v3587_v29 = vld [vmem:[%s5283_s16 + $0x78] sm:$0xff] }
 0xdea   :  { %v2469_v3 = vsel %vm159_vm1, %v2465_v28, %v3639_v39  ;;  %v2468_v19 = vsel %vm159_vm1, %v2464_v8, %v3638_v7  ;;  %v3399_v39 = vld [vmem:[%s5282_s15 + $0x40] sm:$0xf]  ;;  %v3573_v7 = vld [vmem:[%s5282_s15 + $0x44] sm:$0xf0]  ;;  %2863 = vmatpush.bf16.msra.mxu0 %v3587_v29 }
 0xdeb   :  { %2699 = vmatpush.bf16.msrb.mxu2 %v3412_v30  ;;  %v3400_v8 = vor.u32 %v3573_v7, %v3399_v39  ;;  %v3586_v30 = vld [vmem:[%s5283_s16 + $0x70] sm:$0xff]  ;;  %v3584_v39 = vld [vmem:[%s5283_s16 + $0x60] sm:$0xff]  ;;  %v3583_v7 = vld [vmem:[%s5283_s16 + $0x58] sm:$0xff] }
 0xdee   :  { %2864 = vmatpush.bf16.msra.mxu0 %v3586_v30 }
 0xdff   :  { %v3642_v46 = vpop.permute.xlu1 %3641 }
 0xe00   :  { %v3644_v35 = vunpack.i.h.bf16 %v3642_v46  ;;  %v3643_v26 = vunpack.i.l.bf16 %v3642_v46  ;;  %v3572_v46 = vld [vmem:[%s5282_s15 + $0x44] sm:$0xf] }
 0xe02   :  { %v2473_v24 = vsel %vm1232_vm4, %v2469_v3, %v3644_v35  ;;  %v2472_v10 = vsel %vm1232_vm4, %v2468_v19, %v3643_v26  ;;  %v3401_v35 = vld [vmem:[%s5282_s15 + $0x48] sm:$0xf0] }
 0xe03   :  { %v2476_v23 = vpack.c.bf16 %v2473_v24, %v2472_v10  ;;  %v3404_v26 = vor.u32 %v3572_v46, %v3401_v35  ;;  %v3582_v46 = vld [vmem:[%s5283_s16 + $0x50] sm:$0xff]  ;;  %v3581_v35 = vld [vmem:[%s5283_s16 + $0x48] sm:$0xff] }
 0xe05   :  { %3386 = vmatmul.msk.bf16.vlgmr.msrb.gmra.mxu3 %vm164_vm2, %v2476_v23  ;;  %2700 = vmatpush.bf16.msrb.mxu2 %v3404_v26  ;;  %v3580_v26 = vld [vmem:[%s5283_s16 + $0x40] sm:$0xff] }
 0xe0d   :  { %v3657_v36 = vpop.permute.xlu2 %3656 }
 0xe0e   :  { %v3659_v5 = vunpack.i.h.bf16 %v3657_v36  ;;  %v3658_v2 = vunpack.i.l.bf16 %v3657_v36 }
 0xe40   :  { %v3652_v33 = vpop.permute.xlu0 %3651 }
 0xe41   :  { %v3654_v51 = vunpack.i.h.bf16 %v3652_v33  ;;  %v3653_v50 = vunpack.i.l.bf16 %v3652_v33 }
 0xe43   :  { %v2471_v27 = vsel %vm159_vm1, %v2467_v34, %v3654_v51  ;;  %v2470_v47 = vsel %vm159_vm1, %v2466_v48, %v3653_v50 }
 0xe44   :  { %v2474_v53 = vsel %vm1232_vm4, %v2470_v47, %v3658_v2  ;;  %v2475_v62 = vsel %vm1232_vm4, %v2471_v27, %v3659_v5  ;;  %v3664_v47 = vld [vmem:[%s5301_s20 + $0x1] ss:$0 sm:$0xff] }
 0xe45   :  { %v2477_v43 = vpack.c.bf16 %v2475_v62, %v2474_v53 }
 0xe47   :  { %3387 = vmatmul.msk.bf16.gmra.mxu3 %vm164_vm2, %v2477_v43 }
 0xe88   :  { %v2526_v55 = vpop.f32.mrf.mxu3 }
 0xe89   :  { %v5106_v58 = vadd.f32 %v2526_v55, %v4691_v11 }
 0xe8b   :  { %v2542_v59 = vmul.f32 %v5106_v58, %v5106_v58 }
 0xe8d   :  { %v2546_v44 = vsel %vm164_vm2, %v2542_v59, 0.0 }
 0xe8e   :  { %2547 = vadd.xlane.f32.xlu0 %v2546_v44 }
 0xe90   :  { %v2528_v61 = vpop.f32.mrf.mxu3 }
 0xe91   :  { %v5112_v54 = vadd.f32 %v2528_v61, %v4697_v63 }
 0xe93   :  { %v2543_v40 = vmul.f32 %v5112_v54, %v5112_v54 }
 0xe95   :  { %v2549_v9 = vsel %vm164_vm2, %v2543_v40, 0.0 }
 0xe96   :  { %2550 = vadd.xlane.f32.xlu1 %v2549_v9 }
 0xeca   :  { %v2531_v13 = vpop.f32.mrf.mxu3 }
 0xecb   :  { %v5118_v11 = vadd.f32 %v2531_v13, %v4703_v31  ;;  %v3423_v31 = vld [vmem:[%s5282_s15 + $0x70] sm:$0xf] }
 0xecd   :  { %v2544_v32 = vmul.f32 %v5118_v11, %v5118_v11 }
 0xecf   :  { %v2552_v4 = vsel %vm164_vm2, %v2544_v32, 0.0 }
 0xed0   :  { %2553 = vadd.xlane.f32.xlu2 %v2552_v4 }
 0xed2   :  { %v2533_v49 = vpop.f32.mrf.mxu3 }
 0xed3   :  { %v5124_v63 = vadd.f32 %v2533_v49, %v4709_v45  ;;  %v3424_v45 = vor.u32 %v3579_v57, %v3423_v31 }
 0xed5   :  { %v2545_v38 = vmul.f32 %v5124_v63, %v5124_v63  ;;  %2678 = vmatpush.bf16.msrb.mxu1 %v3424_v45 }
 0xed7   :  { %v2555_v60 = vsel %vm164_vm2, %v2545_v38, 0.0 }
 0xed8   :  { %2556 = vadd.xlane.f32.xlu0 %v2555_v60 }
 0xed9   :  { %2679 = vmatpush.bf16.msrb.mxu1 %v3416_v17 }
 0xedd   :  { %2680 = vmatpush.bf16.msrb.mxu1 %v3408_v42 }
 0xee1   :  { %2681 = vmatpush.bf16.msrb.mxu1 %v3400_v8 }
 0xf01   :  { %v2548_v25 = vpop.xlane.xlu0 %2547 }
 0xf02   :  { %v2558_v28 = vmul.f32 %v2548_v25, %v4180_v56  ;;  %v3585_v25 = vld [vmem:[%s5283_s16 + $0x68] sm:$0xff] }
 0xf03   :  { %2865 = vmatpush.bf16.msra.mxu0 %v3585_v25 }
 0xf04   :  { %v2562_v3 = vadd.f32 1e-06, %v2558_v28 }
 0xf06   :  { %3836 = vrsqrt.f32 %v2562_v3  ;;  %vm2572_vm1 = vweird.f32 %v2562_v3 }
 0xf07   :  { %2866 = vmatpush.bf16.msra.mxu0 %v3584_v39 }
 0xf09   :  { %v2551_v19 = vpop.xlane.xlu1 %2550 }
 0xf0a   :  { %v2559_v24 = vmul.f32 %v2551_v19, %v4180_v56 }
 0xf0b   :  { %2867 = vmatpush.bf16.msra.mxu0 %v3583_v7 }
 0xf0c   :  { %v3837_v10 = vpop.eup %3836  ;;  %v2563_v23 = vadd.f32 1e-06, %v2559_v24 }
 0xf0d   :  { %v2567_v1 = vmul.f32 %v3837_v10, %v2562_v3  ;;  %vm2573_vm0 = vweird.f32 %v3837_v10 }
 0xf0e   :  { %3838 = vrsqrt.f32 %v2563_v23  ;;  %vm2574_vm4 = vmor %vm2572_vm1, %vm2573_vm0  ;;  %vm2582_vm10 = vweird.f32 %v2563_v23 }
 0xf0f   :  { %v2568_v20 = vmul.f32 %v3837_v10, %v2567_v1  ;;  %2868 = vmatpush.bf16.msra.mxu0 %v3582_v46 }
 0xf11   :  { %v2569_v21 = vmul.f32 0.5, %v2568_v20 }
 0xf13   :  { %v2570_v36 = vsub.f32 1.5, %v2569_v21  ;;  %2869 = vmatpush.bf16.msra.mxu0 %v3581_v35 }
 0xf14   :  { %v3839_v33 = vpop.eup %3838 }
 0xf15   :  { %v2577_v51 = vmul.f32 %v3839_v33, %v2563_v23  ;;  %v2571_v50 = vmul.f32 %v3837_v10, %v2570_v36  ;;  %vm2583_vm9 = vweird.f32 %v3839_v33 }
 0xf16   :  { %vm2584_vm11 = vmor %vm2582_vm10, %vm2583_vm9 }
 0xf17   :  { %v2578_v34 = vmul.f32 %v3839_v33, %v2577_v51  ;;  %v2575_v5 = vsel %vm2574_vm4, %v3837_v10, %v2571_v50  ;;  %2870 = vmatpush.bf16.msra.mxu0 %v3580_v26 }
 0xf18   :  { %v2606_v53 = vmul.f32 %v2575_v5, %v5106_v58 }
 0xf19   :  { %v2579_v48 = vmul.f32 0.5, %v2578_v34 }
 0xf1a   :  { %v2613_v55 = vmul.f32 %v3664_v47, %v2606_v53 }
 0xf1b   :  { %v2580_v2 = vsub.f32 1.5, %v2579_v48 }
 0xf1d   :  { %v2581_v27 = vmul.f32 %v3839_v33, %v2580_v2 }
 0xf1f   :  { %v2585_v62 = vsel %vm2584_vm11, %v3839_v33, %v2581_v27 }
 0xf20   :  { %v2607_v43 = vmul.f32 %v2585_v62, %v5112_v54 }
 0xf22   :  { %v2614_v59 = vmul.f32 %v3664_v47, %v2607_v43 }
 0xf24   :  { %v2617_v44 = vpack.c.bf16 %v2614_v59, %v2613_v55 }
 0xf26   :  { %3429 = vmatmul.msk.bf16.vlgmr.msrb.gmra.mxu1 %vm164_vm2, %v2617_v44  ;;  %3431 = vmatmul.msk.bf16.vlgmr.msrb.gmra.mxu2 %vm164_vm2, %v2617_v44 }
 0xf43   :  { %v2554_v61 = vpop.xlane.xlu2 %2553 }
 0xf44   :  { %v2560_v40 = vmul.f32 %v2554_v61, %v4180_v56 }
 0xf46   :  { %v2564_v9 = vadd.f32 1e-06, %v2560_v40 }
 0xf48   :  { %3840 = vrsqrt.f32 %v2564_v9  ;;  %vm2592_vm13 = vweird.f32 %v2564_v9 }
 0xf4b   :  { %v2557_v13 = vpop.xlane.xlu0 %2556 }
 0xf4c   :  { %v2561_v32 = vmul.f32 %v2557_v13, %v4180_v56 }
 0xf4e   :  { %v3841_v4 = vpop.eup %3840  ;;  %v2565_v49 = vadd.f32 1e-06, %v2561_v32 }
 0xf4f   :  { %v2587_v38 = vmul.f32 %v3841_v4, %v2564_v9  ;;  %vm2593_vm12 = vweird.f32 %v3841_v4 }
 0xf50   :  { %3842 = vrsqrt.f32 %v2565_v49  ;;  %vm2594_vm14 = vmor %vm2592_vm13, %vm2593_vm12  ;;  %vm2602_vm3 = vweird.f32 %v2565_v49 }
 0xf51   :  { %v2588_v60 = vmul.f32 %v3841_v4, %v2587_v38 }
 0xf53   :  { %v2589_v31 = vmul.f32 0.5, %v2588_v60 }
 0xf55   :  { %v2590_v57 = vsub.f32 1.5, %v2589_v31 }
 0xf56   :  { %v3843_v6 = vpop.eup %3842 }
 0xf57   :  { %v2597_v45 = vmul.f32 %v3843_v6, %v2565_v49  ;;  %v2591_v0 = vmul.f32 %v3841_v4, %v2590_v57  ;;  %vm2603_vm15 = vweird.f32 %v3843_v6 }
 0xf58   :  { %vm2604_vm5 = vmor %vm2602_vm3, %vm2603_vm15 }
 0xf59   :  { %v2598_v15 = vmul.f32 %v3843_v6, %v2597_v45  ;;  %v2595_v18 = vsel %vm2594_vm14, %v3841_v4, %v2591_v0 }
 0xf5a   :  { %v2608_v52 = vmul.f32 %v2595_v18, %v5118_v11 }
 0xf5b   :  { %v2599_v22 = vmul.f32 0.5, %v2598_v15 }
 0xf5c   :  { %v2615_v12 = vmul.f32 %v3664_v47, %v2608_v52 }
 0xf5d   :  { %v2600_v14 = vsub.f32 1.5, %v2599_v22 }
 0xf5f   :  { %v2601_v17 = vmul.f32 %v3843_v6, %v2600_v14 }
 0xf61   :  { %v2605_v41 = vsel %vm2604_vm5, %v3843_v6, %v2601_v17 }
 0xf62   :  { %v2609_v37 = vmul.f32 %v2605_v41, %v5124_v63 }
 0xf64   :  { %v2616_v16 = vmul.f32 %v3664_v47, %v2609_v37 }
 0xf66   :  { %v2618_v42 = vpack.c.bf16 %v2616_v16, %v2615_v12 }
 0xf68   :  { %3430 = vmatmul.msk.bf16.gmra.mxu1 %vm164_vm2, %v2618_v42  ;;  %3432 = vmatmul.msk.bf16.gmra.mxu2 %vm164_vm2, %v2618_v42 }
 0xfa3   :  { %v2683_v28 = vpop.f32.mrf.mxu1 }
 0xfa4   :  { %v3433_v8 = vmul.f32 -1.442695, %v2683_v28 }
 0xfa6   :  { %3844 = vpow2.f32 %v3433_v8 }
 0xfa9   :  { %v2702_v2 = vpop.f32.mrf.mxu2 }
 0xfab   :  { %v2685_v3 = vpop.f32.mrf.mxu1 }
 0xfac   :  { %v3845_v19 = vpop.eup %3844  ;;  %v3434_v24 = vmul.f32 -1.442695, %v2685_v3 }
 0xfad   :  { %v2724_v10 = vadd.f32 1.0, %v3845_v19 }
 0xfae   :  { %3846 = vpow2.f32 %v3434_v24 }
 0xfaf   :  { %3848 = vrcp.f32 %v2724_v10  ;;  %v2739_v34 = vand.u32 2147483648, %v2724_v10  ;;  %vm2733_vm7 = vweird.f32 %v2724_v10  ;;  %v2737_v48 = vand.u32 2147483647, %v2724_v10 }
 0xfb1   :  { %v2740_v53 = vor.u32 1.1754944e-38, %v2739_v34  ;;  %vm2738_vm0 = vcmp.eq.f32.partialorder %v2737_v48, 8.507059e+37  ;;  %v2704_v4 = vpop.f32.mrf.mxu2 }
 0xfb4   :  { %v3847_v23 = vpop.eup %3846 }
 0xfb5   :  { %v3849_v1 = vpop.eup %3848  ;;  %v2725_v20 = vadd.f32 1.0, %v3847_v23 }
 0xfb6   :  { %v2729_v21 = vmul.f32 %v3849_v1, %v2724_v10  ;;  %vm2734_vm6 = vweird.f32 %v3849_v1 }
 0xfb7   :  { %3850 = vrcp.f32 %v2725_v20  ;;  %vm2735_vm8 = vmor %vm2733_vm7, %vm2734_vm6  ;;  %v2754_v62 = vand.u32 2147483648, %v2725_v20  ;;  %v2752_v55 = vand.u32 2147483647, %v2725_v20  ;;  %vm2748_vm4 = vweird.f32 %v2725_v20 }
 0xfb8   :  { %v2730_v36 = vsub.f32 1.0, %v2729_v21 }
 0xfb9   :  { %v2755_v61 = vor.u32 1.1754944e-38, %v2754_v62  ;;  %vm2753_vm10 = vcmp.eq.f32.partialorder %v2752_v55, 8.507059e+37 }
 0xfba   :  { %v2731_v33 = vmul.f32 %v3849_v1, %v2730_v36 }
 0xfbc   :  { %v2732_v51 = vadd.f32 %v3849_v1, %v2731_v33 }
 0xfbd   :  { %v3851_v50 = vpop.eup %3850 }
 0xfbe   :  { %v2744_v5 = vmul.f32 %v3851_v50, %v2725_v20  ;;  %v2736_v27 = vsel %vm2735_vm8, %v3849_v1, %v2732_v51  ;;  %vm2749_vm1 = vweird.f32 %v3851_v50 }
 0xfbf   :  { %v2741_v59 = vsel %vm2738_vm0, %v2740_v53, %v2736_v27  ;;  %vm2750_vm9 = vmor %vm2748_vm4, %vm2749_vm1 }
 0xfc0   :  { %v2745_v47 = vsub.f32 1.0, %v2744_v5  ;;  %v2788_v40 = vmul.f32 %v2741_v59, %v2683_v28 }
 0xfc2   :  { %v2746_v43 = vmul.f32 %v3851_v50, %v2745_v47  ;;  %v2792_v49 = vmul.f32 %v2788_v40, %v2702_v2 }
 0xfc4   :  { %v2747_v44 = vadd.f32 %v3851_v50, %v2746_v43 }
 0xfc6   :  { %v2751_v9 = vsel %vm2750_vm9, %v3851_v50, %v2747_v44  ;;  %v3590_v44 = vld [vmem:[%s5285_s18 + $0x10] sm:$0xff] }
 0xfc7   :  { %v2756_v13 = vsel %vm2753_vm10, %v2755_v61, %v2751_v9  ;;  %v3588_v9 = vld [vmem:[%s5285_s18] sm:$0xff] }
 0xfc8   :  { %v2789_v32 = vmul.f32 %v2756_v13, %v2685_v3 }
 0xfca   :  { %v2793_v38 = vmul.f32 %v2789_v32, %v2704_v4 }
 0xfcc   :  { %v2796_v60 = vpack.c.bf16 %v2793_v38, %v2792_v49 }
 0xfce   :  { %2871 = vmatmul.bf16.vlgmr.msra.gmra.mxu0 %v2796_v60 }
 0xfe5   :  { %v2688_v31 = vpop.f32.mrf.mxu1 }
 0xfe6   :  { %v3435_v57 = vmul.f32 -1.442695, %v2688_v31 }
 0xfe8   :  { %3852 = vpow2.f32 %v3435_v57 }
 0xfeb   :  { %v2707_v30 = vpop.f32.mrf.mxu2 }
 0xfed   :  { %v2690_v6 = vpop.f32.mrf.mxu1 }
 0xfee   :  { %v3853_v45 = vpop.eup %3852  ;;  %v3436_v0 = vmul.f32 -1.442695, %v2690_v6 }
 0xfef   :  { %v2726_v15 = vadd.f32 1.0, %v3853_v45 }
 0xff0   :  { %3854 = vpow2.f32 %v3436_v0 }
 0xff1   :  { %3856 = vrcp.f32 %v2726_v15  ;;  %v2769_v16 = vand.u32 2147483648, %v2726_v15  ;;  %vm2763_vm12 = vweird.f32 %v2726_v15  ;;  %v2767_v42 = vand.u32 2147483647, %v2726_v15 }
 0xff3   :  { %v2770_v7 = vor.u32 1.1754944e-38, %v2769_v16  ;;  %vm2768_vm14 = vcmp.eq.f32.partialorder %v2767_v42, 8.507059e+37  ;;  %v2709_v1 = vpop.f32.mrf.mxu2 }
 0xff6   :  { %v3855_v22 = vpop.eup %3854 }
 0xff7   :  { %v3857_v18 = vpop.eup %3856  ;;  %v2727_v14 = vadd.f32 1.0, %v3855_v22 }
 0xff8   :  { %v2759_v17 = vmul.f32 %v3857_v18, %v2726_v15  ;;  %vm2764_vm11 = vweird.f32 %v3857_v18 }
 0xff9   :  { %3858 = vrcp.f32 %v2727_v14  ;;  %vm2765_vm13 = vmor %vm2763_vm12, %vm2764_vm11  ;;  %v2784_v46 = vand.u32 2147483648, %v2727_v14  ;;  %v2782_v8 = vand.u32 2147483647, %v2727_v14  ;;  %vm2778_vm3 = vweird.f32 %v2727_v14 }
 0xffa   :  { %v2760_v52 = vsub.f32 1.0, %v2759_v17 }
 0xffb   :  { %v2785_v3 = vor.u32 1.1754944e-38, %v2784_v46  ;;  %vm2783_vm6 = vcmp.eq.f32.partialorder %v2782_v8, 8.507059e+37 }
 0xffc   :  { %v2761_v41 = vmul.f32 %v3857_v18, %v2760_v52 }
 0xffe   :  { %v2762_v37 = vadd.f32 %v3857_v18, %v2761_v41  ;;  %v3665_v41 = vld [vmem:[%s5284_s17] ss:$0 sm:$0xff] }
 0xfff   :  { %v3859_v12 = vpop.eup %3858 }
0x1000   :  { %v2774_v29 = vmul.f32 %v3859_v12, %v2727_v14  ;;  %v2766_v25 = vsel %vm2765_vm13, %v3857_v18, %v2762_v37  ;;  %vm2779_vm15 = vweird.f32 %v3859_v12 }
0x1001   :  { %v2771_v35 = vsel %vm2768_vm14, %v2770_v7, %v2766_v25  ;;  %vm2780_vm5 = vmor %vm2778_vm3, %vm2779_vm15 }
0x1002   :  { %v2775_v39 = vsub.f32 1.0, %v2774_v29  ;;  %v2790_v19 = vmul.f32 %v2771_v35, %v2688_v31 }
0x1004   :  { %v2776_v28 = vmul.f32 %v3859_v12, %v2775_v39  ;;  %v2794_v20 = vmul.f32 %v2790_v19, %v2707_v30 }
0x1006   :  { %v2777_v26 = vadd.f32 %v3859_v12, %v2776_v28 }
0x1008   :  { %v2781_v24 = vsel %vm2780_vm5, %v3859_v12, %v2777_v26 }
0x1009   :  { %v2786_v10 = vsel %vm2783_vm6, %v2785_v3, %v2781_v24 }
0x100a   :  { %v2791_v23 = vmul.f32 %v2786_v10, %v2690_v6 }
0x100c   :  { %v2795_v21 = vmul.f32 %v2791_v23, %v2709_v1 }
0x100e   :  { %v2797_v36 = vpack.c.bf16 %v2795_v21, %v2794_v20 }
0x1010   :  { %2876 = vmatmul.bf16.gmra.mxu0 %v2797_v36 }
0x104b   :  { %v2872_v33 = vpop.f32.mrf.mxu0 }
0x104c   :  { %v2882_v51 = vadd.f32 %v2872_v33, %v5106_v58 }
0x104e   :  { %v2887_v50 = vmul.f32 %v2882_v51, %v2882_v51 }
0x1050   :  { %v2891_v34 = vsel %vm164_vm2, %v2887_v50, 0.0 }
0x1051   :  { %2892 = vadd.xlane.f32.xlu1 %v2891_v34 }
0x1053   :  { %v2874_v48 = vpop.f32.mrf.mxu0 }
0x1054   :  { %v2883_v5 = vadd.f32 %v2874_v48, %v5112_v54 }
0x1056   :  { %v2888_v2 = vmul.f32 %v2883_v5, %v2883_v5 }
0x1058   :  { %v2894_v27 = vsel %vm164_vm2, %v2888_v2, 0.0 }
0x1059   :  { %2895 = vadd.xlane.f32.xlu2 %v2894_v27 }
0x108d   :  { %v2877_v47 = vpop.f32.mrf.mxu0 }
0x108e   :  { %v5221_v53 = vadd.f32 %v2877_v47, %v5118_v11  ;;  %v3591_v11 = vld [vmem:[%s5285_s18 + $0x18] sm:$0xff] }
0x108f   :  { %3006 = vmatpush.bf16.msra.mxu3 %v3591_v11 }
0x1090   :  { %v2889_v62 = vmul.f32 %v5221_v53, %v5221_v53 }
0x1092   :  { %v2897_v58 = vsel %vm164_vm2, %v2889_v62, 0.0 }
0x1093   :  { %2898 = vadd.xlane.f32.xlu0 %v2897_v58  ;;  %3007 = vmatpush.bf16.msra.mxu3 %v3590_v44 }
0x1095   :  { %v2879_v43 = vpop.f32.mrf.mxu0 }
0x1096   :  { %v5227_v55 = vadd.f32 %v2879_v43, %v5124_v63  ;;  %v3589_v63 = vld [vmem:[%s5285_s18 + $0x8] sm:$0xff] }
0x1097   :  { %3008 = vmatpush.bf16.msra.mxu3 %v3589_v63 }
0x1098   :  { %v2890_v54 = vmul.f32 %v5227_v55, %v5227_v55 }
0x109a   :  { %v2900_v59 = vsel %vm164_vm2, %v2890_v54, 0.0 }
0x109b   :  { %2901 = vadd.xlane.f32.xlu1 %v2900_v59  ;;  %3009 = vmatpush.bf16.msra.mxu3 %v3588_v9 }
0x10c4   :  { %v2893_v61 = vpop.xlane.xlu1 %2892 }
0x10c5   :  { %v2903_v40 = vmul.f32 %v2893_v61, %v4180_v56 }
0x10c7   :  { %v2907_v13 = vadd.f32 1e-06, %v2903_v40 }
0x10c9   :  { %3860 = vrsqrt.f32 %v2907_v13  ;;  %vm2917_vm8 = vweird.f32 %v2907_v13 }
0x10cc   :  { %v2896_v32 = vpop.xlane.xlu2 %2895 }
0x10cd   :  { %v2904_v4 = vmul.f32 %v2896_v32, %v4180_v56 }
0x10cf   :  { %v3861_v49 = vpop.eup %3860  ;;  %v2908_v38 = vadd.f32 1e-06, %v2904_v4 }
0x10d0   :  { %v2912_v60 = vmul.f32 %v3861_v49, %v2907_v13  ;;  %vm2918_vm7 = vweird.f32 %v3861_v49 }
0x10d1   :  { %3862 = vrsqrt.f32 %v2908_v38  ;;  %vm2919_vm0 = vmor %vm2917_vm8, %vm2918_vm7  ;;  %vm2927_vm4 = vweird.f32 %v2908_v38 }
0x10d2   :  { %v2913_v31 = vmul.f32 %v3861_v49, %v2912_v60 }
0x10d4   :  { %v2914_v57 = vmul.f32 0.5, %v2913_v31 }
0x10d6   :  { %v2915_v6 = vsub.f32 1.5, %v2914_v57 }
0x10d7   :  { %v3863_v45 = vpop.eup %3862 }
0x10d8   :  { %v2922_v0 = vmul.f32 %v3863_v45, %v2908_v38  ;;  %v2916_v15 = vmul.f32 %v3861_v49, %v2915_v6  ;;  %vm2928_vm1 = vweird.f32 %v3863_v45 }
0x10d9   :  { %vm2929_vm9 = vmor %vm2927_vm4, %vm2928_vm1 }
0x10da   :  { %v2923_v22 = vmul.f32 %v3863_v45, %v2922_v0  ;;  %v2920_v14 = vsel %vm2919_vm0, %v3861_v49, %v2916_v15 }
0x10db   :  { %v2951_v37 = vmul.f32 %v2920_v14, %v2882_v51 }
0x10dc   :  { %v2924_v18 = vmul.f32 0.5, %v2923_v22 }
0x10dd   :  { %v2958_v42 = vmul.f32 %v3665_v41, %v2951_v37 }
0x10de   :  { %v2925_v17 = vsub.f32 1.5, %v2924_v18 }
0x10e0   :  { %v2926_v52 = vmul.f32 %v3863_v45, %v2925_v17 }
0x10e2   :  { %v2930_v12 = vsel %vm2929_vm9, %v3863_v45, %v2926_v52 }
0x10e3   :  { %v2952_v16 = vmul.f32 %v2930_v12, %v2883_v5 }
0x10e5   :  { %v2959_v29 = vmul.f32 %v3665_v41, %v2952_v16 }
0x10e7   :  { %v2962_v30 = vpack.c.bf16 %v2959_v29, %v2958_v42 }
0x10e9   :  { %3501 = vmatmul.msk.bf16.vlgmr.msra.gmra.mxu3 %vm164_vm2, %v2962_v30 }
0x1106   :  { %v2899_v25 = vpop.xlane.xlu0 %2898 }
0x1107   :  { %v2905_v39 = vmul.f32 %v2899_v25, %v4180_v56 }
0x1109   :  { %v2909_v7 = vadd.f32 1e-06, %v2905_v39 }
0x110b   :  { %3864 = vrsqrt.f32 %v2909_v7  ;;  %vm2937_vm11 = vweird.f32 %v2909_v7 }
0x110e   :  { %v2902_v46 = vpop.xlane.xlu1 %2901 }
0x110f   :  { %v2906_v28 = vmul.f32 %v2902_v46, %v4180_v56 }
0x1111   :  { %v3865_v8 = vpop.eup %3864  ;;  %v2910_v35 = vadd.f32 1e-06, %v2906_v28 }
0x1112   :  { %v2932_v26 = vmul.f32 %v3865_v8, %v2909_v7  ;;  %vm2938_vm10 = vweird.f32 %v3865_v8 }
0x1113   :  { %3866 = vrsqrt.f32 %v2910_v35  ;;  %vm2939_vm12 = vmor %vm2937_vm11, %vm2938_vm10  ;;  %vm2947_vm14 = vweird.f32 %v2910_v35 }
0x1114   :  { %v2933_v3 = vmul.f32 %v3865_v8, %v2932_v26 }
0x1116   :  { %v2934_v19 = vmul.f32 0.5, %v2933_v3 }
0x1118   :  { %v2935_v24 = vsub.f32 1.5, %v2934_v19 }
0x1119   :  { %v3867_v10 = vpop.eup %3866 }
0x111a   :  { %v2942_v23 = vmul.f32 %v3867_v10, %v2910_v35  ;;  %v2936_v1 = vmul.f32 %v3865_v8, %v2935_v24  ;;  %vm2948_vm13 = vweird.f32 %v3867_v10 }
0x111b   :  { %vm2949_vm15 = vmor %vm2947_vm14, %vm2948_vm13 }
0x111c   :  { %v2943_v20 = vmul.f32 %v3867_v10, %v2942_v23  ;;  %v2940_v36 = vsel %vm2939_vm12, %v3865_v8, %v2936_v1 }
0x111d   :  { %v2953_v56 = vmul.f32 %v2940_v36, %v5221_v53 }
0x111e   :  { %v2944_v21 = vmul.f32 0.5, %v2943_v20 }
0x111f   :  { %v2960_v48 = vmul.f32 %v3665_v41, %v2953_v56 }
0x1120   :  { %v2945_v33 = vsub.f32 1.5, %v2944_v21 }
0x1122   :  { %v2946_v51 = vmul.f32 %v3867_v10, %v2945_v33 }
0x1124   :  { %v2950_v50 = vsel %vm2949_vm15, %v3867_v10, %v2946_v51 }
0x1125   :  { %v2954_v34 = vmul.f32 %v2950_v50, %v5227_v55 }
0x1127   :  { %v2961_v5 = vmul.f32 %v3665_v41, %v2954_v34 }
0x1129   :  { %v2963_v2 = vpack.c.bf16 %v2961_v5, %v2960_v48 }
0x112b   :  { %3502 = vmatmul.msk.bf16.gmra.mxu3 %vm164_vm2, %v2963_v2 }
0x116c   :  { %v3011_v27 = vpop.f32.mrf.mxu3 }
0x116d   :  { %3021 = vst [vmem:[%s5286_s19] sm:$0xff] %v3011_v27 }
0x1174   :  { %v3013_v47 = vpop.f32.mrf.mxu3 }
0x1175   :  { %3022 = vst [vmem:[%s5286_s19 + $0x8] sm:$0xff] %v3013_v47 }
0x11ae   :  { %v3016_v53 = vpop.f32.mrf.mxu3 }
0x11af   :  { %3023 = vst [vmem:[%s5286_s19 + $0x10] sm:$0xff] %v3016_v53 }
0x11b6   :  { %v3018_v62 = vpop.f32.mrf.mxu3 }
0x11b7   :  { %3024 = vst [vmem:[%s5286_s19 + $0x18] sm:$0xff] %v3018_v62 }

</bundles_post_ra>
